<compile_context>
chip_gen: v7x
topology: tpu7x:2x2x1
jax: 0.10.0
libtpu: 0.0.40
codegen_flags: <defaults>
</compile_context>

<pallas_src>
import functools
import math

import jax
import jax.numpy as jnp
from jax.experimental import pallas as pl
from jax.experimental.pallas import tpu as pltpu


# ----------------------------------------------------------------------------
# Pallas kernels: K-tiled matmul with f32 VMEM accumulator + fused epilogue
#   out = maybe_relu((x @ w) * scale + shift [+ residual])
# x / w / residual arrive as bf16; accumulate & epilogue in f32; store bf16.
# ----------------------------------------------------------------------------
def _mm_affine_kernel(x_ref, w_ref, scale_ref, shift_ref, o_ref, acc_ref, *, relu):
    @pl.when(pl.program_id(2) == 0)
    def _():
        acc_ref[...] = jnp.zeros_like(acc_ref)

    acc_ref[...] += jnp.dot(x_ref[...], w_ref[...],
                            preferred_element_type=jnp.float32)

    @pl.when(pl.program_id(2) == pl.num_programs(2) - 1)
    def _():
        acc = acc_ref[...] * scale_ref[...] + shift_ref[...]
        if relu:
            acc = jnp.maximum(acc, 0.0)
        o_ref[...] = acc.astype(o_ref.dtype)


def _mm_affine_res_kernel(x_ref, w_ref, scale_ref, shift_ref, res_ref, o_ref,
                          acc_ref, *, relu):
    @pl.when(pl.program_id(2) == 0)
    def _():
        acc_ref[...] = jnp.zeros_like(acc_ref)

    acc_ref[...] += jnp.dot(x_ref[...], w_ref[...],
                            preferred_element_type=jnp.float32)

    @pl.when(pl.program_id(2) == pl.num_programs(2) - 1)
    def _():
        acc = (acc_ref[...] * scale_ref[...] + shift_ref[...]
               + res_ref[...].astype(jnp.float32))
        if relu:
            acc = jnp.maximum(acc, 0.0)
        o_ref[...] = acc.astype(o_ref.dtype)


def _round_up(x, m):
    return ((x + m - 1) // m) * m


def _pick_tile(total, cap):
    """Largest multiple-of-128 divisor of `total` (itself a multiple of 128) <= cap."""
    if total <= cap:
        return total
    best = 128
    d = 128
    while d <= cap:
        if total % d == 0:
            best = d
        d += 128
    return best


def fused_matmul_pallas(x, w, scale, shift, residual=None, relu=False):
    """out = maybe_relu((x @ w) * scale + shift [+ residual]).

    x:(M,K) w:(K,N) -> (M,N) bf16.  Matmul runs in bf16 on the MXU with f32
    accumulation; the affine / residual / ReLU epilogue runs in f32.
    K and N are zero-padded to multiples of 128 for lane-dense blocks; the M
    grid is ragged (pl.cdiv) so x is never copied just to pad rows.
    """
    M, K = x.shape
    Kw, N = w.shape
    assert K == Kw, (K, Kw)

    Kp = _round_up(K, 128)
    Np = _round_up(N, 128)

    xb = x.astype(jnp.bfloat16)
    wb = w.astype(jnp.bfloat16)
    if Kp != K:
        # zero-pad the reduction dim (zeros contribute nothing to the dot)
        xb = jnp.pad(xb, ((0, 0), (0, Kp - K)))
        wb = jnp.pad(wb, ((0, Kp - K), (0, 0)))
    if Np != N:
        wb = jnp.pad(wb, ((0, 0), (0, Np - N)))
    scale2 = jnp.pad(scale.astype(jnp.float32), (0, Np - N)).reshape(1, Np)
    shift2 = jnp.pad(shift.astype(jnp.float32), (0, Np - N)).reshape(1, Np)

    resb = None
    if residual is not None:
        resb = residual.astype(jnp.bfloat16)
        if Np != N:
            resb = jnp.pad(resb, ((0, 0), (0, Np - N)))

    # Tile sizes: big M tiles feed the 256-wide MXU; N/K tiles bound VMEM
    # (important for v7x's 64 MiB) while keeping stores lane-dense.
    tm = min(512, _round_up(M, 16))          # multiple of 16 -> bf16 sublane friendly
    tn = _pick_tile(Np, 512)
    tk = _pick_tile(Kp, 2048)
    gm = pl.cdiv(M, tm)
    gn = Np // tn
    gk = Kp // tk

    in_specs = [
        pl.BlockSpec((tm, tk), lambda i, j, k: (i, k)),
        pl.BlockSpec((tk, tn), lambda i, j, k: (k, j)),
        pl.BlockSpec((1, tn), lambda i, j, k: (0, j)),
        pl.BlockSpec((1, tn), lambda i, j, k: (0, j)),
    ]
    args = [xb, wb, scale2, shift2]
    if resb is not None:
        in_specs.append(pl.BlockSpec((tm, tn), lambda i, j, k: (i, j)))
        args.append(resb)
        kernel = functools.partial(_mm_affine_res_kernel, relu=relu)
    else:
        kernel = functools.partial(_mm_affine_kernel, relu=relu)

    bytes_accessed = (xb.size * 2 + wb.size * 2 + M * Np * 2
                      + (resb.size * 2 if resb is not None else 0)
                      + scale2.size * 4 + shift2.size * 4)
    cost = pl.CostEstimate(flops=2 * M * Kp * Np, transcendentals=0,
                           bytes_accessed=int(bytes_accessed))

    out = pl.pallas_call(
        kernel,
        out_shape=jax.ShapeDtypeStruct((M, Np), jnp.bfloat16),
        grid=(gm, gn, gk),
        in_specs=in_specs,
        out_specs=pl.BlockSpec((tm, tn), lambda i, j, k: (i, j)),
        scratch_shapes=[pltpu.VMEM((tm, tn), jnp.float32)],
        compiler_params=pltpu.CompilerParams(
            dimension_semantics=("parallel", "parallel", "arbitrary")),
        cost_estimate=cost,
    )(*args)

    if Np != N:
        out = out[:, :N]
    return out


def fused_matmul_ref(x, w, scale, shift, residual=None, relu=False):
    """Pure-JAX reference with the same numerics contract (bf16 matmul, f32
    accumulate/epilogue, bf16 output) — used for the correctness check."""
    xb = x.astype(jnp.bfloat16)
    wb = w.astype(jnp.bfloat16)
    acc = jnp.dot(xb, wb, preferred_element_type=jnp.float32)
    acc = acc * scale[None, :].astype(jnp.float32) + shift[None, :].astype(jnp.float32)
    if residual is not None:
        acc = acc + residual.astype(jnp.bfloat16).astype(jnp.float32)
    if relu:
        acc = jnp.maximum(acc, 0.0)
    return acc.astype(jnp.bfloat16)


# ----------------------------------------------------------------------------
# im2col glue (plain JAX: pad + strided slicing + reshape)
# K layout is tap-major / channel-minor; weights are initialized in that layout.
# ----------------------------------------------------------------------------
def im2col_spatial(x, kh, kw, pad, stride):
    # x: (N, T, H, W, C) -> (N*T*Ho*Wo, kh*kw*C)
    N, T, H, W, C = x.shape
    xp = jnp.pad(x, ((0, 0), (0, 0), (pad, pad), (pad, pad), (0, 0)))
    Ho = (H + 2 * pad - kh) // stride + 1
    Wo = (W + 2 * pad - kw) // stride + 1
    cols = []
    for i in range(kh):
        for j in range(kw):
            cols.append(
                xp[:, :, i:i + (Ho - 1) * stride + 1:stride,
                   j:j + (Wo - 1) * stride + 1:stride, :]
            )
    patches = jnp.concatenate(cols, axis=-1)
    return patches.reshape(N * T * Ho * Wo, kh * kw * C), (Ho, Wo)


def im2col_temporal(x, kt, pad, stride):
    # x: (N, T, H, W, C) -> (N*To*H*W, kt*C)
    N, T, H, W, C = x.shape
    xp = jnp.pad(x, ((0, 0), (pad, pad), (0, 0), (0, 0), (0, 0)))
    To = (T + 2 * pad - kt) // stride + 1
    cols = [xp[:, t:t + (To - 1) * stride + 1:stride, :, :, :] for t in range(kt)]
    patches = jnp.concatenate(cols, axis=-1)
    return patches.reshape(N * To * H * W, kt * C), To


# ----------------------------------------------------------------------------
# Parameter init (deterministic, in-script; shapes follow the torch module)
# ----------------------------------------------------------------------------
def init_bn(key, c):
    k1, k2, k3, k4 = jax.random.split(key, 4)
    return dict(
        gamma=jax.random.uniform(k1, (c,), jnp.float32, 0.5, 1.5),
        beta=0.1 * jax.random.normal(k2, (c,), jnp.float32),
        mean=0.1 * jax.random.normal(k3, (c,), jnp.float32),
        var=jax.random.uniform(k4, (c,), jnp.float32, 0.5, 1.5),
    )


def bn_fold(bn, eps=1e-5):
    scale = bn["gamma"] / jnp.sqrt(bn["var"] + eps)
    shift = bn["beta"] - bn["mean"] * scale
    return scale, shift


def init_st_conv(key, cin, cout, ksz):
    """SpatioTemporalConv params.  ksz = (kt, kh, kw).  Weights stored directly
    in im2col-matmul layout: spatial (kh*kw*cin, cmid), temporal (kt*cmid, cout).
    NOTE: loading real PyTorch Conv3d weights (cout,cin,kt,kh,kw) requires a
    matching permutation to this tap-major/channel-minor layout."""
    kt, kh, kw = ksz
    cmid = int(math.floor(kt * kh * kw * cin * cout / (kh * kw * cin + kt * cout)))
    k1, k2, k3 = jax.random.split(key, 3)
    w_s = jax.random.normal(k1, (kh * kw * cin, cmid), jnp.float32) / math.sqrt(kh * kw * cin)
    w_t = jax.random.normal(k3, (kt * cmid, cout), jnp.float32) / math.sqrt(kt * cmid)
    return dict(w_s=w_s, bn_s=init_bn(k2, cmid), w_t=w_t, kt=kt, kh=kh, kw=kw)


def init_block(key, cin, cout, kernel_size, downsample):
    keys = jax.random.split(key, 6)
    pad = kernel_size // 2
    p = dict(downsample=downsample, padding=pad)
    if downsample:
        p["downsampleconv"] = init_st_conv(keys[0], cin, cout, (1, 1, 1))
        p["downsamplebn"] = init_bn(keys[1], cout)
        p["conv1_stride"] = 2
    else:
        p["conv1_stride"] = 1
    p["conv1"] = init_st_conv(keys[2], cin, cout, (kernel_size,) * 3)
    p["bn1"] = init_bn(keys[3], cout)
    p["conv2"] = init_st_conv(keys[4], cout, cout, (kernel_size,) * 3)
    p["bn2"] = init_bn(keys[5], cout)
    return p


def init_layer(key, cin, cout, kernel_size, layer_size, downsample):
    keys = jax.random.split(key, layer_size)
    return dict(
        block1=init_block(keys[0], cin, cout, kernel_size, downsample),
        blocks=[init_block(keys[i], cout, cout, kernel_size, False)
                for i in range(1, layer_size)],
    )


# ----------------------------------------------------------------------------
# Forward pass (mirrors torch SpatioTemporalConv / ResBlock / ResLayer)
# ----------------------------------------------------------------------------
def st_conv_apply(x, p, stride, padding, post_scale, post_shift,
                  residual, relu, matmul_fn):
    """relu(bn_s(spatial_conv(x))) -> temporal_conv -> post affine [+res] [+relu]."""
    kt, kh, kw = p["kt"], p["kh"], p["kw"]
    s_t, s_s = stride      # temporal stride, spatial stride
    p_t, p_s = padding     # temporal padding, spatial padding
    N = x.shape[0]
    T = x.shape[1]

    # spatial (1,kh,kw) conv + internal BN + ReLU  (fused matmul kernel)
    xc, (ho, wo) = im2col_spatial(x, kh, kw, p_s, s_s)
    s_scale, s_shift = bn_fold(p["bn_s"])
    cmid = p["w_s"].shape[1]
    mid = matmul_fn(xc, p["w_s"], s_scale, s_shift, relu=True)
    mid = mid.reshape(N, T, ho, wo, cmid)          # bf16 hand-off

    # temporal (kt,1,1) conv + post affine (+ residual) (+ ReLU)  (fused matmul kernel)
    xt, to = im2col_temporal(mid, kt, p_t, s_t)
    cout = p["w_t"].shape[1]
    res2d = None if residual is None else residual.reshape(-1, cout)
    out = matmul_fn(xt, p["w_t"], post_scale, post_shift, residual=res2d, relu=relu)
    return out.reshape(N, to, ho, wo, cout)


def res_block_apply(x, bp, matmul_fn):
    pad = bp["padding"]
    s = bp["conv1_stride"]

    # res = relu1(bn1(conv1(x)))   (bn1+relu fused into conv1's temporal matmul)
    s1, b1 = bn_fold(bp["bn1"])
    res = st_conv_apply(x, bp["conv1"], stride=(s, s), padding=(pad, pad),
                        post_scale=s1, post_shift=b1, residual=None, relu=True,
                        matmul_fn=matmul_fn)

    # shortcut
    if bp["downsample"]:
        ds_scale, ds_shift = bn_fold(bp["downsamplebn"])
        shortcut = st_conv_apply(x, bp["downsampleconv"], stride=(2, 2), padding=(0, 0),
                                 post_scale=ds_scale, post_shift=ds_shift,
                                 residual=None, relu=False, matmul_fn=matmul_fn)
    else:
        shortcut = x

    # out = relu(bn2(conv2(res)) + shortcut)   (bn2 + residual + relu fused)
    s2, b2 = bn_fold(bp["bn2"])
    return st_conv_apply(res, bp["conv2"], stride=(1, 1), padding=(pad, pad),
                         post_scale=s2, post_shift=b2, residual=shortcut, relu=True,
                         matmul_fn=matmul_fn)


def res_layer_apply(x, layer_params, matmul_fn):
    x = res_block_apply(x, layer_params["block1"], matmul_fn)
    for bp in layer_params["blocks"]:
        x = res_block_apply(x, bp, matmul_fn)
    return x


# ----------------------------------------------------------------------------
# Main
# ----------------------------------------------------------------------------
if __name__ == "__main__":
    key = jax.random.PRNGKey(0)
    kx, kp, ka, kb, kc, kd = jax.random.split(key, 6)

    # ---- direct kernel self-test: exercises ragged M, K-tiled accumulation,
    #      N/K zero-padding, residual add and ReLU in one call -----------------
    Mt_, Kt_, Nt_ = 1000, 4200, 200
    xs = jax.random.normal(ka, (Mt_, Kt_), jnp.float32)
    ws = jax.random.normal(kb, (Kt_, Nt_), jnp.float32) / math.sqrt(Kt_)
    sc = jax.random.uniform(kc, (Nt_,), jnp.float32, 0.5, 1.5)
    sh = 0.1 * jax.random.normal(kd, (Nt_,), jnp.float32)
    rs = jax.random.normal(kc, (Mt_, Nt_), jnp.float32)
    got = fused_matmul_pallas(xs, ws, sc, sh, residual=rs, relu=True)
    got = jax.block_until_ready(got)
    want = fused_matmul_ref(xs, ws, sc, sh, residual=rs, relu=True)
    d = float(jnp.max(jnp.abs(got.astype(jnp.float32) - want.astype(jnp.float32))))
    if d > 1e-1:
        raise AssertionError(f"fused matmul self-test mismatch: max|diff|={d}")

    # ---- full SpatioTemporalResLayer forward ---------------------------------
    # small shapes: batch=2, in_channels=4, out_channels=8, T=4, H=W=8
    # (NTHWC here; equivalent PyTorch NCDHW input would be (2, 4, 4, 8, 8))
    Nb, Cin, Cout, T, H, W = 2, 4, 8, 4, 8, 8
    kernel_size, layer_size, downsample = 3, 2, True

    x = jax.random.normal(kx, (Nb, T, H, W, Cin), jnp.float32)
    params = init_layer(kp, Cin, Cout, kernel_size, layer_size, downsample)

    out = res_layer_apply(x, params, fused_matmul_pallas)
    out = jax.block_until_ready(out)

    # sanity check against a pure-JAX version with the same bf16 numerics
    ref = res_layer_apply(x, params, fused_matmul_ref)
    assert out.shape == ref.shape, (out.shape, ref.shape)
    max_diff = float(jnp.max(jnp.abs(out.astype(jnp.float32) - ref.astype(jnp.float32))))
    if max_diff > 1e-1:
        raise AssertionError(f"Pallas vs reference mismatch: max|diff|={max_diff}")

    print("KERNEL_OK")
</pallas_src>

<mosaic_0001>
module attributes {stable_mosaic.version = 11 : i64} {
  func.func @_mm_affine_res_kernel(%arg0: i32, %arg1: i32, %arg2: i32, %arg3: memref<512x1408xbf16, #tpu.memory_space<vmem>>, %arg4: memref<1408x256xbf16, #tpu.memory_space<vmem>>, %arg5: memref<1x256xf32, #tpu.memory_space<vmem>>, %arg6: memref<1x256xf32, #tpu.memory_space<vmem>>, %arg7: memref<512x256xbf16, #tpu.memory_space<vmem>>, %arg8: memref<512x256xbf16, #tpu.memory_space<vmem>>, %arg9: memref<512x256xf32, #tpu.memory_space<vmem>>) attributes {dimension_semantics = [#tpu.dimension_semantics<parallel>, #tpu.dimension_semantics<parallel>, #tpu.dimension_semantics<arbitrary>], iteration_bounds = array<i64: 2, 1, 3>, scalar_prefetch = 0 : i64, scratch_operands = 1 : i64, tpu.core_type = #tpu.core_type<tc>, window_params = [{transform_indices = @transform_0, window_bounds = array<i64: 512, 1408>}, {transform_indices = @transform_1, window_bounds = array<i64: 1408, 256>}, {transform_indices = @transform_2, window_bounds = array<i64: 1, 256>}, {transform_indices = @transform_3, window_bounds = array<i64: 1, 256>}, {transform_indices = @transform_4, window_bounds = array<i64: 512, 256>}, {transform_indices = @transform_5, window_bounds = array<i64: 512, 256>}]} {
    %c0_i32 = arith.constant 0 : i32
    %0 = arith.cmpi eq, %arg2, %c0_i32 : i32
    %1 = arith.extui %0 : i1 to i32
    %c0_i32_0 = arith.constant 0 : i32
    %2 = arith.cmpi ne, %1, %c0_i32_0 : i32
    scf.if %2 {
      %cst_9 = arith.constant 0.000000e+00 : f32
      %12 = vector.broadcast %cst_9 : f32 to vector<512x256xf32>
      %c0_10 = arith.constant 0 : index
      %c0_11 = arith.constant 0 : index
      %13 = vector.load %arg9[%c0_10, %c0_11] : memref<512x256xf32, #tpu.memory_space<vmem>>, vector<512x256xf32>
      tpu.vector_store %arg9[%c0_10, %c0_11], %12 {strides = array<i32>} : memref<512x256xf32, #tpu.memory_space<vmem>>, vector<512x256xf32>,
    } else {
    }
    %c0 = arith.constant 0 : index
    %c0_1 = arith.constant 0 : index
    %3 = vector.load %arg9[%c0, %c0_1] : memref<512x256xf32, #tpu.memory_space<vmem>>, vector<512x256xf32>
    %c0_2 = arith.constant 0 : index
    %c0_3 = arith.constant 0 : index
    %4 = vector.load %arg3[%c0_2, %c0_3] : memref<512x1408xbf16, #tpu.memory_space<vmem>>, vector<512x1408xbf16>
    %c0_4 = arith.constant 0 : index
    %c0_5 = arith.constant 0 : index
    %5 = vector.load %arg4[%c0_4, %c0_5] : memref<1408x256xbf16, #tpu.memory_space<vmem>>, vector<1408x256xbf16>
    %cst = arith.constant dense<0.000000e+00> : vector<512x256xf32>
    %6 = tpu.matmul %4, %5, %cst {dimension_numbers = #tpu.dot_dimension_numbers<[1], [0], [0], [1], [0, 0, 1, 1], [], []>} : vector<512x1408xbf16>, vector<1408x256xbf16>, vector<512x256xf32> -> vector<512x256xf32>
    %7 = arith.addf %3, %6 : vector<512x256xf32>
    %c0_6 = arith.constant 0 : index
    %c0_7 = arith.constant 0 : index
    %8 = vector.load %arg9[%c0_6, %c0_7] : memref<512x256xf32, #tpu.memory_space<vmem>>, vector<512x256xf32>
    tpu.vector_store %arg9[%c0_6, %c0_7], %7 {strides = array<i32>} : memref<512x256xf32, #tpu.memory_space<vmem>>, vector<512x256xf32>,
    %c2_i32 = arith.constant 2 : i32
    %9 = arith.cmpi eq, %arg2, %c2_i32 : i32
    %10 = arith.extui %9 : i1 to i32
    %c0_i32_8 = arith.constant 0 : i32
    %11 = arith.cmpi ne, %10, %c0_i32_8 : i32
    scf.if %11 {
      %c0_9 = arith.constant 0 : index
      %c0_10 = arith.constant 0 : index
      %12 = vector.load %arg9[%c0_9, %c0_10] : memref<512x256xf32, #tpu.memory_space<vmem>>, vector<512x256xf32>
      %c0_11 = arith.constant 0 : index
      %c0_12 = arith.constant 0 : index
      %13 = vector.load %arg5[%c0_11, %c0_12] : memref<1x256xf32, #tpu.memory_space<vmem>>, vector<1x256xf32>
      %14 = vector.broadcast %13 : vector<1x256xf32> to vector<512x256xf32>
      %15 = arith.mulf %12, %14 : vector<512x256xf32>
      %c0_13 = arith.constant 0 : index
      %c0_14 = arith.constant 0 : index
      %16 = vector.load %arg6[%c0_13, %c0_14] : memref<1x256xf32, #tpu.memory_space<vmem>>, vector<1x256xf32>
      %17 = vector.broadcast %16 : vector<1x256xf32> to vector<512x256xf32>
      %18 = arith.addf %15, %17 : vector<512x256xf32>
      %c0_15 = arith.constant 0 : index
      %c0_16 = arith.constant 0 : index
      %19 = vector.load %arg7[%c0_15, %c0_16] : memref<512x256xbf16, #tpu.memory_space<vmem>>, vector<512x256xbf16>
      %20 = arith.extf %19 : vector<512x256xbf16> to vector<512x256xf32>
      %21 = arith.addf %18, %20 : vector<512x256xf32>
      %cst_17 = arith.constant 0.000000e+00 : f32
      %22 = vector.broadcast %cst_17 : f32 to vector<512x256xf32>
      %23 = arith.maximumf %21, %22 : vector<512x256xf32>
      %24 = arith.truncf %23 : vector<512x256xf32> to vector<512x256xbf16>
      %c0_18 = arith.constant 0 : index
      %c0_19 = arith.constant 0 : index
      %25 = vector.load %arg8[%c0_18, %c0_19] : memref<512x256xbf16, #tpu.memory_space<vmem>>, vector<512x256xbf16>
      tpu.vector_store %arg8[%c0_18, %c0_19], %24 {strides = array<i32>} : memref<512x256xbf16, #tpu.memory_space<vmem>>, vector<512x256xbf16>,
    } else {
    }
    return
  }
  func.func @transform_0(%arg0: i32, %arg1: i32, %arg2: i32) -> (i32, i32) {
    %c0_i32 = arith.constant 0 : i32
    return %arg0, %arg2 : i32, i32
  }
  func.func @transform_1(%arg0: i32, %arg1: i32, %arg2: i32) -> (i32, i32) {
    %c0_i32 = arith.constant 0 : i32
    return %arg2, %arg1 : i32, i32
  }
  func.func @transform_2(%arg0: i32, %arg1: i32, %arg2: i32) -> (i32, i32) {
    %c0_i32 = arith.constant 0 : i32
    %c0_i32_0 = arith.constant 0 : i32
    return %c0_i32, %arg1 : i32, i32
  }
  func.func @transform_3(%arg0: i32, %arg1: i32, %arg2: i32) -> (i32, i32) {
    %c0_i32 = arith.constant 0 : i32
    %c0_i32_0 = arith.constant 0 : i32
    return %c0_i32, %arg1 : i32, i32
  }
  func.func @transform_4(%arg0: i32, %arg1: i32, %arg2: i32) -> (i32, i32) {
    %c0_i32 = arith.constant 0 : i32
    return %arg0, %arg1 : i32, i32
  }
  func.func @transform_5(%arg0: i32, %arg1: i32, %arg2: i32) -> (i32, i32) {
    %c0_i32 = arith.constant 0 : i32
    return %arg0, %arg1 : i32, i32
  }
}

</mosaic_0001>

<bundles_post_ra>
// kernel: tpu_custom_call.1
= control target key start
LH: loop header
LB: loop body
LE: loop exit
PB: predicated region body
PF: predicated region fallthrough
CT: control target
= control target key end

     0   :  { %s12012_s0 = inlined_call_operand.hbm [shape: bf16[1000,4224], index: 0, kind: input, shape index: {}]   ;;  %s12013_s1 = inlined_call_operand.hbm [shape: bf16[4224,256], index: 1, kind: input, shape index: {}]   ;;  %s12014_s2 = inlined_call_operand.hbm [shape: f32[1,256], index: 2, kind: input, shape index: {}]   ;;  %s12015_s3 = inlined_call_operand.hbm [shape: f32[1,256], index: 3, kind: input, shape index: {}]   ;;  %s12016_s4 = inlined_call_operand.hbm [shape: bf16[1000,256], index: 4, kind: input, shape index: {}]   ;;  %s12017_s5 = inlined_call_operand.hbm [shape: bf16[1000,256], index: 5, kind: output, shape index: {}]  }
   0x1   :  { %12037 = sst [smem:[#allocation32_spill]] %s12014_s2 }
   0x2   :  { %12038 = sst [smem:[#allocation33_spill]] %s12017_s5 }
   0x3   :  { %10 = vsyncpa [#allocation4], 0 }
   0x4   :  { %12 = vsyncpa [#allocation4 + $0x1], 0 }
   0x5   :  { %13 = vsyncpa [#allocation7], 0 }
   0x6   :  { %15 = vsyncpa [#allocation7 + $0x1], 0 }
   0x7   :  { %16 = vsyncpa [#allocation10], 0 }
   0x8   :  { %17 = vsyncpa [#allocation5], 0 }
   0x9   :  { %19 = vsyncpa [#allocation5 + $0x1], 0  ;;  %s10433_s18 = smov 0   ;;  %s10435_s19 = smov 0  }
   0xa   :  { %s10437_s20 = smov 0   ;;  %s10439_s21 = smov 0  }
   0xb   :  { %s10441_s22 = smov 0   ;;  %s10443_s23 = smov 0  }
   0xc   :  { %s10445_s24 = smov 0   ;;  %s10447_s25 = smov 0  }
   0xd   :  { %s10449_s26 = smov 0   ;;  %s10451_s27 = smov 0  }
   0xe   :  { %s10453_s28 = smov 0   ;;  %s10455_s29 = smov 0  }
   0xf   :  { %s10457_s30 = smov 0   ;;  %s10459_s6 = smov 0  }
  0x10 LB: > { %12039 = sst [smem:[#allocation19_spill]] %s10332_s18  ;;  %s10502_s7 = sadd.s32 4294967295, %s10384_s6   ;;  %s10384_s6 = sphi %s10459_s6, %s25_s6   ;;  %s10380_s30 = sphi %s10457_s30, %s12107_s30   ;;  %s10376_s29 = sphi %s10455_s29, %s12106_s29   ;;  %s10372_s28 = sphi %s10453_s28, %s12105_s28   ;;  %s10368_s27 = sphi %s10451_s27, %s12104_s27   ;;  %s10364_s26 = sphi %s10449_s26, %s12103_s26   ;;  %s10360_s25 = sphi %s10447_s25, %s12102_s25   ;;  %s10356_s24 = sphi %s10445_s24, %s12101_s24   ;;  %s10352_s23 = sphi %s10443_s23, %s12100_s23   ;;  %s10348_s22 = sphi %s10441_s22, %s12099_s22   ;;  %s10344_s21 = sphi %s10439_s21, %s12098_s21   ;;  %s10340_s20 = sphi %s10437_s20, %s12097_s20   ;;  %s10336_s19 = sphi %s10435_s19, %s12096_s19   ;;  %s10332_s18 = sphi %s10433_s18, %s12090_s18  }
  0x11   : > { %12040 = sst [smem:[#allocation20_spill]] %s10336_s19  ;;  %s37_s9 = sadd.s32 1, %s10376_s29 }
  0x12   : > { %12041 = sst [smem:[#allocation21_spill]] %s10368_s27  ;;  %s44_s10 = sadd.s32 1, %s10380_s30 }
  0x13   : > { %12042 = sst [smem:[#allocation22_spill]] %s10372_s28  ;;  %p38_p0 = scmp.ge.s32.totalorder %s37_s9, 3 }
  0x14   : > { %s53_s11 = sadd.s32 1, %s10364_s26  ;;  %p60_p1 = scmp.ne.s32.totalorder %s10364_s26, %s10360_s25 }
  0x15   : > { %p61_p2 = scmp.eq.s32.totalorder %s10384_s6, 0  ;;  %s12109_s9 = smov (%p38_p0, %s37_s9), 0 }
  0x16   : > { %12043 = sst [smem:[#allocation23_spill]] %s12109_s9  ;;  %s12111_s10 = smov (!%p38_p0, %s44_s10), %s10380_s30 }
  0x17   : > { %s49_s12 = ssub.s32 %s10376_s29, %s12109_s9  ;;  %p10518_p3 = por %p61_p2, %p60_p1 }
  0x18   : > { %p46_p4 = scmp.ge.s32.totalorder %s12111_s10, 2  ;;  %p66_p5 = scmp.ne.s32.totalorder %s10360_s25, %s10356_s24 }
  0x19   : > { %s12044_s13 = scalar_select %p10518_p3, 1, 0 }
  0x1a   : > { %p12022_p6 = scmp.eq.s32.totalorder %s10502_s7, 0  ;;  %p79_p7 = scmp.eq.s32.totalorder %s49_s12, 0 }
  0x1b   : > { %s12113_s10 = smov (%p46_p4, %s12111_s10), 0  ;;  %s81_s15 = sadd.s32 1, %s10352_s23 }
  0x1c   : > { %12045 = sst [smem:[#allocation24_spill]] %s12113_s10  ;;  %p10528_p8 = por %p12022_p6, %p66_p5 }
  0x1d   : > { %s48_s16 = ssub.s32 %s10380_s30, %s12113_s10  ;;  %p88_p9 = scmp.ne.s32.totalorder %s10352_s23, %s10348_s22 }
  0x1e   : > { %s12046_s14 = scalar_select %p10528_p8, 1, 0 }
  0x1f   : > { %s50_s17 = sor.u32 %s49_s12, %s48_s16  ;;  %p94_p10 = scmp.ne.s32.totalorder %s10348_s22, %s10344_s21 }
  0x20   : > { %p51_p11 = scmp.eq.s32.totalorder %s50_s17, 0  ;;  %p10541_p12 = por %p88_p9, %p61_p2 }
  0x21   : > { %s10546_s8 = scalar_select %p79_p7, %s10352_s23, %s81_s15  }
  0x22   : > { %s12047_s24 = scalar_select %p10541_p12, 1, 0 }
  0x23   : > { %12048 = sst [smem:[#allocation25_spill]] %s10546_s8  ;;  %p10553_p13 = por %p94_p10, %p12022_p6 }
  0x24   : > { %s10549_s9 = scalar_select %p51_p11, %s10364_s26, %s53_s11  }
  0x25   : > { %s12050_s10 = scalar_select %p10553_p13, 1, 0 }
  0x26   : > { %12049 = sst [smem:[#allocation26_spill]] %s10549_s9  ;;  %p159_p0 = scmp.eq.s32.totalorder %s48_s16, 0 }
  0x27   : > { %12051 = sst [smem:[#allocation27_spill]] %s12050_s10  ;;  %s161_s12 = sadd.s32 1, %s10340_s20 }
  0x28   : > { %p168_p1 = scmp.ne.s32.totalorder %s10340_s20, %s10336_s19  ;;  %p174_p5 = scmp.ne.s32.totalorder %s10336_s19, %s10332_s18 }
  0x29   : > { %s10561_s21 = scalar_select %p159_p0, %s10340_s20, %s161_s12  }
  0x2a   : > { %p10565_p4 = por %p168_p1, %p61_p2  ;;  %p200_p7 = scmp.eq.s32.totalorder %s10502_s7, 5 }
  0x2b   : > { %12052 = sst [smem:[#allocation28_spill]] %s10561_s21  ;;  %s12054_s11 = sadd.s32 4294967294, %s10384_s6  }
  0x2c   : > { %s12053_s17 = scalar_select %p10565_p4, 1, 0 }
  0x2d   : > { %p206_p9 = scmp.eq.s32.totalorder %s12054_s11, 5  ;;  %p10576_p10 = por %p174_p5, %p12022_p6 }
  0x2e   : > { %p7802_p11 = scmp.ge.s32.totalorder %s10384_s6, 1  ;;  %p10581_p13 = por %p200_p7, %p168_p1 }
  0x2f   : > { %s12055_s15 = scalar_select %p10576_p10, 1, 0 }
  0x30   : > { %s12057_s16 = scalar_select %p10581_p13, 1, 0 }
  0x31   : > { %12056 = sst [smem:[#allocation29_spill]] %s12055_s15  ;;  %p10585_p0 = por %p206_p9, %p174_p5 }
  0x32   : > { %12058 = sst [smem:[#allocation30_spill]] %s12057_s16  ;;  %p213_p2 = scmp.lt.s32.totalorder %s10384_s6, 7 }
  0x33   : > { %s12059_s12 = scalar_select %p10585_p0, 1, 0 }
  0x34   : > { %p10590_p8 = pnand %p7802_p11, %p213_p2  ;;  %s10386_s11 = smov [#allocation8]  }
  0x35   : > { %12060 = sst [smem:[#allocation31_spill]] %s12059_s12  ;;  %s229_s8 = sshll.u32 %s10386_s11, 4  ;;  %s230_s8 = int_to_ptr.vmem [resolvable:$true] %s229_s8 }
  0x36   : > { %s12061_s9 = scalar_select %p10590_p8, 1, 0 }
  0x37   : > { %p9165_p6 = pneg %p10590_p8  ;;  %s10387_s21 = smov [#allocation9]  }
  0x38   : > { %s243_s18 = sshll.u32 %s10387_s21, 4  ;;  %p12062_p1 = scmp.eq.s32.totalorder %s10502_s7, 0  ;;  %s10602_s18 = int_to_ptr.vmem [resolvable:$true] %s243_s18 }
  0x39   : > { %s12064_s2 = sld [smem:[#allocation32_spill]] }
  0x3a   : > { %p10598_p7 = pnand %p9165_p6, %p12062_p1 }
  0x3c   : > { %p10084_p9 = pneg %p10598_p7 }
  0x3f   : > { %s10082_s16 = scalar_lea.hbm %s12064_s2, 32 }
  0x40   : > { %p10083_p5 = scmp.ne.s32.totalorder %s12064_s2, %s10082_s16  ;;  %p10089_p2 = scmp.lt.u32.totalorder %s10082_s16, %s12064_s2 }
  0x42   : > { %p10085_p6 = pnand %p10084_p9, %p10083_p5 }
  0x44   : > { %p10086_p11 = pneg %p10085_p6 }
  0x46   : > { %p10091_p1 = pnand %p10089_p2, %p10086_p11 }
  0x48   : > { %10094 = shalt.err (!%p10091_p1)
}
  0x49   : > { %s10095_s19 = scalar_lea.vmem %s230_s8, 32  ;;  %p10103_p8 = scmp.lt.s32.totalorder %s230_s8, %s230_s8 }
  0x4a   : > { %p10096_p0 = scmp.ne.s32.totalorder %s230_s8, %s10095_s19  ;;  %p10104_p4 = scmp.lt.s32.totalorder %s10095_s19, %s10095_s19 }
  0x4c   : > { %p10098_p13 = pnand %p10096_p0, %p10084_p9  ;;  %p10105_p12 = por %p10104_p4, %p10103_p8 }
  0x4e   : > { %p10099_p10 = pneg %p10098_p13 }
  0x50   : > { %p10106_p3 = pnand %p10105_p12, %p10099_p10 }
  0x52   : > { %10109 = shalt.err (!%p10106_p3)
}
  0x53   : > { %9168 = dma.hbm_to_vmem [thread:$0]  (!%p10598_p7), %s12064_s2, 32, %s230_s8, [#allocation7]  }
  0x54   : > { %s10110_s12 = scalar_lea.hbm %s12015_s3, 32 }
  0x55   : > { %p10111_p13 = scmp.ne.s32.totalorder %s12015_s3, %s10110_s12  ;;  %p10117_p3 = scmp.lt.u32.totalorder %s10110_s12, %s12015_s3 }
  0x57   : > { %p10113_p8 = pnand %p10111_p13, %p10084_p9 }
  0x59   : > { %p10114_p12 = pneg %p10113_p8 }
  0x5b   : > { %p10119_p4 = pnand %p10117_p3, %p10114_p12 }
  0x5d   : > { %10122 = shalt.err (!%p10119_p4)
}
  0x5e   : > { %s10123_s8 = scalar_lea.vmem %s10602_s18, 32  ;;  %p10131_p6 = scmp.lt.s32.totalorder %s10602_s18, %s10602_s18 }
  0x5f   : > { %p10124_p10 = scmp.ne.s32.totalorder %s10602_s18, %s10123_s8  ;;  %p10132_p11 = scmp.lt.s32.totalorder %s10123_s8, %s10123_s8 }
  0x61   : > { %p10126_p0 = pnand %p10124_p10, %p10084_p9  ;;  %p10133_p2 = por %p10132_p11, %p10131_p6 }
  0x63   : > { %p10127_p5 = pneg %p10126_p0 }
  0x65   : > { %p10134_p1 = pnand %p10133_p2, %p10127_p5 }
  0x67   : > { %10137 = shalt.err (!%p10134_p1)
}
  0x68   : > { %9171 = dma.hbm_to_vmem [thread:$0]  (!%p10598_p7), %s12015_s3, 32, %s10602_s18, [#allocation10]  }
  0x69   : > { %p7805_p13 = scmp.ge.s32.totalorder %s10384_s6, 6 }
  0x6a   : > { %p12065_p8 = scmp.ne.s32.totalorder (!%p7805_p13), %s12044_s13, 0 }
  0x6b   : > { %250 = sbr.rel (%p7805_p13) target bundleno = 217 (0xd9), region = 24 }
  0x72   : > { %253 = sbr.rel (!%p12065_p8) target bundleno = 153 (0x99), region = 28  ;;  %s254_s28 = sand.u32 (%p12065_p8), 1, %s10384_s6  }
  0x73   : > { %s256_s15 = sand.u32 (%p12065_p8), 1, %s10364_s26   ;;  %s7806_s12 = sshll.u32 (%p12065_p8), %s10380_s30, 6 }
  0x74   : > { %s9147_s16 = smul.u32 (%p12065_p8), 2816, %s256_s15  ;;  %s261_s11 = ssub.s32 (%p12065_p8), 125, %s7806_s12 }
  0x75   : > { %s260_s5 = smul.u32 (%p12065_p8), 11, %s10376_s29  ;;  %p262_p9 = scmp.lt.s32.totalorder (%p12065_p8), %s261_s11, 64 }
  0x76   : > { %s10661_s19 = scalar_lea.sflag (%p12065_p8), [#allocation4], %s254_s28  ;;  %s258_s13 = scalar_lea.vmem (%p12065_p8), [#allocation3], %s9147_s16 }
  0x79   : > { %s12115_s11 = smov (!%p262_p9, %s261_s11), 64 }
  0x7a   : > { %s10658_s21 = smul.u32 704, %s12115_s11 }
  0x7c   : > { %s267_s18 = ssub.s32 45056, %s10658_s21 }
  0x7d   : > { %268 = vsyncadd %s10661_s19, %s267_s18  ;;  %p7809_p7 = scmp.ne.s32.totalorder %s10658_s21, 0  ;;  %s9148_s8 = smul.u32 2112, %s10380_s30 }
  0x7e   : > { %s275_s10 = sshll.u32 %s258_s13, 4  ;;  %s10666_s10 = int_to_ptr.vmem [resolvable:$true] %s275_s10 }
  0x7f   : > { %s271_s27 = sadd.s32 %s9148_s8, %s260_s5  ;;  %s10142_s5 = scalar_lea.hbm %s12012_s0, 264000 }
  0x80   : > { %s7811_s15 = sshll.u32 %s271_s27, 6 }
  0x81   : > { %s10671_s2 = scalar_lea.hbm %s12012_s0, %s7811_s15 }
  0x82   : > { %s10138_s28 = scalar_lea.hbm %s10671_s2, %s10658_s21  ;;  %p10143_p10 = scmp.lt.u32.totalorder %s10671_s2, %s12012_s0 }
  0x83   : > { %p10139_p12 = scmp.ne.s32.totalorder %s10671_s2, %s10138_s28  ;;  %p10144_p0 = scmp.lt.u32.totalorder %s10142_s5, %s10138_s28 }
  0x84   : > { %p10146_p6 = scmp.lt.u32.totalorder %s10138_s28, %s10671_s2 }
  0x85   : > { %p10140_p3 = pnand %p10139_p12, %p7809_p7  ;;  %p10145_p5 = por %p10144_p0, %p10143_p10 }
  0x87   : > { %p10141_p4 = pneg %p10140_p3  ;;  %p10147_p11 = por %p10146_p6, %p10145_p5 }
  0x89   : > { %p10148_p2 = pnand %p10147_p11, %p10141_p4 }
  0x8b   : > { %10151 = shalt.err (!%p10148_p2)
}
  0x8c   : > { %s10152_s27 = scalar_lea.vmem %s10666_s10, %s10658_s21  ;;  %s10388_s15 = smov [#allocation3]  }
  0x8d   : > { %p10153_p1 = scmp.ne.s32.totalorder %s10666_s10, %s10152_s27  ;;  %s10156_s12 = sshll.u32 %s10388_s15, 4  ;;  %s10157_s12 = int_to_ptr.vmem [resolvable:$false] %s10156_s12 }
  0x8e   : > { %s10158_s11 = scalar_lea.vmem %s10157_s12, 90112  ;;  %p10159_p9 = scmp.lt.s32.totalorder %s10666_s10, %s10157_s12 }
  0x8f   : > { %p10154_p13 = pnand %p10153_p1, %p7809_p7  ;;  %p10160_p12 = scmp.lt.s32.totalorder %s10158_s11, %s10152_s27 }
  0x91   : > { %p10155_p8 = pneg %p10154_p13  ;;  %p10161_p3 = por %p10160_p12, %p10159_p9 }
  0x93   : > { %p10162_p10 = pnand %p10161_p3, %p10155_p8 }
  0x95   : > { %10165 = shalt.err (!%p10162_p10)
}
  0x96   : > { %s10389_s28 = smov 2112   ;;  %s10390_s16 = smov 704  }
  0x97   : > { %s10391_s18 = smov 44  }
  0x98   : > { %281 = dma.hbm_to_vmem [thread:$0]  (%p7809_p7), %s10671_s2, %s10658_s21, %s10666_s10, %s10661_s19, %s10389_s28, %s10390_s16, %s10391_s18  }
  0x99 PF: > { %s285_s5 = sand.u32 1, %s10384_s6   ;;  %s287_s13 = sand.u32 1, %s10352_s23  }
  0x9a   : > { %s9149_s8 = smul.u32 1408, %s287_s13  ;;  %s10710_s19 = scalar_lea.sflag [#allocation7], %s285_s5 }
  0x9b   : > { %s8506_s27 = smul.u32 22528, %s10376_s29  ;;  %p12066_p4 = scmp.ne.s32.totalorder %s12047_s24, 0 }
  0x9c   : > { %s289_s2 = scalar_lea.vmem [#allocation6], %s9149_s8  ;;  %s10170_s18 = scalar_lea.hbm %s12013_s1, 67584 }
  0x9d   : > { %s10704_s11 = scalar_lea.hbm %s12013_s1, %s8506_s27  ;;  %s299_s21 = sshll.u32 %s289_s2, 4  ;;  %s10706_s21 = int_to_ptr.vmem [resolvable:$true] %s299_s21 }
  0x9e   : > { %s10166_s10 = scalar_lea.hbm %s10704_s11, 22528  ;;  %p10171_p6 = scmp.lt.u32.totalorder %s10704_s11, %s12013_s1 }
  0x9f   : > { %p10167_p7 = scmp.ne.s32.totalorder %s10704_s11, %s10166_s10  ;;  %p10172_p11 = scmp.lt.u32.totalorder %s10170_s18, %s10166_s10 }
  0xa0   : > { %p10174_p1 = scmp.lt.u32.totalorder %s10166_s10, %s10704_s11 }
  0xa1   : > { %p10168_p0 = pnand %p10167_p7, %p12066_p4  ;;  %p10173_p2 = por %p10172_p11, %p10171_p6 }
  0xa3   : > { %p10169_p5 = pneg %p10168_p0  ;;  %p10175_p13 = por %p10174_p1, %p10173_p2 }
  0xa5   : > { %p10176_p8 = pnand %p10175_p13, %p10169_p5 }
  0xa7   : > { %10179 = shalt.err (!%p10176_p8)
}
  0xa8   : > { %s10180_s8 = scalar_lea.vmem %s10706_s21, 22528  ;;  %s10392_s15 = smov [#allocation6]  }
  0xa9   : > { %p10181_p9 = scmp.ne.s32.totalorder %s10706_s21, %s10180_s8  ;;  %s10184_s12 = sshll.u32 %s10392_s15, 4  ;;  %s10185_s12 = int_to_ptr.vmem [resolvable:$false] %s10184_s12 }
  0xaa   : > { %s10186_s2 = scalar_lea.vmem %s10185_s12, 45056  ;;  %p10187_p10 = scmp.lt.s32.totalorder %s10706_s21, %s10185_s12 }
  0xab   : > { %p10182_p12 = pnand %p10181_p9, %p12066_p4  ;;  %p10188_p7 = scmp.lt.s32.totalorder %s10186_s2, %s10180_s8 }
  0xad   : > { %p10183_p3 = pneg %p10182_p12  ;;  %p10189_p0 = por %p10188_p7, %p10187_p10 }
  0xaf   : > { %p10190_p6 = pnand %p10189_p0, %p10183_p3 }
  0xb1   : > { %10193 = shalt.err (!%p10190_p6)
}
  0xb2   : > { %s10393_s10 = smov 128   ;;  %s10394_s28 = smov 8  }
  0xb3   : > { %9156 = dma.hbm_to_vmem [thread:$0]  (%p12066_p4), %s10704_s11, 22528, %s10706_s21, %s10710_s19, %s10393_s10, %s10393_s10, %s10394_s28  }
  0xb4   : > { %p12067_p5 = scmp.ne.s32.totalorder %s12053_s17, 0 }
  0xb5   : > { %s311_s16 = sand.u32 (%p12067_p5), 1, %s10340_s20   ;;  %s7816_s13 = sshll.u32 (%p12067_p5), %s10380_s30, 6 }
  0xb6   : > { %308 = sbr.rel (!%p12067_p5) target bundleno = 217 (0xd9), region = 36  ;;  %s7815_s18 = sshll.u32 (%p12067_p5), %s311_s16, 9 }
  0xb7   : > { %s316_s27 = ssub.s32 (%p12067_p5), 125, %s7816_s13  ;;  %s10743_s12 = scalar_lea.sflag (%p12067_p5), [#allocation4], %s285_s5 }
  0xb8   : > { %p317_p11 = scmp.lt.s32.totalorder (%p12067_p5), %s316_s27, 64  ;;  %s313_s24 = scalar_lea.vmem (%p12067_p5), [#allocation11], %s7815_s18 }
  0xbd   : > { %s12117_s27 = smov (!%p317_p11, %s316_s27), 64 }
  0xbe   : > { %s10738_s8 = sshll.u32 %s12117_s27, 7 }
  0xbf   : > { %s322_s15 = ssub.s32 8192, %s10738_s8 }
  0xc0   : > { %323 = vsyncadd %s10743_s12, %s322_s15  ;;  %p7819_p4 = scmp.ne.s32.totalorder %s10738_s8, 0  ;;  %s8438_s17 = sshll.u32 %s10380_s30, 13 }
  0xc1   : > { %s10751_s19 = scalar_lea.hbm %s12016_s4, %s8438_s17  ;;  %s330_s5 = sshll.u32 %s313_s24, 4  ;;  %s10753_s5 = int_to_ptr.vmem [resolvable:$true] %s330_s5 }
  0xc2   : > { %s10194_s2 = scalar_lea.hbm %s10751_s19, %s10738_s8  ;;  %s10198_s16 = scalar_lea.hbm %s12016_s4, 16000 }
  0xc3   : > { %p10195_p2 = scmp.ne.s32.totalorder %s10751_s19, %s10194_s2  ;;  %p10199_p8 = scmp.lt.u32.totalorder %s10751_s19, %s12016_s4 }
  0xc4   : > { %p10200_p9 = scmp.lt.u32.totalorder %s10198_s16, %s10194_s2  ;;  %p10202_p3 = scmp.lt.u32.totalorder %s10194_s2, %s10751_s19 }
  0xc5   : > { %p10196_p1 = pnand %p10195_p2, %p7819_p4 }
  0xc6   : > { %p10201_p12 = por %p10200_p9, %p10199_p8 }
  0xc7   : > { %p10197_p13 = pneg %p10196_p1 }
  0xc8   : > { %p10203_p10 = por %p10202_p3, %p10201_p12 }
  0xca   : > { %p10204_p7 = pnand %p10203_p10, %p10197_p13 }
  0xcc   : > { %10207 = shalt.err (!%p10204_p7)
}
  0xcd   : > { %s10208_s27 = scalar_lea.vmem %s10753_s5, %s10738_s8  ;;  %s10395_s15 = smov [#allocation11]  }
  0xce   : > { %p10209_p0 = scmp.ne.s32.totalorder %s10753_s5, %s10208_s27  ;;  %s10212_s24 = sshll.u32 %s10395_s15, 4  ;;  %s10213_s24 = int_to_ptr.vmem [resolvable:$false] %s10212_s24 }
  0xcf   : > { %s10214_s17 = scalar_lea.vmem %s10213_s24, 16384  ;;  %p10215_p11 = scmp.lt.s32.totalorder %s10753_s5, %s10213_s24 }
  0xd0   : > { %p10210_p6 = pnand %p10209_p0, %p7819_p4  ;;  %p10216_p2 = scmp.lt.s32.totalorder %s10214_s17, %s10208_s27 }
  0xd2   : > { %p10211_p5 = pneg %p10210_p6  ;;  %p10217_p1 = por %p10216_p2, %p10215_p11 }
  0xd4   : > { %p10218_p8 = pnand %p10217_p1, %p10211_p5 }
  0xd6   : > { %10221 = shalt.err (!%p10218_p8)
}
  0xd7   : > { %s10396_s11 = smov 128   ;;  %s10397_s21 = smov 8  }
  0xd8   : > { %336 = dma.hbm_to_vmem [thread:$0]  (%p7819_p4), %s10751_s19, %s10738_s8, %s10753_s5, %s10743_s12, %s10396_s11, %s10396_s11, %s10397_s21  }
  0xd9 PF: > { %p12068_p13 = scmp.ne.s32.totalorder %s12061_s9, 0 }
  0xda   : > { %s344_s2 = sand.u32 (!%p12068_p13), 1, %s10502_s7   ;;  %s346_s10 = sand.u32 (!%p12068_p13), 1, %s10360_s25  }
  0xdb   : > { %342 = sbr.rel (%p12068_p13) target bundleno = 1588 (0x634), region = 40  ;;  %s345_s16 = scalar_lea.sflag (!%p12068_p13), [#allocation4], %s344_s2 }
  0xdc   : > { %s9150_s28 = smul.u32 (!%p12068_p13), 2816, %s346_s10  ;;  %p12069_p9 = scmp.ne.s32.totalorder (!%p12068_p13), %s12046_s14, 0 }
  0xde   : > { %s10784_s18 = scalar_lea.vmem (!%p12068_p13), [#allocation3], %s9150_s28 }
  0xe2   : > { %10307 = dma.done.wait (%p12069_p9), %s345_s16, 45056  }
  0xe3   : > { %10309 = vsyncadd (%p12069_p9), %s345_s16, 4294922240  ;;  %s12070_s8 = sld [smem:[#allocation27_spill]]  ;;  %s355_s12 = sand.u32 1, %s10348_s22  }
  0xe4   : > { %s9151_s19 = smul.u32 1408, %s355_s12  ;;  %s354_s9 = scalar_lea.sflag [#allocation7], %s344_s2 }
  0xe6   : > { %s10791_s5 = scalar_lea.vmem [#allocation6], %s9151_s19 }
  0xe9   : > { %p12071_p4 = scmp.ne.s32.totalorder %s12070_s8, 0 }
  0xeb   : > { %10311 = dma.done.wait (%p12071_p4), %s354_s9, 22528  }
  0xec   : > { %10313 = vsyncadd (%p12071_p4), %s354_s9, 4294944768  ;;  %p12072_p12 = scmp.eq.s32.totalorder %s10502_s7, 0 }
  0xee   : > { %10315 = dma.done.wait (%p12072_p12), [#allocation7], 32   ;;  %p12073_p3 = pmov %p12072_p12 }
  0xf0   : > { %10317 = vsyncadd (%p12073_p3), [#allocation7], 4294967264  ;;  %p12074_p10 = pmov %p12073_p3 }
  0xf1   : > { %p12075_p7 = pmov %p12073_p3 }
  0xf2   : > { %10319 = dma.done.wait (%p12074_p10), [#allocation10], 32  }
  0xf3   : > { %10321 = vsyncadd (%p12075_p7), [#allocation10], 4294967264  ;;  %s12076_s14 = sld [smem:[#allocation20_spill]]  ;;  %s12077_s13 = sld [smem:[#allocation29_spill]] }
  0xf9   : > { %s372_s27 = sand.u32 1, %s12076_s14   ;;  %p12078_p0 = scmp.ne.s32.totalorder %s12077_s13, 0 }
  0xfa   : > { %s7827_s15 = sshll.u32 %s372_s27, 9 }
  0xfb   : > { %s10808_s24 = scalar_lea.vmem [#allocation11], %s7827_s15 }
  0xfc   : > { %10323 = dma.done.wait (%p12078_p0), %s345_s16, 8192  }
  0xfd   : > { %10325 = vsyncadd (%p12078_p0), %s345_s16, 4294959104  ;;  %s10814_s17 = scalar_lea.vmem [#allocation12], %s7827_s15  ;;  %s12079_s11 = sld [smem:[#allocation21_spill]] }
 0x103   : > { %p7829_p6 = scmp.ne.s32.totalorder %s12079_s11, 0 }
 0x104   : > { %v10398_v0 = vmov (!%p7829_p6), 0.0  }
 0x105   : > { %440 = sbr.rel (%p7829_p6) target bundleno = 325 (0x145), region = 64  ;;  %441 = vst [vmem:[#allocation2] sm:$0xff] (!%p7829_p6), %v10398_v0  ;;  %442 = vst [vmem:[#allocation2 + $0x8] sm:$0xff] (!%p7829_p6), %v10398_v0 }
 0x106   : > { %443 = vst [vmem:[#allocation2 + $0x10] sm:$0xff] (!%p7829_p6), %v10398_v0  ;;  %444 = vst [vmem:[#allocation2 + $0x18] sm:$0xff] (!%p7829_p6), %v10398_v0 }
 0x107   : > { %445 = vst [vmem:[#allocation2 + $0x20] sm:$0xff] (!%p7829_p6), %v10398_v0  ;;  %446 = vst [vmem:[#allocation2 + $0x28] sm:$0xff] (!%p7829_p6), %v10398_v0 }
 0x108   : > { %447 = vst [vmem:[#allocation2 + $0x30] sm:$0xff] (!%p7829_p6), %v10398_v0  ;;  %448 = vst [vmem:[#allocation2 + $0x38] sm:$0xff] (!%p7829_p6), %v10398_v0 }
 0x109   : > { %449 = vst [vmem:[#allocation2 + $0x40] sm:$0xff] (!%p7829_p6), %v10398_v0  ;;  %450 = vst [vmem:[#allocation2 + $0x48] sm:$0xff] (!%p7829_p6), %v10398_v0 }
 0x10a   : > { %451 = vst [vmem:[#allocation2 + $0x50] sm:$0xff] (!%p7829_p6), %v10398_v0  ;;  %452 = vst [vmem:[#allocation2 + $0x58] sm:$0xff] (!%p7829_p6), %v10398_v0 }
 0x10b   : > { %453 = vst [vmem:[#allocation2 + $0x60] sm:$0xff] (!%p7829_p6), %v10398_v0  ;;  %454 = vst [vmem:[#allocation2 + $0x68] sm:$0xff] (!%p7829_p6), %v10398_v0 }
 0x10c   : > { %455 = vst [vmem:[#allocation2 + $0x70] sm:$0xff] %v10398_v0  ;;  %456 = vst [vmem:[#allocation2 + $0x78] sm:$0xff] %v10398_v0 }
 0x10d   : > { %457 = vst [vmem:[#allocation2 + $0x80] sm:$0xff] %v10398_v0  ;;  %458 = vst [vmem:[#allocation2 + $0x88] sm:$0xff] %v10398_v0 }
 0x10e   : > { %459 = vst [vmem:[#allocation2 + $0x90] sm:$0xff] %v10398_v0  ;;  %460 = vst [vmem:[#allocation2 + $0x98] sm:$0xff] %v10398_v0 }
 0x10f   : > { %461 = vst [vmem:[#allocation2 + $0xa0] sm:$0xff] %v10398_v0  ;;  %462 = vst [vmem:[#allocation2 + $0xa8] sm:$0xff] %v10398_v0 }
 0x110   : > { %463 = vst [vmem:[#allocation2 + $0xb0] sm:$0xff] %v10398_v0  ;;  %464 = vst [vmem:[#allocation2 + $0xb8] sm:$0xff] %v10398_v0 }
 0x111   : > { %465 = vst [vmem:[#allocation2 + $0xc0] sm:$0xff] %v10398_v0  ;;  %466 = vst [vmem:[#allocation2 + $0xc8] sm:$0xff] %v10398_v0 }
 0x112   : > { %467 = vst [vmem:[#allocation2 + $0xd0] sm:$0xff] %v10398_v0  ;;  %468 = vst [vmem:[#allocation2 + $0xd8] sm:$0xff] %v10398_v0 }
 0x113   : > { %469 = vst [vmem:[#allocation2 + $0xe0] sm:$0xff] %v10398_v0  ;;  %470 = vst [vmem:[#allocation2 + $0xe8] sm:$0xff] %v10398_v0 }
 0x114   : > { %471 = vst [vmem:[#allocation2 + $0xf0] sm:$0xff] %v10398_v0  ;;  %472 = vst [vmem:[#allocation2 + $0xf8] sm:$0xff] %v10398_v0 }
 0x115   : > { %473 = vst [vmem:[#allocation2 + $0x100] sm:$0xff] %v10398_v0  ;;  %474 = vst [vmem:[#allocation2 + $0x108] sm:$0xff] %v10398_v0 }
 0x116   : > { %475 = vst [vmem:[#allocation2 + $0x110] sm:$0xff] %v10398_v0  ;;  %476 = vst [vmem:[#allocation2 + $0x118] sm:$0xff] %v10398_v0 }
 0x117   : > { %477 = vst [vmem:[#allocation2 + $0x120] sm:$0xff] %v10398_v0  ;;  %478 = vst [vmem:[#allocation2 + $0x128] sm:$0xff] %v10398_v0 }
 0x118   : > { %479 = vst [vmem:[#allocation2 + $0x130] sm:$0xff] %v10398_v0  ;;  %480 = vst [vmem:[#allocation2 + $0x138] sm:$0xff] %v10398_v0 }
 0x119   : > { %481 = vst [vmem:[#allocation2 + $0x140] sm:$0xff] %v10398_v0  ;;  %482 = vst [vmem:[#allocation2 + $0x148] sm:$0xff] %v10398_v0 }
 0x11a   : > { %483 = vst [vmem:[#allocation2 + $0x150] sm:$0xff] %v10398_v0  ;;  %484 = vst [vmem:[#allocation2 + $0x158] sm:$0xff] %v10398_v0 }
 0x11b   : > { %485 = vst [vmem:[#allocation2 + $0x160] sm:$0xff] %v10398_v0  ;;  %486 = vst [vmem:[#allocation2 + $0x168] sm:$0xff] %v10398_v0 }
 0x11c   : > { %487 = vst [vmem:[#allocation2 + $0x170] sm:$0xff] %v10398_v0  ;;  %488 = vst [vmem:[#allocation2 + $0x178] sm:$0xff] %v10398_v0 }
 0x11d   : > { %489 = vst [vmem:[#allocation2 + $0x180] sm:$0xff] %v10398_v0  ;;  %490 = vst [vmem:[#allocation2 + $0x188] sm:$0xff] %v10398_v0 }
 0x11e   : > { %491 = vst [vmem:[#allocation2 + $0x190] sm:$0xff] %v10398_v0  ;;  %492 = vst [vmem:[#allocation2 + $0x198] sm:$0xff] %v10398_v0 }
 0x11f   : > { %493 = vst [vmem:[#allocation2 + $0x1a0] sm:$0xff] %v10398_v0  ;;  %494 = vst [vmem:[#allocation2 + $0x1a8] sm:$0xff] %v10398_v0 }
 0x120   : > { %495 = vst [vmem:[#allocation2 + $0x1b0] sm:$0xff] %v10398_v0  ;;  %496 = vst [vmem:[#allocation2 + $0x1b8] sm:$0xff] %v10398_v0 }
 0x121   : > { %497 = vst [vmem:[#allocation2 + $0x1c0] sm:$0xff] %v10398_v0  ;;  %498 = vst [vmem:[#allocation2 + $0x1c8] sm:$0xff] %v10398_v0 }
 0x122   : > { %499 = vst [vmem:[#allocation2 + $0x1d0] sm:$0xff] %v10398_v0  ;;  %500 = vst [vmem:[#allocation2 + $0x1d8] sm:$0xff] %v10398_v0 }
 0x123   : > { %501 = vst [vmem:[#allocation2 + $0x1e0] sm:$0xff] %v10398_v0  ;;  %502 = vst [vmem:[#allocation2 + $0x1e8] sm:$0xff] %v10398_v0 }
 0x124   : > { %503 = vst [vmem:[#allocation2 + $0x1f0] sm:$0xff] %v10398_v0  ;;  %504 = vst [vmem:[#allocation2 + $0x1f8] sm:$0xff] %v10398_v0 }
 0x125   : > { %505 = vst [vmem:[#allocation2 + $0x200] sm:$0xff] %v10398_v0  ;;  %506 = vst [vmem:[#allocation2 + $0x208] sm:$0xff] %v10398_v0 }
 0x126   : > { %507 = vst [vmem:[#allocation2 + $0x210] sm:$0xff] %v10398_v0  ;;  %508 = vst [vmem:[#allocation2 + $0x218] sm:$0xff] %v10398_v0 }
 0x127   : > { %509 = vst [vmem:[#allocation2 + $0x220] sm:$0xff] %v10398_v0  ;;  %510 = vst [vmem:[#allocation2 + $0x228] sm:$0xff] %v10398_v0 }
 0x128   : > { %511 = vst [vmem:[#allocation2 + $0x230] sm:$0xff] %v10398_v0  ;;  %512 = vst [vmem:[#allocation2 + $0x238] sm:$0xff] %v10398_v0 }
 0x129   : > { %513 = vst [vmem:[#allocation2 + $0x240] sm:$0xff] %v10398_v0  ;;  %514 = vst [vmem:[#allocation2 + $0x248] sm:$0xff] %v10398_v0 }
 0x12a   : > { %515 = vst [vmem:[#allocation2 + $0x250] sm:$0xff] %v10398_v0  ;;  %516 = vst [vmem:[#allocation2 + $0x258] sm:$0xff] %v10398_v0 }
 0x12b   : > { %517 = vst [vmem:[#allocation2 + $0x260] sm:$0xff] %v10398_v0  ;;  %518 = vst [vmem:[#allocation2 + $0x268] sm:$0xff] %v10398_v0 }
 0x12c   : > { %519 = vst [vmem:[#allocation2 + $0x270] sm:$0xff] %v10398_v0  ;;  %520 = vst [vmem:[#allocation2 + $0x278] sm:$0xff] %v10398_v0 }
 0x12d   : > { %521 = vst [vmem:[#allocation2 + $0x280] sm:$0xff] %v10398_v0  ;;  %522 = vst [vmem:[#allocation2 + $0x288] sm:$0xff] %v10398_v0 }
 0x12e   : > { %523 = vst [vmem:[#allocation2 + $0x290] sm:$0xff] %v10398_v0  ;;  %524 = vst [vmem:[#allocation2 + $0x298] sm:$0xff] %v10398_v0 }
 0x12f   : > { %525 = vst [vmem:[#allocation2 + $0x2a0] sm:$0xff] %v10398_v0  ;;  %526 = vst [vmem:[#allocation2 + $0x2a8] sm:$0xff] %v10398_v0 }
 0x130   : > { %527 = vst [vmem:[#allocation2 + $0x2b0] sm:$0xff] %v10398_v0  ;;  %528 = vst [vmem:[#allocation2 + $0x2b8] sm:$0xff] %v10398_v0 }
 0x131   : > { %529 = vst [vmem:[#allocation2 + $0x2c0] sm:$0xff] %v10398_v0  ;;  %530 = vst [vmem:[#allocation2 + $0x2c8] sm:$0xff] %v10398_v0 }
 0x132   : > { %531 = vst [vmem:[#allocation2 + $0x2d0] sm:$0xff] %v10398_v0  ;;  %532 = vst [vmem:[#allocation2 + $0x2d8] sm:$0xff] %v10398_v0 }
 0x133   : > { %533 = vst [vmem:[#allocation2 + $0x2e0] sm:$0xff] %v10398_v0  ;;  %534 = vst [vmem:[#allocation2 + $0x2e8] sm:$0xff] %v10398_v0 }
 0x134   : > { %535 = vst [vmem:[#allocation2 + $0x2f0] sm:$0xff] %v10398_v0  ;;  %536 = vst [vmem:[#allocation2 + $0x2f8] sm:$0xff] %v10398_v0 }
 0x135   : > { %537 = vst [vmem:[#allocation2 + $0x300] sm:$0xff] %v10398_v0  ;;  %538 = vst [vmem:[#allocation2 + $0x308] sm:$0xff] %v10398_v0 }
 0x136   : > { %539 = vst [vmem:[#allocation2 + $0x310] sm:$0xff] %v10398_v0  ;;  %540 = vst [vmem:[#allocation2 + $0x318] sm:$0xff] %v10398_v0 }
 0x137   : > { %541 = vst [vmem:[#allocation2 + $0x320] sm:$0xff] %v10398_v0  ;;  %542 = vst [vmem:[#allocation2 + $0x328] sm:$0xff] %v10398_v0 }
 0x138   : > { %543 = vst [vmem:[#allocation2 + $0x330] sm:$0xff] %v10398_v0  ;;  %544 = vst [vmem:[#allocation2 + $0x338] sm:$0xff] %v10398_v0 }
 0x139   : > { %545 = vst [vmem:[#allocation2 + $0x340] sm:$0xff] %v10398_v0  ;;  %546 = vst [vmem:[#allocation2 + $0x348] sm:$0xff] %v10398_v0 }
 0x13a   : > { %547 = vst [vmem:[#allocation2 + $0x350] sm:$0xff] %v10398_v0  ;;  %548 = vst [vmem:[#allocation2 + $0x358] sm:$0xff] %v10398_v0 }
 0x13b   : > { %549 = vst [vmem:[#allocation2 + $0x360] sm:$0xff] %v10398_v0  ;;  %550 = vst [vmem:[#allocation2 + $0x368] sm:$0xff] %v10398_v0 }
 0x13c   : > { %551 = vst [vmem:[#allocation2 + $0x370] sm:$0xff] %v10398_v0  ;;  %552 = vst [vmem:[#allocation2 + $0x378] sm:$0xff] %v10398_v0 }
 0x13d   : > { %553 = vst [vmem:[#allocation2 + $0x380] sm:$0xff] %v10398_v0  ;;  %554 = vst [vmem:[#allocation2 + $0x388] sm:$0xff] %v10398_v0 }
 0x13e   : > { %555 = vst [vmem:[#allocation2 + $0x390] sm:$0xff] %v10398_v0  ;;  %556 = vst [vmem:[#allocation2 + $0x398] sm:$0xff] %v10398_v0 }
 0x13f   : > { %557 = vst [vmem:[#allocation2 + $0x3a0] sm:$0xff] %v10398_v0  ;;  %558 = vst [vmem:[#allocation2 + $0x3a8] sm:$0xff] %v10398_v0 }
 0x140   : > { %559 = vst [vmem:[#allocation2 + $0x3b0] sm:$0xff] %v10398_v0  ;;  %560 = vst [vmem:[#allocation2 + $0x3b8] sm:$0xff] %v10398_v0 }
 0x141   : > { %561 = vst [vmem:[#allocation2 + $0x3c0] sm:$0xff] %v10398_v0  ;;  %562 = vst [vmem:[#allocation2 + $0x3c8] sm:$0xff] %v10398_v0 }
 0x142   : > { %563 = vst [vmem:[#allocation2 + $0x3d0] sm:$0xff] %v10398_v0  ;;  %564 = vst [vmem:[#allocation2 + $0x3d8] sm:$0xff] %v10398_v0 }
 0x143   : > { %565 = vst [vmem:[#allocation2 + $0x3e0] sm:$0xff] %v10398_v0  ;;  %566 = vst [vmem:[#allocation2 + $0x3e8] sm:$0xff] %v10398_v0 }
 0x144   : > { %567 = vst [vmem:[#allocation2 + $0x3f0] sm:$0xff] %v10398_v0  ;;  %568 = vst [vmem:[#allocation2 + $0x3f8] sm:$0xff] %v10398_v0 }
 0x145 PF: > { %v9306_v1 = vld [vmem:[%s10791_s5 + $0x4] ss:$8 sps:$4 sm:$0xff]   ;;  %v9310_v3 = vld [vmem:[%s10791_s5] ss:$8 sps:$4 sm:$0xff]   ;;  %v9312_v5 = vld [vmem:[%s10791_s5 + $0x14] ss:$8 sps:$4 sm:$0xff]  }
 0x146   : > { %v9308_v2 = vld [vmem:[%s10791_s5 + $0x304] ss:$8 sps:$4 sm:$0xff]   ;;  %3929 = vmatprep.subr.bf16.mxu1 %v9306_v1  ;;  %v9311_v4 = vld [vmem:[%s10791_s5 + $0x300] ss:$8 sps:$4 sm:$0xff]   ;;  %v9314_v6 = vld [vmem:[%s10791_s5 + $0x314] ss:$8 sps:$4 sm:$0xff]  }
 0x147   : > { %4988 = vmatprep.subr.bf16.mxu0 %v9308_v2  ;;  %3930 = vmatpush1.bf16.msra.mxu1 %v9310_v3  ;;  %v9316_v7 = vld [vmem:[%s10791_s5 + $0x10] ss:$8 sps:$4 sm:$0xff]   ;;  %v9318_v9 = vld [vmem:[%s10791_s5 + $0x24] ss:$8 sps:$4 sm:$0xff]   ;;  %v9322_v11 = vld [vmem:[%s10791_s5 + $0x20] ss:$8 sps:$4 sm:$0xff]  }
 0x148   : > { %4989 = vmatpush1.bf16.msra.mxu0 %v9311_v4  ;;  %3931 = vmatprep.subr.bf16.mxu1 %v9312_v5  ;;  %v9317_v8 = vld [vmem:[%s10791_s5 + $0x310] ss:$8 sps:$4 sm:$0xff]   ;;  %v9320_v10 = vld [vmem:[%s10791_s5 + $0x324] ss:$8 sps:$4 sm:$0xff]   ;;  %v9323_v12 = vld [vmem:[%s10791_s5 + $0x320] ss:$8 sps:$4 sm:$0xff]  }
 0x149   : > { %4990 = vmatprep.subr.bf16.mxu0 %v9314_v6  ;;  %v9324_v13 = vld [vmem:[%s10791_s5 + $0x34] ss:$8 sps:$4 sm:$0xff]   ;;  %v9328_v15 = vld [vmem:[%s10791_s5 + $0x30] ss:$8 sps:$4 sm:$0xff]   ;;  %v9330_v17 = vld [vmem:[%s10791_s5 + $0x44] ss:$8 sps:$4 sm:$0xff]  }
 0x14a   : > { %v9326_v14 = vld [vmem:[%s10791_s5 + $0x334] ss:$8 sps:$4 sm:$0xff]   ;;  %v9329_v16 = vld [vmem:[%s10791_s5 + $0x330] ss:$8 sps:$4 sm:$0xff]   ;;  %v9332_v18 = vld [vmem:[%s10791_s5 + $0x344] ss:$8 sps:$4 sm:$0xff]  }
 0x14b   : > { %3932 = vmatpush1.bf16.msra.mxu1 %v9316_v7  ;;  %v9334_v19 = vld [vmem:[%s10791_s5 + $0x40] ss:$8 sps:$4 sm:$0xff]   ;;  %v9336_v21 = vld [vmem:[%s10791_s5 + $0x54] ss:$8 sps:$4 sm:$0xff]   ;;  %v9340_v23 = vld [vmem:[%s10791_s5 + $0x50] ss:$8 sps:$4 sm:$0xff]  }
 0x14c   : > { %4991 = vmatpush1.bf16.msra.mxu0 %v9317_v8  ;;  %3933 = vmatprep.subr.bf16.mxu1 %v9318_v9  ;;  %v9335_v20 = vld [vmem:[%s10791_s5 + $0x340] ss:$8 sps:$4 sm:$0xff]   ;;  %v9338_v22 = vld [vmem:[%s10791_s5 + $0x354] ss:$8 sps:$4 sm:$0xff]   ;;  %v9341_v24 = vld [vmem:[%s10791_s5 + $0x350] ss:$8 sps:$4 sm:$0xff]  }
 0x14d   : > { %4992 = vmatprep.subr.bf16.mxu0 %v9320_v10  ;;  %v9342_v25 = vld [vmem:[%s10791_s5 + $0x64] ss:$8 sps:$4 sm:$0xff]   ;;  %v9346_v27 = vld [vmem:[%s10791_s5 + $0x60] ss:$8 sps:$4 sm:$0xff]   ;;  %v9348_v29 = vld [vmem:[%s10791_s5 + $0x74] ss:$8 sps:$4 sm:$0xff]  }
 0x14e   : > { %v9344_v26 = vld [vmem:[%s10791_s5 + $0x364] ss:$8 sps:$4 sm:$0xff]   ;;  %v9347_v28 = vld [vmem:[%s10791_s5 + $0x360] ss:$8 sps:$4 sm:$0xff]   ;;  %v9350_v30 = vld [vmem:[%s10791_s5 + $0x374] ss:$8 sps:$4 sm:$0xff]  }
 0x14f   : > { %3934 = vmatpush1.bf16.msra.mxu1 %v9322_v11  ;;  %v9352_v31 = vld [vmem:[%s10791_s5 + $0x70] ss:$8 sps:$4 sm:$0xff]   ;;  %v9354_v33 = vld [vmem:[%s10791_s5 + $0x84] ss:$8 sps:$4 sm:$0xff]   ;;  %v9358_v35 = vld [vmem:[%s10791_s5 + $0x80] ss:$8 sps:$4 sm:$0xff]  }
 0x150   : > { %4993 = vmatpush1.bf16.msra.mxu0 %v9323_v12  ;;  %3935 = vmatprep.subr.bf16.mxu1 %v9324_v13  ;;  %v9353_v32 = vld [vmem:[%s10791_s5 + $0x370] ss:$8 sps:$4 sm:$0xff]   ;;  %v9356_v34 = vld [vmem:[%s10791_s5 + $0x384] ss:$8 sps:$4 sm:$0xff]   ;;  %v9359_v36 = vld [vmem:[%s10791_s5 + $0x380] ss:$8 sps:$4 sm:$0xff]  }
 0x151   : > { %4994 = vmatprep.subr.bf16.mxu0 %v9326_v14  ;;  %v9360_v37 = vld [vmem:[%s10791_s5 + $0x94] ss:$8 sps:$4 sm:$0xff]   ;;  %v9364_v39 = vld [vmem:[%s10791_s5 + $0x90] ss:$8 sps:$4 sm:$0xff]   ;;  %v9366_v41 = vld [vmem:[%s10791_s5 + $0xa4] ss:$8 sps:$4 sm:$0xff]  }
 0x152   : > { %v9362_v38 = vld [vmem:[%s10791_s5 + $0x394] ss:$8 sps:$4 sm:$0xff]   ;;  %v9365_v40 = vld [vmem:[%s10791_s5 + $0x390] ss:$8 sps:$4 sm:$0xff]   ;;  %v9368_v42 = vld [vmem:[%s10791_s5 + $0x3a4] ss:$8 sps:$4 sm:$0xff]  }
 0x153   : > { %3936 = vmatpush1.bf16.msra.mxu1 %v9328_v15  ;;  %v9370_v43 = vld [vmem:[%s10791_s5 + $0xa0] ss:$8 sps:$4 sm:$0xff]   ;;  %v9372_v45 = vld [vmem:[%s10791_s5 + $0xb4] ss:$8 sps:$4 sm:$0xff]   ;;  %v9376_v47 = vld [vmem:[%s10791_s5 + $0xb0] ss:$8 sps:$4 sm:$0xff]  }
 0x154   : > { %4995 = vmatpush1.bf16.msra.mxu0 %v9329_v16  ;;  %3937 = vmatprep.subr.bf16.mxu1 %v9330_v17  ;;  %v9371_v44 = vld [vmem:[%s10791_s5 + $0x3a0] ss:$8 sps:$4 sm:$0xff]   ;;  %v9374_v46 = vld [vmem:[%s10791_s5 + $0x3b4] ss:$8 sps:$4 sm:$0xff]   ;;  %v9377_v48 = vld [vmem:[%s10791_s5 + $0x3b0] ss:$8 sps:$4 sm:$0xff]  }
 0x155   : > { %4996 = vmatprep.subr.bf16.mxu0 %v9332_v18  ;;  %v9378_v49 = vld [vmem:[%s10791_s5 + $0xc4] ss:$8 sps:$4 sm:$0xff]   ;;  %v9407_v52 = vld [vmem:[%s10784_s18 + $0x1c] ss:$44 sps:$4 sm:$0xff]   ;;  %v9388_v57 = vld [vmem:[%s10791_s5 + $0xd0] ss:$8 sps:$4 sm:$0xff]  }
 0x156   : > { %v9404_v50 = vld [vmem:[%s10784_s18 + $0x4] ss:$44 sps:$4 sm:$0xff]   ;;  %v9382_v53 = vld [vmem:[%s10791_s5 + $0xc0] ss:$8 sps:$4 sm:$0xff]   ;;  %5020 = vmatprep.mubr.bf16.mxu0 %v9407_v52  ;;  %v9384_v55 = vld [vmem:[%s10791_s5 + $0xd4] ss:$8 sps:$4 sm:$0xff]  }
 0x157   : > { %3938 = vmatpush1.bf16.msra.mxu1 %v9334_v19  ;;  %v9380_v51 = vld [vmem:[%s10791_s5 + $0x3c4] ss:$8 sps:$4 sm:$0xff]   ;;  %3961 = vmatprep.mubr.bf16.mxu1 %v9404_v50  ;;  %v9383_v54 = vld [vmem:[%s10791_s5 + $0x3c0] ss:$8 sps:$4 sm:$0xff]   ;;  %v9386_v56 = vld [vmem:[%s10791_s5 + $0x3d4] ss:$8 sps:$4 sm:$0xff]  }
 0x158   : > { %4997 = vmatpush1.bf16.msra.mxu0 %v9335_v20  ;;  %3939 = vmatprep.subr.bf16.mxu1 %v9336_v21  ;;  %v9389_v58 = vld [vmem:[%s10791_s5 + $0x3d0] ss:$8 sps:$4 sm:$0xff]   ;;  %v9390_v59 = vld [vmem:[%s10791_s5 + $0xe4] ss:$8 sps:$4 sm:$0xff]   ;;  %v9394_v61 = vld [vmem:[%s10791_s5 + $0xe0] ss:$8 sps:$4 sm:$0xff]  }
 0x159   : > { %4998 = vmatprep.subr.bf16.mxu0 %v9338_v22  ;;  %v9392_v60 = vld [vmem:[%s10791_s5 + $0x3e4] ss:$8 sps:$4 sm:$0xff]   ;;  %v9395_v62 = vld [vmem:[%s10791_s5 + $0x3e0] ss:$8 sps:$4 sm:$0xff]   ;;  %v9396_v63 = vld [vmem:[%s10791_s5 + $0xf4] ss:$8 sps:$4 sm:$0xff]  }
 0x15a   : > { %v9398_v0 = vld [vmem:[%s10791_s5 + $0x3f4] ss:$8 sps:$4 sm:$0xff]   ;;  %v9400_v1 = vld [vmem:[%s10791_s5 + $0xf0] ss:$8 sps:$4 sm:$0xff]   ;;  %v9410_v3 = vld [vmem:[%s10791_s5 + $0x104] ss:$8 sps:$4 sm:$0xff]  }
 0x15b   : > { %3940 = vmatpush1.bf16.msra.mxu1 %v9340_v23  ;;  %v9401_v2 = vld [vmem:[%s10791_s5 + $0x3f0] ss:$8 sps:$4 sm:$0xff]   ;;  %v9413_v4 = vld [vmem:[%s10791_s5 + $0x404] ss:$8 sps:$4 sm:$0xff]   ;;  %v9408_v7 = vld [vmem:[%s10791_s5 + $0x100] ss:$8 sps:$4 sm:$0xff]  }
 0x15c   : > { %4999 = vmatpush1.bf16.msra.mxu0 %v9341_v24  ;;  %3941 = vmatprep.subr.bf16.mxu1 %v9342_v25  ;;  %v9402_v5 = vld [vmem:[%s10784_s18] ss:$44 sps:$4 sm:$0xff]   ;;  %v9405_v6 = vld [vmem:[%s10784_s18 + $0x18] ss:$44 sps:$4 sm:$0xff]   ;;  %v9414_v9 = vld [vmem:[%s10784_s18 + $0x5c] ss:$44 sps:$4 sm:$0xff]  }
 0x15d   : > { %5000 = vmatprep.subr.bf16.mxu0 %v9344_v26  ;;  %v9411_v8 = vld [vmem:[%s10791_s5 + $0x400] ss:$8 sps:$4 sm:$0xff]   ;;  %v9427_v11 = vld [vmem:[%s10791_s5 + $0x114] ss:$8 sps:$4 sm:$0xff]   ;;  %v9425_v13 = vld [vmem:[%s10791_s5 + $0x110] ss:$8 sps:$4 sm:$0xff]  }
 0x15e   : > { %v9416_v10 = vld [vmem:[%s10784_s18 + $0x74] ss:$44 sps:$4 sm:$0xff]   ;;  %v9429_v14 = vld [vmem:[%s10791_s5 + $0x410] ss:$8 sps:$4 sm:$0xff]   ;;  %v9445_v15 = vld [vmem:[%s10791_s5 + $0x124] ss:$8 sps:$4 sm:$0xff]  }
 0x15f   : > { %3942 = vmatpush1.bf16.msra.mxu1 %v9346_v27  ;;  %v9431_v12 = vld [vmem:[%s10791_s5 + $0x414] ss:$8 sps:$4 sm:$0xff]   ;;  %v9449_v16 = vld [vmem:[%s10791_s5 + $0x424] ss:$8 sps:$4 sm:$0xff]   ;;  %v9443_v21 = vld [vmem:[%s10791_s5 + $0x120] ss:$8 sps:$4 sm:$0xff]  }
 0x160   : > { %5001 = vmatpush1.bf16.msra.mxu0 %v9347_v28  ;;  %3943 = vmatprep.subr.bf16.mxu1 %v9348_v29  ;;  %v9418_v17 = vld [vmem:[%s10784_s18 + $0x58] ss:$44 sps:$4 sm:$0xff]   ;;  %v9419_v18 = vld [vmem:[%s10784_s18 + $0x70] ss:$44 sps:$4 sm:$0xff]   ;;  %v9420_v19 = vld [vmem:[%s10784_s18 + $0xb4] ss:$44 sps:$4 sm:$0xff]  }
 0x161   : > { %5002 = vmatprep.subr.bf16.mxu0 %v9350_v30  ;;  %v9422_v20 = vld [vmem:[%s10784_s18 + $0xcc] ss:$44 sps:$4 sm:$0xff]   ;;  %v9447_v22 = vld [vmem:[%s10791_s5 + $0x420] ss:$8 sps:$4 sm:$0xff]   ;;  %v9463_v23 = vld [vmem:[%s10791_s5 + $0x134] ss:$8 sps:$4 sm:$0xff]  }
 0x162   : > { %v9467_v24 = vld [vmem:[%s10791_s5 + $0x434] ss:$8 sps:$4 sm:$0xff]   ;;  %v9461_v25 = vld [vmem:[%s10791_s5 + $0x130] ss:$8 sps:$4 sm:$0xff]   ;;  %v9481_v30 = vld [vmem:[%s10791_s5 + $0x144] ss:$8 sps:$4 sm:$0xff]  }
 0x163   : > { %3944 = vmatpush1.bf16.msra.mxu1 %v9352_v31  ;;  %v9424_v26 = vld [vmem:[%s10784_s18 + $0xb0] ss:$44 sps:$4 sm:$0xff]   ;;  %v9428_v27 = vld [vmem:[%s10784_s18 + $0xc8] ss:$44 sps:$4 sm:$0xff]   ;;  %v9432_v29 = vld [vmem:[%s10784_s18 + $0x10c] ss:$44 sps:$4 sm:$0xff]  }
 0x164   : > { %5003 = vmatpush1.bf16.msra.mxu0 %v9353_v32  ;;  %3945 = vmatprep.subr.bf16.mxu1 %v9354_v33  ;;  %v9465_v28 = vld [vmem:[%s10791_s5 + $0x430] ss:$8 sps:$4 sm:$0xff]   ;;  %v9485_v32 = vld [vmem:[%s10791_s5 + $0x444] ss:$8 sps:$4 sm:$0xff]   ;;  %v9479_v33 = vld [vmem:[%s10791_s5 + $0x140] ss:$8 sps:$4 sm:$0xff]  }
 0x165   : > { %5004 = vmatprep.subr.bf16.mxu0 %v9356_v34  ;;  %v9434_v31 = vld [vmem:[%s10784_s18 + $0x124] ss:$44 sps:$4 sm:$0xff]   ;;  %v9483_v34 = vld [vmem:[%s10791_s5 + $0x440] ss:$8 sps:$4 sm:$0xff]   ;;  %s12080_s7 = sld [smem:[#allocation21_spill]] }
 0x166   : > { %v9452_v50 = vld [vmem:[%s10784_s18 + $0x1d4] ss:$44 sps:$4 sm:$0xff]   ;;  %v9455_v52 = vld [vmem:[%s10784_s18 + $0x1d0] ss:$44 sps:$4 sm:$0xff]  }
 0x167   : > { %3946 = vmatpush1.bf16.msra.mxu1 %v9358_v35  ;;  %v9436_v35 = vld [vmem:[%s10784_s18 + $0x108] ss:$44 sps:$4 sm:$0xff]  }
 0x168   : > { %5005 = vmatpush1.bf16.msra.mxu0 %v9359_v36  ;;  %3947 = vmatprep.subr.bf16.mxu1 %v9360_v37  ;;  %v9437_v36 = vld [vmem:[%s10784_s18 + $0x120] ss:$44 sps:$4 sm:$0xff]   ;;  %v9497_v37 = vld [vmem:[%s10791_s5 + $0x150] ss:$8 sps:$4 sm:$0xff]  }
 0x169   : > { %5006 = vmatprep.subr.bf16.mxu0 %v9362_v38  ;;  %v9438_v38 = vld [vmem:[%s10784_s18 + $0x164] ss:$44 sps:$4 sm:$0xff]  }
 0x16b   : > { %3948 = vmatpush1.bf16.msra.mxu1 %v9364_v39  ;;  %v9499_v39 = vld [vmem:[%s10791_s5 + $0x154] ss:$8 sps:$4 sm:$0xff]   ;;  %p8358_p5 = scmp.ne.s32.totalorder %s12080_s7, 2 }
 0x16c   : > { %5007 = vmatpush1.bf16.msra.mxu0 %v9365_v40  ;;  %3949 = vmatprep.subr.bf16.mxu1 %v9366_v41  ;;  %v9501_v40 = vld [vmem:[%s10791_s5 + $0x450] ss:$8 sps:$4 sm:$0xff]   ;;  %v9503_v41 = vld [vmem:[%s10791_s5 + $0x454] ss:$8 sps:$4 sm:$0xff]  }
 0x16d   : > { %5008 = vmatprep.subr.bf16.mxu0 %v9368_v42  ;;  %v9440_v42 = vld [vmem:[%s10784_s18 + $0x17c] ss:$44 sps:$4 sm:$0xff]  }
 0x16f   : > { %3950 = vmatpush1.bf16.msra.mxu1 %v9370_v43  ;;  %v9442_v43 = vld [vmem:[%s10784_s18 + $0x160] ss:$44 sps:$4 sm:$0xff]  }
 0x170   : > { %5009 = vmatpush1.bf16.msra.mxu0 %v9371_v44  ;;  %3951 = vmatprep.subr.bf16.mxu1 %v9372_v45  ;;  %v9446_v44 = vld [vmem:[%s10784_s18 + $0x178] ss:$44 sps:$4 sm:$0xff]   ;;  %v9515_v45 = vld [vmem:[%s10791_s5 + $0x160] ss:$8 sps:$4 sm:$0xff]  }
 0x171   : > { %5010 = vmatprep.subr.bf16.mxu0 %v9374_v46  ;;  %v9450_v46 = vld [vmem:[%s10784_s18 + $0x1bc] ss:$44 sps:$4 sm:$0xff]  }
 0x173   : > { %3952 = vmatpush1.bf16.msra.mxu1 %v9376_v47  ;;  %v9517_v47 = vld [vmem:[%s10791_s5 + $0x164] ss:$8 sps:$4 sm:$0xff]  }
 0x174   : > { %5011 = vmatpush1.bf16.msra.mxu0 %v9377_v48  ;;  %3953 = vmatprep.subr.bf16.mxu1 %v9378_v49  ;;  %v9519_v48 = vld [vmem:[%s10791_s5 + $0x460] ss:$8 sps:$4 sm:$0xff]   ;;  %v9521_v49 = vld [vmem:[%s10791_s5 + $0x464] ss:$8 sps:$4 sm:$0xff]  }
 0x175   : > { %5012 = vmatprep.subr.bf16.mxu0 %v9380_v51  ;;  %v9454_v51 = vld [vmem:[%s10784_s18 + $0x1b8] ss:$44 sps:$4 sm:$0xff]  }
 0x177   : > { %3954 = vmatpush1.bf16.msra.mxu1 %v9382_v53  ;;  %v9533_v53 = vld [vmem:[%s10791_s5 + $0x170] ss:$8 sps:$4 sm:$0xff]  }
 0x178   : > { %5013 = vmatpush1.bf16.msra.mxu0 %v9383_v54  ;;  %3955 = vmatprep.subr.bf16.mxu1 %v9384_v55  ;;  %v9456_v54 = vld [vmem:[%s10784_s18 + $0x214] ss:$44 sps:$4 sm:$0xff]  }
 0x179   : > { %5014 = vmatprep.subr.bf16.mxu0 %v9386_v56  ;;  %v9535_v55 = vld [vmem:[%s10791_s5 + $0x174] ss:$8 sps:$4 sm:$0xff]   ;;  %v9537_v56 = vld [vmem:[%s10791_s5 + $0x470] ss:$8 sps:$4 sm:$0xff]  }
 0x17b   : > { %3956 = vmatpush1.bf16.msra.mxu1 %v9388_v57  ;;  %v9539_v57 = vld [vmem:[%s10791_s5 + $0x474] ss:$8 sps:$4 sm:$0xff]  }
 0x17c   : > { %5015 = vmatpush1.bf16.msra.mxu0 %v9389_v58  ;;  %3957 = vmatprep.subr.bf16.mxu1 %v9390_v59  ;;  %v9458_v58 = vld [vmem:[%s10784_s18 + $0x22c] ss:$44 sps:$4 sm:$0xff]   ;;  %v9460_v59 = vld [vmem:[%s10784_s18 + $0x210] ss:$44 sps:$4 sm:$0xff]  }
 0x17d   : > { %5016 = vmatprep.subr.bf16.mxu0 %v9392_v60  ;;  %v9464_v60 = vld [vmem:[%s10784_s18 + $0x228] ss:$44 sps:$4 sm:$0xff]  }
 0x17f   : > { %3958 = vmatpush1.bf16.msra.mxu1 %v9394_v61  ;;  %v9551_v61 = vld [vmem:[%s10791_s5 + $0x180] ss:$8 sps:$4 sm:$0xff]  }
 0x180   : > { %5017 = vmatpush1.bf16.msra.mxu0 %v9395_v62  ;;  %3959 = vmatprep.subr.bf16.mxu1 %v9396_v63  ;;  %v9468_v62 = vld [vmem:[%s10784_s18 + $0x26c] ss:$44 sps:$4 sm:$0xff]  }
 0x181   : > { %5018 = vmatprep.subr.bf16.mxu0 %v9398_v0  ;;  %v9553_v63 = vld [vmem:[%s10791_s5 + $0x184] ss:$8 sps:$4 sm:$0xff]   ;;  %v9555_v0 = vld [vmem:[%s10791_s5 + $0x480] ss:$8 sps:$4 sm:$0xff]  }
 0x183   : > { %3960 = vmatpush1.bf16.msra.mxu1 %v9400_v1  ;;  %v9557_v1 = vld [vmem:[%s10791_s5 + $0x484] ss:$8 sps:$4 sm:$0xff]  }
 0x184   : > { %5019 = vmatpush1.bf16.msra.mxu0 %v9401_v2  ;;  %4282 = vmatprep.subr.bf16.mxu1 %v9410_v3  ;;  %v9470_v2 = vld [vmem:[%s10784_s18 + $0x284] ss:$44 sps:$4 sm:$0xff]   ;;  %v9472_v3 = vld [vmem:[%s10784_s18 + $0x268] ss:$44 sps:$4 sm:$0xff]  }
 0x185   : > { %5341 = vmatprep.subr.bf16.mxu0 %v9413_v4  ;;  %v9473_v4 = vld [vmem:[%s10784_s18 + $0x280] ss:$44 sps:$4 sm:$0xff]  }
 0x186   : > { %3962 = vmatmul.mubr.bf16.vlgmr.msra.gmra.mrb[0].mxu1 %v9402_v5  ;;  %v9569_v5 = vld [vmem:[%s10791_s5 + $0x190] ss:$8 sps:$4 sm:$0xff]  }
 0x187   : > { %5021 = vmatmul.mubr.bf16.vlgmr.msra.gmra.mrb[0].mxu0 %v9405_v6  ;;  %4283 = vmatpush1.bf16.msra.mxu1 %v9408_v7  ;;  %v9474_v6 = vld [vmem:[%s10784_s18 + $0x2c4] ss:$44 sps:$4 sm:$0xff]   ;;  %v9571_v7 = vld [vmem:[%s10791_s5 + $0x194] ss:$8 sps:$4 sm:$0xff]  }
 0x188   : > { %5342 = vmatpush1.bf16.msra.mxu0 %v9411_v8  ;;  %3971 = vmatprep.mubr.bf16.mxu1 %v9414_v9  ;;  %v9573_v8 = vld [vmem:[%s10791_s5 + $0x490] ss:$8 sps:$4 sm:$0xff]   ;;  %v9575_v9 = vld [vmem:[%s10791_s5 + $0x494] ss:$8 sps:$4 sm:$0xff]  }
 0x189   : > { %5030 = vmatprep.mubr.bf16.mxu0 %v9416_v10  ;;  %4284 = vmatprep.subr.bf16.mxu1 %v9427_v11  ;;  %v9476_v10 = vld [vmem:[%s10784_s18 + $0x2dc] ss:$44 sps:$4 sm:$0xff]   ;;  %v9478_v11 = vld [vmem:[%s10784_s18 + $0x2c0] ss:$44 sps:$4 sm:$0xff]  }
 0x18a   : > { %5343 = vmatprep.subr.bf16.mxu0 %v9431_v12  ;;  %v9482_v12 = vld [vmem:[%s10784_s18 + $0x2d8] ss:$44 sps:$4 sm:$0xff]  }
 0x18b   : > { %4285 = vmatpush1.bf16.msra.mxu1 %v9425_v13  ;;  %v9587_v13 = vld [vmem:[%s10791_s5 + $0x1a0] ss:$8 sps:$4 sm:$0xff]  }
 0x18c   : > { %5344 = vmatpush1.bf16.msra.mxu0 %v9429_v14  ;;  %4286 = vmatprep.subr.bf16.mxu1 %v9445_v15  ;;  %v9486_v14 = vld [vmem:[%s10784_s18 + $0x31c] ss:$44 sps:$4 sm:$0xff]   ;;  %v9589_v15 = vld [vmem:[%s10791_s5 + $0x1a4] ss:$8 sps:$4 sm:$0xff]  }
 0x18d   : > { %5345 = vmatprep.subr.bf16.mxu0 %v9449_v16  ;;  %v9591_v16 = vld [vmem:[%s10791_s5 + $0x4a0] ss:$8 sps:$4 sm:$0xff]  }
 0x18e   : > { %3972 = vmatmul.mubr.bf16.gmra.mrb[4].mxu1 %v9418_v17  ;;  %v9593_v17 = vld [vmem:[%s10791_s5 + $0x4a4] ss:$8 sps:$4 sm:$0xff]  }
 0x18f   : > { %5031 = vmatmul.mubr.bf16.gmra.mrb[4].mxu0 %v9419_v18  ;;  %3981 = vmatprep.mubr.bf16.mxu1 %v9420_v19  ;;  %v9488_v18 = vld [vmem:[%s10784_s18 + $0x334] ss:$44 sps:$4 sm:$0xff]   ;;  %v9490_v19 = vld [vmem:[%s10784_s18 + $0x318] ss:$44 sps:$4 sm:$0xff]  }
 0x190   : > { %5040 = vmatprep.mubr.bf16.mxu0 %v9422_v20  ;;  %4287 = vmatpush1.bf16.msra.mxu1 %v9443_v21  ;;  %v9491_v20 = vld [vmem:[%s10784_s18 + $0x330] ss:$44 sps:$4 sm:$0xff]  }
 0x191   : > { %5346 = vmatpush1.bf16.msra.mxu0 %v9447_v22  ;;  %4288 = vmatprep.subr.bf16.mxu1 %v9463_v23  ;;  %v9605_v21 = vld [vmem:[%s10791_s5 + $0x1b0] ss:$8 sps:$4 sm:$0xff]   ;;  %v9492_v22 = vld [vmem:[%s10784_s18 + $0x374] ss:$44 sps:$4 sm:$0xff]  }
 0x192   : > { %5347 = vmatprep.subr.bf16.mxu0 %v9467_v24  ;;  %v9607_v23 = vld [vmem:[%s10791_s5 + $0x1b4] ss:$8 sps:$4 sm:$0xff]   ;;  %v9609_v24 = vld [vmem:[%s10791_s5 + $0x4b0] ss:$8 sps:$4 sm:$0xff]  }
 0x194   : > { %4289 = vmatpush1.bf16.msra.mxu1 %v9461_v25  ;;  %v9611_v25 = vld [vmem:[%s10791_s5 + $0x4b4] ss:$8 sps:$4 sm:$0xff]  }
 0x195   : > { %5348 = vmatpush1.bf16.msra.mxu0 %v9465_v28  ;;  %4290 = vmatprep.subr.bf16.mxu1 %v9481_v30  ;;  %v9500_v28 = vld [vmem:[%s10784_s18 + $0x388] ss:$44 sps:$4 sm:$0xff]   ;;  %v9504_v30 = vld [vmem:[%s10784_s18 + $0x3cc] ss:$44 sps:$4 sm:$0xff]  }
 0x196   : > { %5349 = vmatprep.subr.bf16.mxu0 %v9485_v32  ;;  %3982 = vmatmul.mubr.bf16.gmra.mrb[8].mxu1 %v9424_v26  ;;  %v9494_v26 = vld [vmem:[%s10784_s18 + $0x38c] ss:$44 sps:$4 sm:$0xff]   ;;  %v9627_v32 = vld [vmem:[%s10791_s5 + $0x4c0] ss:$8 sps:$4 sm:$0xff]  }
 0x197   : > { %5041 = vmatmul.mubr.bf16.gmra.mrb[8].mxu0 %v9428_v27  ;;  %3991 = vmatprep.mubr.bf16.mxu1 %v9432_v29  ;;  %v9496_v27 = vld [vmem:[%s10784_s18 + $0x370] ss:$44 sps:$4 sm:$0xff]   ;;  %v9623_v29 = vld [vmem:[%s10791_s5 + $0x1c0] ss:$8 sps:$4 sm:$0xff]  }
 0x198   : > { %5050 = vmatprep.mubr.bf16.mxu0 %v9434_v31  ;;  %4291 = vmatpush1.bf16.msra.mxu1 %v9479_v33  ;;  %v9625_v31 = vld [vmem:[%s10791_s5 + $0x1c4] ss:$8 sps:$4 sm:$0xff]  }
 0x199   : > { %5350 = vmatpush1.bf16.msra.mxu0 %v9483_v34  ;;  %4292 = vmatprep.subr.bf16.mxu1 %v9499_v39  ;;  %v9629_v33 = vld [vmem:[%s10791_s5 + $0x4c4] ss:$8 sps:$4 sm:$0xff]   ;;  %v9643_v39 = vld [vmem:[%s10791_s5 + $0x1d4] ss:$8 sps:$4 sm:$0xff]  }
 0x19a   : > { %5351 = vmatprep.subr.bf16.mxu0 %v9503_v41  ;;  %v9506_v34 = vld [vmem:[%s10784_s18 + $0x3e4] ss:$44 sps:$4 sm:$0xff]   ;;  %v9647_v41 = vld [vmem:[%s10791_s5 + $0x4d4] ss:$8 sps:$4 sm:$0xff]  }
 0x19c   : > { %4293 = vmatpush1.bf16.msra.mxu1 %v9497_v37  ;;  %v9641_v37 = vld [vmem:[%s10791_s5 + $0x1d0] ss:$8 sps:$4 sm:$0xff]  }
 0x19d   : > { %5352 = vmatpush1.bf16.msra.mxu0 %v9501_v40  ;;  %4294 = vmatprep.subr.bf16.mxu1 %v9517_v47  ;;  %v9645_v40 = vld [vmem:[%s10791_s5 + $0x4d0] ss:$8 sps:$4 sm:$0xff]   ;;  %v9659_v47 = vld [vmem:[%s10791_s5 + $0x1e0] ss:$8 sps:$4 sm:$0xff]  }
 0x19e   : > { %3992 = vmatmul.mubr.bf16.gmra.mrb[12].mxu1 %v9436_v35  ;;  %5353 = vmatprep.subr.bf16.mxu0 %v9521_v49  ;;  %v9508_v35 = vld [vmem:[%s10784_s18 + $0x3c8] ss:$44 sps:$4 sm:$0xff]  }
 0x19f   : > { %5051 = vmatmul.mubr.bf16.gmra.mrb[12].mxu0 %v9437_v36  ;;  %4001 = vmatprep.mubr.bf16.mxu1 %v9438_v38  ;;  %v9509_v36 = vld [vmem:[%s10784_s18 + $0x3e0] ss:$44 sps:$4 sm:$0xff]   ;;  %v9510_v38 = vld [vmem:[%s10784_s18 + $0x424] ss:$44 sps:$4 sm:$0xff]  }
 0x1a0   : > { %5060 = vmatprep.mubr.bf16.mxu0 %v9440_v42  ;;  %4295 = vmatpush1.bf16.msra.mxu1 %v9515_v45  ;;  %v9512_v42 = vld [vmem:[%s10784_s18 + $0x43c] ss:$44 sps:$4 sm:$0xff]  }
 0x1a1   : > { %5354 = vmatpush1.bf16.msra.mxu0 %v9519_v48  ;;  %4296 = vmatprep.subr.bf16.mxu1 %v9535_v55  ;;  %v9522_v45 = vld [vmem:[%s10784_s18 + $0x47c] ss:$44 sps:$4 sm:$0xff]   ;;  %v9661_v48 = vld [vmem:[%s10791_s5 + $0x1e4] ss:$8 sps:$4 sm:$0xff]  }
 0x1a2   : > { %5355 = vmatprep.subr.bf16.mxu0 %v9539_v57  ;;  %v9663_v49 = vld [vmem:[%s10791_s5 + $0x4e0] ss:$8 sps:$4 sm:$0xff]   ;;  %v9532_v55 = vld [vmem:[%s10784_s18 + $0x4d0] ss:$44 sps:$4 sm:$0xff]   ;;  %v9540_v57 = vld [vmem:[%s10784_s18 + $0x52c] ss:$44 sps:$4 sm:$0xff]  }
 0x1a4   : > { %4297 = vmatpush1.bf16.msra.mxu1 %v9533_v53  ;;  %v9528_v53 = vld [vmem:[%s10784_s18 + $0x4d4] ss:$44 sps:$4 sm:$0xff]  }
 0x1a5   : > { %5356 = vmatpush1.bf16.msra.mxu0 %v9537_v56  ;;  %4298 = vmatprep.subr.bf16.mxu1 %v9553_v63  ;;  %v9536_v56 = vld [vmem:[%s10784_s18 + $0x4e8] ss:$44 sps:$4 sm:$0xff]  }
 0x1a6   : > { %4002 = vmatmul.mubr.bf16.gmra.mrb[16].mxu1 %v9442_v43  ;;  %5357 = vmatprep.subr.bf16.mxu0 %v9557_v1  ;;  %v9514_v43 = vld [vmem:[%s10784_s18 + $0x420] ss:$44 sps:$4 sm:$0xff]   ;;  %v9544_v63 = vld [vmem:[%s10784_s18 + $0x528] ss:$44 sps:$4 sm:$0xff]   ;;  %v9546_v1 = vld [vmem:[%s10784_s18 + $0x584] ss:$44 sps:$4 sm:$0xff]  }
 0x1a7   : > { %5061 = vmatmul.mubr.bf16.gmra.mrb[16].mxu0 %v9446_v44  ;;  %4011 = vmatprep.mubr.bf16.mxu1 %v9450_v46  ;;  %v9518_v44 = vld [vmem:[%s10784_s18 + $0x438] ss:$44 sps:$4 sm:$0xff]   ;;  %v9524_v46 = vld [vmem:[%s10784_s18 + $0x494] ss:$44 sps:$4 sm:$0xff]  }
 0x1a8   : > { %5070 = vmatprep.mubr.bf16.mxu0 %v9452_v50  ;;  %4299 = vmatpush1.bf16.msra.mxu1 %v9551_v61  ;;  %v9665_v50 = vld [vmem:[%s10791_s5 + $0x4e4] ss:$8 sps:$4 sm:$0xff]   ;;  %v9681_v61 = vld [vmem:[%s10791_s5 + $0x4f0] ss:$8 sps:$4 sm:$0xff]  }
 0x1a9   : > { %5358 = vmatpush1.bf16.msra.mxu0 %v9555_v0  ;;  %4300 = vmatprep.subr.bf16.mxu1 %v9571_v7  ;;  %v9545_v0 = vld [vmem:[%s10784_s18 + $0x540] ss:$44 sps:$4 sm:$0xff]  }
 0x1aa   : > { %5359 = vmatprep.subr.bf16.mxu0 %v9575_v9  ;;  %v9698_v7 = vld [vmem:[%s10791_s5 + $0x204] ss:$8 sps:$4 sm:$0xff]  }
 0x1ab   : > { %v9562_v9 = vld [vmem:[%s10784_s18 + $0x5d8] ss:$44 sps:$4 sm:$0xff]  }
 0x1ac   : > { %4301 = vmatpush1.bf16.msra.mxu1 %v9569_v5  ;;  %v9558_v5 = vld [vmem:[%s10784_s18 + $0x5dc] ss:$44 sps:$4 sm:$0xff]  }
 0x1ad   : > { %5360 = vmatpush1.bf16.msra.mxu0 %v9573_v8  ;;  %4302 = vmatprep.subr.bf16.mxu1 %v9589_v15  ;;  %v9701_v8 = vld [vmem:[%s10791_s5 + $0x504] ss:$8 sps:$4 sm:$0xff]  }
 0x1ae   : > { %4012 = vmatmul.mubr.bf16.gmra.mrb[20].mxu1 %v9454_v51  ;;  %5361 = vmatprep.subr.bf16.mxu0 %v9593_v17  ;;  %v9526_v51 = vld [vmem:[%s10784_s18 + $0x478] ss:$44 sps:$4 sm:$0xff]   ;;  %v9580_v17 = vld [vmem:[%s10784_s18 + $0x688] ss:$44 sps:$4 sm:$0xff]  }
 0x1af   : > { %5071 = vmatmul.mubr.bf16.gmra.mrb[20].mxu0 %v9455_v52  ;;  %4021 = vmatprep.mubr.bf16.mxu1 %v9456_v54  ;;  %v9527_v52 = vld [vmem:[%s10784_s18 + $0x490] ss:$44 sps:$4 sm:$0xff]   ;;  %v9530_v54 = vld [vmem:[%s10784_s18 + $0x4ec] ss:$44 sps:$4 sm:$0xff]  }
 0x1b0   : > { %5080 = vmatprep.mubr.bf16.mxu0 %v9458_v58  ;;  %4303 = vmatpush1.bf16.msra.mxu1 %v9587_v13  ;;  %v9542_v58 = vld [vmem:[%s10784_s18 + $0x544] ss:$44 sps:$4 sm:$0xff]   ;;  %v9576_v15 = vld [vmem:[%s10784_s18 + $0x68c] ss:$44 sps:$4 sm:$0xff]  }
 0x1b1   : > { %5362 = vmatpush1.bf16.msra.mxu0 %v9591_v16  ;;  %4304 = vmatprep.subr.bf16.mxu1 %v9607_v23  ;;  %v9568_v13 = vld [vmem:[%s10784_s18 + $0x630] ss:$44 sps:$4 sm:$0xff]  }
 0x1b2   : > { %5363 = vmatprep.subr.bf16.mxu0 %v9611_v25  ;;  %v9578_v16 = vld [vmem:[%s10784_s18 + $0x6a4] ss:$44 sps:$4 sm:$0xff]   ;;  %v9594_v23 = vld [vmem:[%s10784_s18 + $0x73c] ss:$44 sps:$4 sm:$0xff]  }
 0x1b3   : > { %v9598_v25 = vld [vmem:[%s10784_s18 + $0x738] ss:$44 sps:$4 sm:$0xff]  }
 0x1b4   : > { %4305 = vmatpush1.bf16.msra.mxu1 %v9605_v21  ;;  %v9586_v21 = vld [vmem:[%s10784_s18 + $0x6e0] ss:$44 sps:$4 sm:$0xff]  }
 0x1b5   : > { %5364 = vmatpush1.bf16.msra.mxu0 %v9609_v24  ;;  %4306 = vmatprep.subr.bf16.mxu1 %v9625_v31  ;;  %v9596_v24 = vld [vmem:[%s10784_s18 + $0x754] ss:$44 sps:$4 sm:$0xff]   ;;  %v9612_v31 = vld [vmem:[%s10784_s18 + $0x7ec] ss:$44 sps:$4 sm:$0xff]  }
 0x1b6   : > { %4022 = vmatmul.mubr.bf16.gmra.mrb[24].mxu1 %v9460_v59  ;;  %5365 = vmatprep.subr.bf16.mxu0 %v9629_v33  ;;  %v9677_v59 = vld [vmem:[%s10791_s5 + $0x1f0] ss:$8 sps:$4 sm:$0xff]   ;;  %v9616_v33 = vld [vmem:[%s10784_s18 + $0x7e8] ss:$44 sps:$4 sm:$0xff]  }
 0x1b7   : > { %5081 = vmatmul.mubr.bf16.gmra.mrb[24].mxu0 %v9464_v60  ;;  %4031 = vmatprep.mubr.bf16.mxu1 %v9468_v62  ;;  %v9679_v60 = vld [vmem:[%s10791_s5 + $0x1f4] ss:$8 sps:$4 sm:$0xff]  }
 0x1b8   : > { %5090 = vmatprep.mubr.bf16.mxu0 %v9470_v2  ;;  %4307 = vmatpush1.bf16.msra.mxu1 %v9623_v29  ;;  %v9683_v62 = vld [vmem:[%s10791_s5 + $0x4f4] ss:$8 sps:$4 sm:$0xff]  }
 0x1b9   : > { %5366 = vmatpush1.bf16.msra.mxu0 %v9627_v32  ;;  %4308 = vmatprep.subr.bf16.mxu1 %v9643_v39  ;;  %v9548_v2 = vld [vmem:[%s10784_s18 + $0x59c] ss:$44 sps:$4 sm:$0xff]   ;;  %v9614_v32 = vld [vmem:[%s10784_s18 + $0x804] ss:$44 sps:$4 sm:$0xff]  }
 0x1ba   : > { %5367 = vmatprep.subr.bf16.mxu0 %v9647_v41  ;;  %v9604_v29 = vld [vmem:[%s10784_s18 + $0x790] ss:$44 sps:$4 sm:$0xff]   ;;  %v9634_v41 = vld [vmem:[%s10784_s18 + $0x898] ss:$44 sps:$4 sm:$0xff]  }
 0x1bb   : > { %v9630_v39 = vld [vmem:[%s10784_s18 + $0x89c] ss:$44 sps:$4 sm:$0xff]  }
 0x1bc   : > { %4309 = vmatpush1.bf16.msra.mxu1 %v9641_v37  ;;  %v9622_v37 = vld [vmem:[%s10784_s18 + $0x840] ss:$44 sps:$4 sm:$0xff]  }
 0x1bd   : > { %5368 = vmatpush1.bf16.msra.mxu0 %v9645_v40  ;;  %4310 = vmatprep.subr.bf16.mxu1 %v9661_v48  ;;  %v9632_v40 = vld [vmem:[%s10784_s18 + $0x8b4] ss:$44 sps:$4 sm:$0xff]   ;;  %v9650_v48 = vld [vmem:[%s10784_s18 + $0x964] ss:$44 sps:$4 sm:$0xff]  }
 0x1be   : > { %4032 = vmatmul.mubr.bf16.gmra.mrb[28].mxu1 %v9472_v3  ;;  %5369 = vmatprep.subr.bf16.mxu0 %v9665_v50  ;;  %v9550_v3 = vld [vmem:[%s10784_s18 + $0x580] ss:$44 sps:$4 sm:$0xff]  }
 0x1bf   : > { %5091 = vmatmul.mubr.bf16.gmra.mrb[28].mxu0 %v9473_v4  ;;  %4041 = vmatprep.mubr.bf16.mxu1 %v9474_v6  ;;  %v9554_v4 = vld [vmem:[%s10784_s18 + $0x598] ss:$44 sps:$4 sm:$0xff]   ;;  %v9560_v6 = vld [vmem:[%s10784_s18 + $0x5f4] ss:$44 sps:$4 sm:$0xff]  }
 0x1c0   : > { %5100 = vmatprep.mubr.bf16.mxu0 %v9476_v10  ;;  %4311 = vmatpush1.bf16.msra.mxu1 %v9659_v47  ;;  %v9563_v10 = vld [vmem:[%s10784_s18 + $0x5f0] ss:$44 sps:$4 sm:$0xff]   ;;  %v9648_v47 = vld [vmem:[%s10784_s18 + $0x94c] ss:$44 sps:$4 sm:$0xff]  }
 0x1c1   : > { %5370 = vmatpush1.bf16.msra.mxu0 %v9663_v49  ;;  %4312 = vmatprep.subr.bf16.mxu1 %v9679_v60  ;;  %v9652_v49 = vld [vmem:[%s10784_s18 + $0x948] ss:$44 sps:$4 sm:$0xff]   ;;  %v9653_v50 = vld [vmem:[%s10784_s18 + $0x960] ss:$44 sps:$4 sm:$0xff]  }
 0x1c2   : > { %5371 = vmatprep.subr.bf16.mxu0 %v9683_v62  ;;  %v9674_v60 = vld [vmem:[%s10784_s18 + $0xa6c] ss:$44 sps:$4 sm:$0xff]   ;;  %v9680_v62 = vld [vmem:[%s10784_s18 + $0xa68] ss:$44 sps:$4 sm:$0xff]  }
 0x1c4   : > { %4313 = vmatpush1.bf16.msra.mxu1 %v9677_v59  ;;  %v9672_v59 = vld [vmem:[%s10784_s18 + $0xa54] ss:$44 sps:$4 sm:$0xff]  }
 0x1c5   : > { %5372 = vmatpush1.bf16.msra.mxu0 %v9681_v61  ;;  %4635 = vmatprep.subr.bf16.mxu1 %v9698_v7  ;;  %v9676_v61 = vld [vmem:[%s10784_s18 + $0xa50] ss:$44 sps:$4 sm:$0xff]   ;;  %v9696_v7 = vld [vmem:[%s10791_s5 + $0x200] ss:$8 sps:$4 sm:$0xff]  }
 0x1c6   : > { %4042 = vmatmul.mubr.bf16.gmra.mrb[32].mxu1 %v9478_v11  ;;  %v9564_v11 = vld [vmem:[%s10784_s18 + $0x634] ss:$44 sps:$4 sm:$0xff]   ;;  %5694 = vmatprep.subr.bf16.mxu0 %v9701_v8 }
 0x1c7   : > { %5101 = vmatmul.mubr.bf16.gmra.mrb[32].mxu0 %v9482_v12  ;;  %4051 = vmatprep.mubr.bf16.mxu1 %v9486_v14  ;;  %v9566_v12 = vld [vmem:[%s10784_s18 + $0x64c] ss:$44 sps:$4 sm:$0xff]   ;;  %v9572_v14 = vld [vmem:[%s10784_s18 + $0x648] ss:$44 sps:$4 sm:$0xff]  }
 0x1c8   : > { %5110 = vmatprep.mubr.bf16.mxu0 %v9488_v18  ;;  %v9581_v18 = vld [vmem:[%s10784_s18 + $0x6a0] ss:$44 sps:$4 sm:$0xff]  }
 0x1c9   : > { %v9699_v8 = vld [vmem:[%s10791_s5 + $0x500] ss:$8 sps:$4 sm:$0xff]  }
 0x1ce   : > { %4052 = vmatmul.mubr.bf16.gmra.mrb[36].mxu1 %v9490_v19  ;;  %v9582_v19 = vld [vmem:[%s10784_s18 + $0x6e4] ss:$44 sps:$4 sm:$0xff]  }
 0x1cf   : > { %5111 = vmatmul.mubr.bf16.gmra.mrb[36].mxu0 %v9491_v20  ;;  %4061 = vmatprep.mubr.bf16.mxu1 %v9492_v22  ;;  %v9584_v20 = vld [vmem:[%s10784_s18 + $0x6fc] ss:$44 sps:$4 sm:$0xff]   ;;  %v9590_v22 = vld [vmem:[%s10784_s18 + $0x6f8] ss:$44 sps:$4 sm:$0xff]  }
 0x1d0   : > { %5120 = vmatprep.mubr.bf16.mxu0 %v9494_v26  ;;  %v9599_v26 = vld [vmem:[%s10784_s18 + $0x750] ss:$44 sps:$4 sm:$0xff]  }
 0x1d6   : > { %4062 = vmatmul.mubr.bf16.gmra.mrb[40].mxu1 %v9496_v27  ;;  %v9600_v27 = vld [vmem:[%s10784_s18 + $0x794] ss:$44 sps:$4 sm:$0xff]  }
 0x1d7   : > { %5121 = vmatmul.mubr.bf16.gmra.mrb[40].mxu0 %v9500_v28  ;;  %4071 = vmatprep.mubr.bf16.mxu1 %v9504_v30  ;;  %v9602_v28 = vld [vmem:[%s10784_s18 + $0x7ac] ss:$44 sps:$4 sm:$0xff]   ;;  %v9608_v30 = vld [vmem:[%s10784_s18 + $0x7a8] ss:$44 sps:$4 sm:$0xff]  }
 0x1d8   : > { %5130 = vmatprep.mubr.bf16.mxu0 %v9506_v34  ;;  %v9617_v34 = vld [vmem:[%s10784_s18 + $0x800] ss:$44 sps:$4 sm:$0xff]  }
 0x1de   : > { %4072 = vmatmul.mubr.bf16.gmra.mrb[44].mxu1 %v9508_v35  ;;  %v9618_v35 = vld [vmem:[%s10784_s18 + $0x844] ss:$44 sps:$4 sm:$0xff]  }
 0x1df   : > { %5131 = vmatmul.mubr.bf16.gmra.mrb[44].mxu0 %v9509_v36  ;;  %4081 = vmatprep.mubr.bf16.mxu1 %v9510_v38  ;;  %v9620_v36 = vld [vmem:[%s10784_s18 + $0x85c] ss:$44 sps:$4 sm:$0xff]   ;;  %v9626_v38 = vld [vmem:[%s10784_s18 + $0x858] ss:$44 sps:$4 sm:$0xff]  }
 0x1e0   : > { %5140 = vmatprep.mubr.bf16.mxu0 %v9512_v42  ;;  %v9635_v42 = vld [vmem:[%s10784_s18 + $0x8b0] ss:$44 sps:$4 sm:$0xff]  }
 0x1e6   : > { %4082 = vmatmul.mubr.bf16.gmra.mrb[48].mxu1 %v9514_v43  ;;  %v9636_v43 = vld [vmem:[%s10784_s18 + $0x8f4] ss:$44 sps:$4 sm:$0xff]  }
 0x1e7   : > { %5141 = vmatmul.mubr.bf16.gmra.mrb[48].mxu0 %v9518_v44  ;;  %4091 = vmatprep.mubr.bf16.mxu1 %v9522_v45  ;;  %v9638_v44 = vld [vmem:[%s10784_s18 + $0x90c] ss:$44 sps:$4 sm:$0xff]   ;;  %v9640_v45 = vld [vmem:[%s10784_s18 + $0x8f0] ss:$44 sps:$4 sm:$0xff]  }
 0x1e8   : > { %5150 = vmatprep.mubr.bf16.mxu0 %v9524_v46  ;;  %v9644_v46 = vld [vmem:[%s10784_s18 + $0x908] ss:$44 sps:$4 sm:$0xff]  }
 0x1ee   : > { %4092 = vmatmul.mubr.bf16.gmra.mrb[52].mxu1 %v9526_v51  ;;  %v9654_v51 = vld [vmem:[%s10784_s18 + $0x9a4] ss:$44 sps:$4 sm:$0xff]  }
 0x1ef   : > { %5151 = vmatmul.mubr.bf16.gmra.mrb[52].mxu0 %v9527_v52  ;;  %4101 = vmatprep.mubr.bf16.mxu1 %v9528_v53  ;;  %v9656_v52 = vld [vmem:[%s10784_s18 + $0x9bc] ss:$44 sps:$4 sm:$0xff]   ;;  %v9658_v53 = vld [vmem:[%s10784_s18 + $0x9a0] ss:$44 sps:$4 sm:$0xff]  }
 0x1f0   : > { %5160 = vmatprep.mubr.bf16.mxu0 %v9530_v54  ;;  %v9662_v54 = vld [vmem:[%s10784_s18 + $0x9b8] ss:$44 sps:$4 sm:$0xff]  }
 0x1f6   : > { %4102 = vmatmul.mubr.bf16.gmra.mrb[56].mxu1 %v9532_v55  ;;  %v9666_v55 = vld [vmem:[%s10784_s18 + $0x9fc] ss:$44 sps:$4 sm:$0xff]  }
 0x1f7   : > { %5161 = vmatmul.mubr.bf16.gmra.mrb[56].mxu0 %v9536_v56  ;;  %4111 = vmatprep.mubr.bf16.mxu1 %v9540_v57  ;;  %v9668_v56 = vld [vmem:[%s10784_s18 + $0xa14] ss:$44 sps:$4 sm:$0xff]   ;;  %v9670_v57 = vld [vmem:[%s10784_s18 + $0x9f8] ss:$44 sps:$4 sm:$0xff]  }
 0x1f8   : > { %5170 = vmatprep.mubr.bf16.mxu0 %v9542_v58  ;;  %v9671_v58 = vld [vmem:[%s10784_s18 + $0xa10] ss:$44 sps:$4 sm:$0xff]  }
 0x1fe   : > { %4112 = vmatmul.mubr.bf16.gmra.mrb[60].mxu1 %v9544_v63  ;;  %v9684_v63 = vld [vmem:[%s10784_s18 + $0xaac] ss:$44 sps:$4 sm:$0xff]  }
 0x1ff   : > { %5171 = vmatmul.mubr.bf16.gmra.mrb[60].mxu0 %v9545_v0  ;;  %4121 = vmatprep.mubr.bf16.mxu1 %v9546_v1  ;;  %v9686_v0 = vld [vmem:[%s10784_s18 + $0xac4] ss:$44 sps:$4 sm:$0xff]   ;;  %v9688_v1 = vld [vmem:[%s10784_s18 + $0xaa8] ss:$44 sps:$4 sm:$0xff]  }
 0x200   : > { %5180 = vmatprep.mubr.bf16.mxu0 %v9548_v2  ;;  %v9689_v2 = vld [vmem:[%s10784_s18 + $0xac0] ss:$44 sps:$4 sm:$0xff]  }
 0x206   : > { %4122 = vmatmul.mubr.bf16.gmra.mrb[64].mxu1 %v9550_v3  ;;  %v9692_v3 = vld [vmem:[%s10784_s18 + $0xc] ss:$44 sps:$4 sm:$0xff]  }
 0x207   : > { %5181 = vmatmul.mubr.bf16.gmra.mrb[64].mxu0 %v9554_v4  ;;  %4131 = vmatprep.mubr.bf16.mxu1 %v9558_v5  ;;  %v9695_v4 = vld [vmem:[%s10784_s18 + $0x24] ss:$44 sps:$4 sm:$0xff]   ;;  %v9690_v5 = vld [vmem:[%s10784_s18 + $0x8] ss:$44 sps:$4 sm:$0xff]  }
 0x208   : > { %5190 = vmatprep.mubr.bf16.mxu0 %v9560_v6  ;;  %v9693_v6 = vld [vmem:[%s10784_s18 + $0x20] ss:$44 sps:$4 sm:$0xff]  }
 0x20e   : > { %4132 = vmatmul.mubr.bf16.gmra.mrb[68].mxu1 %v9562_v9  ;;  %v9702_v9 = vld [vmem:[%s10784_s18 + $0x64] ss:$44 sps:$4 sm:$0xff]  }
 0x20f   : > { %5191 = vmatmul.mubr.bf16.gmra.mrb[68].mxu0 %v9563_v10  ;;  %4141 = vmatprep.mubr.bf16.mxu1 %v9564_v11  ;;  %v9704_v10 = vld [vmem:[%s10784_s18 + $0x7c] ss:$44 sps:$4 sm:$0xff]  }
 0x210   : > { %5200 = vmatprep.mubr.bf16.mxu0 %v9566_v12  ;;  %v9715_v11 = vld [vmem:[%s10791_s5 + $0x214] ss:$8 sps:$4 sm:$0xff]  }
 0x211   : > { %v9734_v12 = vld [vmem:[%s10791_s5 + $0x514] ss:$8 sps:$4 sm:$0xff]  }
 0x216   : > { %4142 = vmatmul.mubr.bf16.gmra.mrb[72].mxu1 %v9568_v13  ;;  %v9713_v13 = vld [vmem:[%s10791_s5 + $0x210] ss:$8 sps:$4 sm:$0xff]  }
 0x217   : > { %5201 = vmatmul.mubr.bf16.gmra.mrb[72].mxu0 %v9572_v14  ;;  %4151 = vmatprep.mubr.bf16.mxu1 %v9576_v15  ;;  %v9732_v14 = vld [vmem:[%s10791_s5 + $0x510] ss:$8 sps:$4 sm:$0xff]   ;;  %v9730_v15 = vld [vmem:[%s10791_s5 + $0x224] ss:$8 sps:$4 sm:$0xff]  }
 0x218   : > { %5210 = vmatprep.mubr.bf16.mxu0 %v9578_v16  ;;  %v9767_v16 = vld [vmem:[%s10791_s5 + $0x524] ss:$8 sps:$4 sm:$0xff]  }
 0x21e   : > { %4152 = vmatmul.mubr.bf16.gmra.mrb[76].mxu1 %v9580_v17  ;;  %v9706_v17 = vld [vmem:[%s10784_s18 + $0x60] ss:$44 sps:$4 sm:$0xff]  }
 0x21f   : > { %5211 = vmatmul.mubr.bf16.gmra.mrb[76].mxu0 %v9581_v18  ;;  %4161 = vmatprep.mubr.bf16.mxu1 %v9582_v19  ;;  %v9707_v18 = vld [vmem:[%s10784_s18 + $0x78] ss:$44 sps:$4 sm:$0xff]   ;;  %v9708_v19 = vld [vmem:[%s10784_s18 + $0xbc] ss:$44 sps:$4 sm:$0xff]  }
 0x220   : > { %5220 = vmatprep.mubr.bf16.mxu0 %v9584_v20  ;;  %v9710_v20 = vld [vmem:[%s10784_s18 + $0xd4] ss:$44 sps:$4 sm:$0xff]  }
 0x226   : > { %4162 = vmatmul.mubr.bf16.gmra.mrb[80].mxu1 %v9586_v21  ;;  %v9728_v21 = vld [vmem:[%s10791_s5 + $0x220] ss:$8 sps:$4 sm:$0xff]  }
 0x227   : > { %5221 = vmatmul.mubr.bf16.gmra.mrb[80].mxu0 %v9590_v22  ;;  %4171 = vmatprep.mubr.bf16.mxu1 %v9594_v23  ;;  %v9765_v22 = vld [vmem:[%s10791_s5 + $0x520] ss:$8 sps:$4 sm:$0xff]   ;;  %v9748_v23 = vld [vmem:[%s10791_s5 + $0x234] ss:$8 sps:$4 sm:$0xff]  }
 0x228   : > { %5230 = vmatprep.mubr.bf16.mxu0 %v9596_v24  ;;  %v9800_v24 = vld [vmem:[%s10791_s5 + $0x534] ss:$8 sps:$4 sm:$0xff]  }
 0x22e   : > { %4172 = vmatmul.mubr.bf16.gmra.mrb[84].mxu1 %v9598_v25  ;;  %v9746_v25 = vld [vmem:[%s10791_s5 + $0x230] ss:$8 sps:$4 sm:$0xff]  }
 0x22f   : > { %5231 = vmatmul.mubr.bf16.gmra.mrb[84].mxu0 %v9599_v26  ;;  %4181 = vmatprep.mubr.bf16.mxu1 %v9600_v27  ;;  %v9798_v26 = vld [vmem:[%s10791_s5 + $0x530] ss:$8 sps:$4 sm:$0xff]   ;;  %v9763_v27 = vld [vmem:[%s10791_s5 + $0x244] ss:$8 sps:$4 sm:$0xff]  }
 0x230   : > { %5240 = vmatprep.mubr.bf16.mxu0 %v9602_v28  ;;  %v9833_v28 = vld [vmem:[%s10791_s5 + $0x544] ss:$8 sps:$4 sm:$0xff]  }
 0x236   : > { %4182 = vmatmul.mubr.bf16.gmra.mrb[88].mxu1 %v9604_v29  ;;  %v9712_v29 = vld [vmem:[%s10784_s18 + $0xb8] ss:$44 sps:$4 sm:$0xff]  }
 0x237   : > { %5241 = vmatmul.mubr.bf16.gmra.mrb[88].mxu0 %v9608_v30  ;;  %4191 = vmatprep.mubr.bf16.mxu1 %v9612_v31  ;;  %v9716_v30 = vld [vmem:[%s10784_s18 + $0xd0] ss:$44 sps:$4 sm:$0xff]   ;;  %v9717_v31 = vld [vmem:[%s10784_s18 + $0x114] ss:$44 sps:$4 sm:$0xff]  }
 0x238   : > { %5250 = vmatprep.mubr.bf16.mxu0 %v9614_v32  ;;  %v9719_v32 = vld [vmem:[%s10784_s18 + $0x12c] ss:$44 sps:$4 sm:$0xff]  }
 0x23e   : > { %4192 = vmatmul.mubr.bf16.gmra.mrb[92].mxu1 %v9616_v33  ;;  %v9761_v33 = vld [vmem:[%s10791_s5 + $0x240] ss:$8 sps:$4 sm:$0xff]  }
 0x23f   : > { %5251 = vmatmul.mubr.bf16.gmra.mrb[92].mxu0 %v9617_v34  ;;  %4201 = vmatprep.mubr.bf16.mxu1 %v9618_v35  ;;  %v9831_v34 = vld [vmem:[%s10791_s5 + $0x540] ss:$8 sps:$4 sm:$0xff]   ;;  %v9781_v35 = vld [vmem:[%s10791_s5 + $0x254] ss:$8 sps:$4 sm:$0xff]  }
 0x240   : > { %5260 = vmatprep.mubr.bf16.mxu0 %v9620_v36  ;;  %v9779_v36 = vld [vmem:[%s10791_s5 + $0x250] ss:$8 sps:$4 sm:$0xff]  }
 0x246   : > { %4202 = vmatmul.mubr.bf16.gmra.mrb[96].mxu1 %v9622_v37  ;;  %v9796_v37 = vld [vmem:[%s10791_s5 + $0x264] ss:$8 sps:$4 sm:$0xff]  }
 0x247   : > { %5261 = vmatmul.mubr.bf16.gmra.mrb[96].mxu0 %v9626_v38  ;;  %4211 = vmatprep.mubr.bf16.mxu1 %v9630_v39  ;;  %v9721_v38 = vld [vmem:[%s10784_s18 + $0x110] ss:$44 sps:$4 sm:$0xff]   ;;  %v9722_v39 = vld [vmem:[%s10784_s18 + $0x128] ss:$44 sps:$4 sm:$0xff]  }
 0x248   : > { %5270 = vmatprep.mubr.bf16.mxu0 %v9632_v40  ;;  %v9723_v40 = vld [vmem:[%s10784_s18 + $0x16c] ss:$44 sps:$4 sm:$0xff]  }
 0x24e   : > { %4212 = vmatmul.mubr.bf16.gmra.mrb[100].mxu1 %v9634_v41  ;;  %v9725_v41 = vld [vmem:[%s10784_s18 + $0x184] ss:$44 sps:$4 sm:$0xff]  }
 0x24f   : > { %5271 = vmatmul.mubr.bf16.gmra.mrb[100].mxu0 %v9635_v42  ;;  %4221 = vmatprep.mubr.bf16.mxu1 %v9636_v43  ;;  %v9794_v42 = vld [vmem:[%s10791_s5 + $0x260] ss:$8 sps:$4 sm:$0xff]   ;;  %v9814_v43 = vld [vmem:[%s10791_s5 + $0x274] ss:$8 sps:$4 sm:$0xff]  }
 0x250   : > { %5280 = vmatprep.mubr.bf16.mxu0 %v9638_v44  ;;  %v9812_v44 = vld [vmem:[%s10791_s5 + $0x270] ss:$8 sps:$4 sm:$0xff]  }
 0x256   : > { %4222 = vmatmul.mubr.bf16.gmra.mrb[104].mxu1 %v9640_v45  ;;  %v9829_v45 = vld [vmem:[%s10791_s5 + $0x284] ss:$8 sps:$4 sm:$0xff]  }
 0x257   : > { %5281 = vmatmul.mubr.bf16.gmra.mrb[104].mxu0 %v9644_v46  ;;  %4231 = vmatprep.mubr.bf16.mxu1 %v9648_v47  ;;  %v9727_v46 = vld [vmem:[%s10784_s18 + $0x168] ss:$44 sps:$4 sm:$0xff]   ;;  %v9731_v47 = vld [vmem:[%s10784_s18 + $0x180] ss:$44 sps:$4 sm:$0xff]  }
 0x258   : > { %5290 = vmatprep.mubr.bf16.mxu0 %v9650_v48  ;;  %v9735_v48 = vld [vmem:[%s10784_s18 + $0x1c4] ss:$44 sps:$4 sm:$0xff]  }
 0x25e   : > { %4232 = vmatmul.mubr.bf16.gmra.mrb[108].mxu1 %v9652_v49  ;;  %v9737_v49 = vld [vmem:[%s10784_s18 + $0x1dc] ss:$44 sps:$4 sm:$0xff]  }
 0x25f   : > { %5291 = vmatmul.mubr.bf16.gmra.mrb[108].mxu0 %v9653_v50  ;;  %4241 = vmatprep.mubr.bf16.mxu1 %v9654_v51  ;;  %v9827_v50 = vld [vmem:[%s10791_s5 + $0x280] ss:$8 sps:$4 sm:$0xff]   ;;  %v9847_v51 = vld [vmem:[%s10791_s5 + $0x294] ss:$8 sps:$4 sm:$0xff]  }
 0x260   : > { %5300 = vmatprep.mubr.bf16.mxu0 %v9656_v52  ;;  %v9864_v52 = vld [vmem:[%s10791_s5 + $0x550] ss:$8 sps:$4 sm:$0xff]  }
 0x266   : > { %4242 = vmatmul.mubr.bf16.gmra.mrb[112].mxu1 %v9658_v53  ;;  %v9866_v53 = vld [vmem:[%s10791_s5 + $0x554] ss:$8 sps:$4 sm:$0xff]  }
 0x267   : > { %5301 = vmatmul.mubr.bf16.gmra.mrb[112].mxu0 %v9662_v54  ;;  %4251 = vmatprep.mubr.bf16.mxu1 %v9666_v55  ;;  %v9845_v54 = vld [vmem:[%s10791_s5 + $0x290] ss:$8 sps:$4 sm:$0xff]   ;;  %v9862_v55 = vld [vmem:[%s10791_s5 + $0x2a4] ss:$8 sps:$4 sm:$0xff]  }
 0x268   : > { %5310 = vmatprep.mubr.bf16.mxu0 %v9668_v56  ;;  %v9739_v56 = vld [vmem:[%s10784_s18 + $0x1c0] ss:$44 sps:$4 sm:$0xff]  }
 0x26e   : > { %4252 = vmatmul.mubr.bf16.gmra.mrb[116].mxu1 %v9670_v57  ;;  %v9740_v57 = vld [vmem:[%s10784_s18 + $0x1d8] ss:$44 sps:$4 sm:$0xff]  }
 0x26f   : > { %5311 = vmatmul.mubr.bf16.gmra.mrb[116].mxu0 %v9671_v58  ;;  %4261 = vmatprep.mubr.bf16.mxu1 %v9672_v59  ;;  %v9741_v58 = vld [vmem:[%s10784_s18 + $0x21c] ss:$44 sps:$4 sm:$0xff]   ;;  %v9743_v59 = vld [vmem:[%s10784_s18 + $0x234] ss:$44 sps:$4 sm:$0xff]  }
 0x270   : > { %5320 = vmatprep.mubr.bf16.mxu0 %v9674_v60  ;;  %v9860_v60 = vld [vmem:[%s10791_s5 + $0x2a0] ss:$8 sps:$4 sm:$0xff]  }
 0x276   : > { %4262 = vmatmul.mubr.bf16.gmra.mrb[120].mxu1 %v9676_v61  ;;  %v9745_v61 = vld [vmem:[%s10784_s18 + $0x218] ss:$44 sps:$4 sm:$0xff]  }
 0x277   : > { %5321 = vmatmul.mubr.bf16.gmra.mrb[120].mxu0 %v9680_v62  ;;  %4271 = vmatprep.mubr.bf16.mxu1 %v9684_v63  ;;  %v9749_v62 = vld [vmem:[%s10784_s18 + $0x230] ss:$44 sps:$4 sm:$0xff]   ;;  %v9750_v63 = vld [vmem:[%s10784_s18 + $0x274] ss:$44 sps:$4 sm:$0xff]  }
 0x278   : > { %5330 = vmatprep.mubr.bf16.mxu0 %v9686_v0  ;;  %v9752_v0 = vld [vmem:[%s10784_s18 + $0x28c] ss:$44 sps:$4 sm:$0xff]  }
 0x27e   : > { %4272 = vmatmul.mubr.bf16.gmra.mrb[124].mxu1 %v9688_v1  ;;  %v9878_v1 = vld [vmem:[%s10791_s5 + $0x2b0] ss:$8 sps:$4 sm:$0xff]  }
 0x27f   : > { %5331 = vmatmul.mubr.bf16.gmra.mrb[124].mxu0 %v9689_v2  ;;  %4314 = vmatprep.mubr.bf16.mxu1 %v9692_v3  ;;  %v9880_v2 = vld [vmem:[%s10791_s5 + $0x2b4] ss:$8 sps:$4 sm:$0xff]  }
 0x280   : > { %5373 = vmatprep.mubr.bf16.mxu0 %v9695_v4  ;;  %v9754_v3 = vld [vmem:[%s10784_s18 + $0x270] ss:$44 sps:$4 sm:$0xff]   ;;  %v9755_v4 = vld [vmem:[%s10784_s18 + $0x288] ss:$44 sps:$4 sm:$0xff]  }
 0x286   : > { %4315 = vmatmul.mubr.bf16.vlgmr.msra.gmra.mrb[0].mxu1 %v9690_v5  ;;  %v9756_v5 = vld [vmem:[%s10784_s18 + $0x2cc] ss:$44 sps:$4 sm:$0xff]  }
 0x287   : > { %5374 = vmatmul.mubr.bf16.vlgmr.msra.gmra.mrb[0].mxu0 %v9693_v6  ;;  %4636 = vmatpush1.bf16.msra.mxu1 %v9696_v7  ;;  %v9758_v6 = vld [vmem:[%s10784_s18 + $0x2e4] ss:$44 sps:$4 sm:$0xff]   ;;  %v9760_v7 = vld [vmem:[%s10784_s18 + $0x2c8] ss:$44 sps:$4 sm:$0xff]  }
 0x288   : > { %5695 = vmatpush1.bf16.msra.mxu0 %v9699_v8  ;;  %4324 = vmatprep.mubr.bf16.mxu1 %v9702_v9  ;;  %v9764_v8 = vld [vmem:[%s10784_s18 + $0x2e0] ss:$44 sps:$4 sm:$0xff]   ;;  %v9768_v9 = vld [vmem:[%s10784_s18 + $0x324] ss:$44 sps:$4 sm:$0xff]  }
 0x289   : > { %5383 = vmatprep.mubr.bf16.mxu0 %v9704_v10  ;;  %4637 = vmatprep.subr.bf16.mxu1 %v9715_v11  ;;  %v9770_v10 = vld [vmem:[%s10784_s18 + $0x33c] ss:$44 sps:$4 sm:$0xff]  }
 0x28a   : > { %5696 = vmatprep.subr.bf16.mxu0 %v9734_v12  ;;  %v9893_v11 = vld [vmem:[%s10791_s5 + $0x2c0] ss:$8 sps:$4 sm:$0xff]   ;;  %v9895_v12 = vld [vmem:[%s10791_s5 + $0x2c4] ss:$8 sps:$4 sm:$0xff]  }
 0x28b   : > { %4638 = vmatpush1.bf16.msra.mxu1 %v9713_v13  ;;  %v9897_v13 = vld [vmem:[%s10791_s5 + $0x560] ss:$8 sps:$4 sm:$0xff]  }
 0x28c   : > { %5697 = vmatpush1.bf16.msra.mxu0 %v9732_v14  ;;  %4639 = vmatprep.subr.bf16.mxu1 %v9730_v15  ;;  %v9899_v14 = vld [vmem:[%s10791_s5 + $0x564] ss:$8 sps:$4 sm:$0xff]  }
 0x28d   : > { %5698 = vmatprep.subr.bf16.mxu0 %v9767_v16  ;;  %v9772_v15 = vld [vmem:[%s10784_s18 + $0x320] ss:$44 sps:$4 sm:$0xff]   ;;  %v9773_v16 = vld [vmem:[%s10784_s18 + $0x338] ss:$44 sps:$4 sm:$0xff]  }
 0x28e   : > { %4325 = vmatmul.mubr.bf16.gmra.mrb[4].mxu1 %v9706_v17  ;;  %v9774_v17 = vld [vmem:[%s10784_s18 + $0x37c] ss:$44 sps:$4 sm:$0xff]  }
 0x28f   : > { %5384 = vmatmul.mubr.bf16.gmra.mrb[4].mxu0 %v9707_v18  ;;  %4334 = vmatprep.mubr.bf16.mxu1 %v9708_v19  ;;  %v9776_v18 = vld [vmem:[%s10784_s18 + $0x394] ss:$44 sps:$4 sm:$0xff]   ;;  %v9778_v19 = vld [vmem:[%s10784_s18 + $0x378] ss:$44 sps:$4 sm:$0xff]  }
 0x290   : > { %5393 = vmatprep.mubr.bf16.mxu0 %v9710_v20  ;;  %4640 = vmatpush1.bf16.msra.mxu1 %v9728_v21  ;;  %v9782_v20 = vld [vmem:[%s10784_s18 + $0x390] ss:$44 sps:$4 sm:$0xff]   ;;  %v9783_v21 = vld [vmem:[%s10784_s18 + $0x3d4] ss:$44 sps:$4 sm:$0xff]  }
 0x291   : > { %5699 = vmatpush1.bf16.msra.mxu0 %v9765_v22  ;;  %4641 = vmatprep.subr.bf16.mxu1 %v9748_v23  ;;  %v9785_v22 = vld [vmem:[%s10784_s18 + $0x3ec] ss:$44 sps:$4 sm:$0xff]  }
 0x292   : > { %5700 = vmatprep.subr.bf16.mxu0 %v9800_v24  ;;  %v9911_v23 = vld [vmem:[%s10791_s5 + $0x2d0] ss:$8 sps:$4 sm:$0xff]   ;;  %v9913_v24 = vld [vmem:[%s10791_s5 + $0x2d4] ss:$8 sps:$4 sm:$0xff]  }
 0x294   : > { %4642 = vmatpush1.bf16.msra.mxu1 %v9746_v25  ;;  %v9787_v25 = vld [vmem:[%s10784_s18 + $0x3d0] ss:$44 sps:$4 sm:$0xff]  }
 0x295   : > { %5701 = vmatpush1.bf16.msra.mxu0 %v9798_v26  ;;  %4643 = vmatprep.subr.bf16.mxu1 %v9763_v27  ;;  %v9788_v26 = vld [vmem:[%s10784_s18 + $0x3e8] ss:$44 sps:$4 sm:$0xff]   ;;  %v9789_v27 = vld [vmem:[%s10784_s18 + $0x42c] ss:$44 sps:$4 sm:$0xff]  }
 0x296   : > { %5702 = vmatprep.subr.bf16.mxu0 %v9833_v28  ;;  %4335 = vmatmul.mubr.bf16.gmra.mrb[8].mxu1 %v9712_v29  ;;  %v9791_v28 = vld [vmem:[%s10784_s18 + $0x444] ss:$44 sps:$4 sm:$0xff]   ;;  %v9793_v29 = vld [vmem:[%s10784_s18 + $0x428] ss:$44 sps:$4 sm:$0xff]  }
 0x297   : > { %5394 = vmatmul.mubr.bf16.gmra.mrb[8].mxu0 %v9716_v30  ;;  %4344 = vmatprep.mubr.bf16.mxu1 %v9717_v31  ;;  %v9797_v30 = vld [vmem:[%s10784_s18 + $0x440] ss:$44 sps:$4 sm:$0xff]   ;;  %v9801_v31 = vld [vmem:[%s10784_s18 + $0x484] ss:$44 sps:$4 sm:$0xff]  }
 0x298   : > { %5403 = vmatprep.mubr.bf16.mxu0 %v9719_v32  ;;  %4644 = vmatpush1.bf16.msra.mxu1 %v9761_v33  ;;  %v9803_v32 = vld [vmem:[%s10784_s18 + $0x49c] ss:$44 sps:$4 sm:$0xff]  }
 0x299   : > { %5703 = vmatpush1.bf16.msra.mxu0 %v9831_v34  ;;  %4645 = vmatprep.subr.bf16.mxu1 %v9781_v35  ;;  %v9926_v33 = vld [vmem:[%s10791_s5 + $0x2e0] ss:$8 sps:$4 sm:$0xff]   ;;  %v9928_v34 = vld [vmem:[%s10791_s5 + $0x2e4] ss:$8 sps:$4 sm:$0xff]   ;;  %v9930_v35 = vld [vmem:[%s10791_s5 + $0x570] ss:$8 sps:$4 sm:$0xff]  }
 0x29a   : > { %5704 = vmatprep.subr.bf16.mxu0 %v9866_v53  ;;  %v9834_v53 = vld [vmem:[%s10784_s18 + $0x5e4] ss:$44 sps:$4 sm:$0xff]  }
 0x29c   : > { %4646 = vmatpush1.bf16.msra.mxu1 %v9779_v36  ;;  %v9932_v36 = vld [vmem:[%s10791_s5 + $0x574] ss:$8 sps:$4 sm:$0xff]  }
 0x29d   : > { %4647 = vmatprep.subr.bf16.mxu1 %v9796_v37  ;;  %5705 = vmatpush1.bf16.msra.mxu0 %v9864_v52  ;;  %v9805_v37 = vld [vmem:[%s10784_s18 + $0x480] ss:$44 sps:$4 sm:$0xff]  }
 0x29e   : > { %4345 = vmatmul.mubr.bf16.gmra.mrb[12].mxu1 %v9721_v38  ;;  %5706 = vmatprep.subr.bf16.mxu0 %v9899_v14  ;;  %v9806_v38 = vld [vmem:[%s10784_s18 + $0x498] ss:$44 sps:$4 sm:$0xff]   ;;  %v9830_v52 = vld [vmem:[%s10784_s18 + $0x5a0] ss:$44 sps:$4 sm:$0xff]  }
 0x29f   : > { %5404 = vmatmul.mubr.bf16.gmra.mrb[12].mxu0 %v9722_v39  ;;  %4354 = vmatprep.mubr.bf16.mxu1 %v9723_v40  ;;  %v9807_v39 = vld [vmem:[%s10784_s18 + $0x4dc] ss:$44 sps:$4 sm:$0xff]   ;;  %v9809_v40 = vld [vmem:[%s10784_s18 + $0x4f4] ss:$44 sps:$4 sm:$0xff]   ;;  %v9884_v14 = vld [vmem:[%s10784_s18 + $0x80c] ss:$44 sps:$4 sm:$0xff]  }
 0x2a0   : > { %5413 = vmatprep.mubr.bf16.mxu0 %v9725_v41  ;;  %4648 = vmatpush1.bf16.msra.mxu1 %v9794_v42  ;;  %v9811_v41 = vld [vmem:[%s10784_s18 + $0x4d8] ss:$44 sps:$4 sm:$0xff]   ;;  %v9815_v42 = vld [vmem:[%s10784_s18 + $0x4f0] ss:$44 sps:$4 sm:$0xff]  }
 0x2a1   : > { %4649 = vmatprep.subr.bf16.mxu1 %v9814_v43  ;;  %5707 = vmatpush1.bf16.msra.mxu0 %v9897_v13  ;;  %v9816_v43 = vld [vmem:[%s10784_s18 + $0x534] ss:$44 sps:$4 sm:$0xff]  }
 0x2a2   : > { %5708 = vmatprep.subr.bf16.mxu0 %v9932_v36  ;;  %v9882_v13 = vld [vmem:[%s10784_s18 + $0x7f4] ss:$44 sps:$4 sm:$0xff]  }
 0x2a3   : > { %v9929_v36 = vld [vmem:[%s10784_s18 + $0x9c0] ss:$44 sps:$4 sm:$0xff]  }
 0x2a4   : > { %4650 = vmatpush1.bf16.msra.mxu1 %v9812_v44  ;;  %v9818_v44 = vld [vmem:[%s10784_s18 + $0x54c] ss:$44 sps:$4 sm:$0xff]  }
 0x2a5   : > { %4651 = vmatprep.subr.bf16.mxu1 %v9829_v45  ;;  %5709 = vmatpush1.bf16.msra.mxu0 %v9930_v35  ;;  %v9944_v45 = vld [vmem:[%s10791_s5 + $0x2f0] ss:$8 sps:$4 sm:$0xff]   ;;  %v9925_v35 = vld [vmem:[%s10784_s18 + $0x9a8] ss:$44 sps:$4 sm:$0xff]  }
 0x2a6   : > { %4355 = vmatmul.mubr.bf16.gmra.mrb[16].mxu1 %v9727_v46  ;;  %v9946_v46 = vld [vmem:[%s10791_s5 + $0x2f4] ss:$8 sps:$4 sm:$0xff]  }
 0x2a7   : > { %5414 = vmatmul.mubr.bf16.gmra.mrb[16].mxu0 %v9731_v47  ;;  %4364 = vmatprep.mubr.bf16.mxu1 %v9735_v48  ;;  %v9820_v47 = vld [vmem:[%s10784_s18 + $0x530] ss:$44 sps:$4 sm:$0xff]   ;;  %v9821_v48 = vld [vmem:[%s10784_s18 + $0x548] ss:$44 sps:$4 sm:$0xff]  }
 0x2a8   : > { %5423 = vmatprep.mubr.bf16.mxu0 %v9737_v49  ;;  %4652 = vmatpush1.bf16.msra.mxu1 %v9827_v50  ;;  %v9822_v49 = vld [vmem:[%s10784_s18 + $0x58c] ss:$44 sps:$4 sm:$0xff]   ;;  %v9824_v50 = vld [vmem:[%s10784_s18 + $0x5a4] ss:$44 sps:$4 sm:$0xff]  }
 0x2a9   : > { %4653 = vmatprep.subr.bf16.mxu1 %v9847_v51  ;;  %v9826_v51 = vld [vmem:[%s10784_s18 + $0x588] ss:$44 sps:$4 sm:$0xff]  }
 0x2ac   : > { %4654 = vmatpush1.bf16.msra.mxu1 %v9845_v54  ;;  %v9836_v54 = vld [vmem:[%s10784_s18 + $0x5fc] ss:$44 sps:$4 sm:$0xff]  }
 0x2ad   : > { %4655 = vmatprep.subr.bf16.mxu1 %v9862_v55  ;;  %v9838_v55 = vld [vmem:[%s10784_s18 + $0x5e0] ss:$44 sps:$4 sm:$0xff]  }
 0x2ae   : > { %4365 = vmatmul.mubr.bf16.gmra.mrb[20].mxu1 %v9739_v56  ;;  %v9839_v56 = vld [vmem:[%s10784_s18 + $0x5f8] ss:$44 sps:$4 sm:$0xff]  }
 0x2af   : > { %5424 = vmatmul.mubr.bf16.gmra.mrb[20].mxu0 %v9740_v57  ;;  %4374 = vmatprep.mubr.bf16.mxu1 %v9741_v58  ;;  %v9840_v57 = vld [vmem:[%s10784_s18 + $0x63c] ss:$44 sps:$4 sm:$0xff]   ;;  %v9842_v58 = vld [vmem:[%s10784_s18 + $0x654] ss:$44 sps:$4 sm:$0xff]  }
 0x2b0   : > { %5433 = vmatprep.mubr.bf16.mxu0 %v9743_v59  ;;  %4656 = vmatpush1.bf16.msra.mxu1 %v9860_v60  ;;  %v9844_v59 = vld [vmem:[%s10784_s18 + $0x638] ss:$44 sps:$4 sm:$0xff]   ;;  %v9848_v60 = vld [vmem:[%s10784_s18 + $0x650] ss:$44 sps:$4 sm:$0xff]  }
 0x2b1   : > { %4657 = vmatprep.subr.bf16.mxu1 %v9880_v2  ;;  %v9857_v2 = vld [vmem:[%s10784_s18 + $0x704] ss:$44 sps:$4 sm:$0xff]  }
 0x2b4   : > { %4658 = vmatpush1.bf16.msra.mxu1 %v9878_v1  ;;  %v9855_v1 = vld [vmem:[%s10784_s18 + $0x6ec] ss:$44 sps:$4 sm:$0xff]  }
 0x2b5   : > { %4659 = vmatprep.subr.bf16.mxu1 %v9895_v12  ;;  %v9881_v12 = vld [vmem:[%s10784_s18 + $0x7b0] ss:$44 sps:$4 sm:$0xff]  }
 0x2b6   : > { %4375 = vmatmul.mubr.bf16.gmra.mrb[24].mxu1 %v9745_v61  ;;  %v9849_v61 = vld [vmem:[%s10784_s18 + $0x694] ss:$44 sps:$4 sm:$0xff]  }
 0x2b7   : > { %5434 = vmatmul.mubr.bf16.gmra.mrb[24].mxu0 %v9749_v62  ;;  %4384 = vmatprep.mubr.bf16.mxu1 %v9750_v63  ;;  %v9851_v62 = vld [vmem:[%s10784_s18 + $0x6ac] ss:$44 sps:$4 sm:$0xff]   ;;  %v9853_v63 = vld [vmem:[%s10784_s18 + $0x690] ss:$44 sps:$4 sm:$0xff]  }
 0x2b8   : > { %5443 = vmatprep.mubr.bf16.mxu0 %v9752_v0  ;;  %4660 = vmatpush1.bf16.msra.mxu1 %v9893_v11  ;;  %v9854_v0 = vld [vmem:[%s10784_s18 + $0x6a8] ss:$44 sps:$4 sm:$0xff]   ;;  %v9877_v11 = vld [vmem:[%s10784_s18 + $0x798] ss:$44 sps:$4 sm:$0xff]  }
 0x2b9   : > { %4661 = vmatprep.subr.bf16.mxu1 %v9913_v24  ;;  %v9905_v24 = vld [vmem:[%s10784_s18 + $0x8b8] ss:$44 sps:$4 sm:$0xff]  }
 0x2bc   : > { %4662 = vmatpush1.bf16.msra.mxu1 %v9911_v23  ;;  %v9904_v23 = vld [vmem:[%s10784_s18 + $0x8a0] ss:$44 sps:$4 sm:$0xff]  }
 0x2bd   : > { %4663 = vmatprep.subr.bf16.mxu1 %v9928_v34  ;;  %v9923_v34 = vld [vmem:[%s10784_s18 + $0x9c4] ss:$44 sps:$4 sm:$0xff]  }
 0x2be   : > { %4385 = vmatmul.mubr.bf16.gmra.mrb[28].mxu1 %v9754_v3  ;;  %v9859_v3 = vld [vmem:[%s10784_s18 + $0x6e8] ss:$44 sps:$4 sm:$0xff]  }
 0x2bf   : > { %5444 = vmatmul.mubr.bf16.gmra.mrb[28].mxu0 %v9755_v4  ;;  %4394 = vmatprep.mubr.bf16.mxu1 %v9756_v5  ;;  %v9863_v4 = vld [vmem:[%s10784_s18 + $0x700] ss:$44 sps:$4 sm:$0xff]   ;;  %v9867_v5 = vld [vmem:[%s10784_s18 + $0x744] ss:$44 sps:$4 sm:$0xff]  }
 0x2c0   : > { %5453 = vmatprep.mubr.bf16.mxu0 %v9758_v6  ;;  %4664 = vmatpush1.bf16.msra.mxu1 %v9926_v33  ;;  %v9869_v6 = vld [vmem:[%s10784_s18 + $0x75c] ss:$44 sps:$4 sm:$0xff]   ;;  %v9921_v33 = vld [vmem:[%s10784_s18 + $0x9ac] ss:$44 sps:$4 sm:$0xff]  }
 0x2c1   : > { %4665 = vmatprep.subr.bf16.mxu1 %v9946_v46  ;;  %v9950_v46 = vld [vmem:[%s10784_s18 + $0xacc] ss:$44 sps:$4 sm:$0xff]  }
 0x2c4   : > { %4666 = vmatpush1.bf16.msra.mxu1 %v9944_v45  ;;  %v9948_v45 = vld [vmem:[%s10784_s18 + $0xab4] ss:$44 sps:$4 sm:$0xff]  }
 0x2c6   : > { %4395 = vmatmul.mubr.bf16.gmra.mrb[32].mxu1 %v9760_v7  ;;  %v9871_v7 = vld [vmem:[%s10784_s18 + $0x740] ss:$44 sps:$4 sm:$0xff]  }
 0x2c7   : > { %5454 = vmatmul.mubr.bf16.gmra.mrb[32].mxu0 %v9764_v8  ;;  %4404 = vmatprep.mubr.bf16.mxu1 %v9768_v9  ;;  %v9872_v8 = vld [vmem:[%s10784_s18 + $0x758] ss:$44 sps:$4 sm:$0xff]   ;;  %v9873_v9 = vld [vmem:[%s10784_s18 + $0x79c] ss:$44 sps:$4 sm:$0xff]  }
 0x2c8   : > { %5463 = vmatprep.mubr.bf16.mxu0 %v9770_v10  ;;  %v9875_v10 = vld [vmem:[%s10784_s18 + $0x7b4] ss:$44 sps:$4 sm:$0xff]  }
 0x2ce   : > { %4405 = vmatmul.mubr.bf16.gmra.mrb[36].mxu1 %v9772_v15  ;;  %v9886_v15 = vld [vmem:[%s10784_s18 + $0x7f0] ss:$44 sps:$4 sm:$0xff]  }
 0x2cf   : > { %5464 = vmatmul.mubr.bf16.gmra.mrb[36].mxu0 %v9773_v16  ;;  %4414 = vmatprep.mubr.bf16.mxu1 %v9774_v17  ;;  %v9887_v16 = vld [vmem:[%s10784_s18 + $0x808] ss:$44 sps:$4 sm:$0xff]   ;;  %v9888_v17 = vld [vmem:[%s10784_s18 + $0x84c] ss:$44 sps:$4 sm:$0xff]  }
 0x2d0   : > { %5473 = vmatprep.mubr.bf16.mxu0 %v9776_v18  ;;  %v9890_v18 = vld [vmem:[%s10784_s18 + $0x864] ss:$44 sps:$4 sm:$0xff]  }
 0x2d6   : > { %4415 = vmatmul.mubr.bf16.gmra.mrb[40].mxu1 %v9778_v19  ;;  %v9892_v19 = vld [vmem:[%s10784_s18 + $0x848] ss:$44 sps:$4 sm:$0xff]  }
 0x2d7   : > { %5474 = vmatmul.mubr.bf16.gmra.mrb[40].mxu0 %v9782_v20  ;;  %4424 = vmatprep.mubr.bf16.mxu1 %v9783_v21  ;;  %v9896_v20 = vld [vmem:[%s10784_s18 + $0x860] ss:$44 sps:$4 sm:$0xff]   ;;  %v9900_v21 = vld [vmem:[%s10784_s18 + $0x8a4] ss:$44 sps:$4 sm:$0xff]  }
 0x2d8   : > { %5483 = vmatprep.mubr.bf16.mxu0 %v9785_v22  ;;  %v9902_v22 = vld [vmem:[%s10784_s18 + $0x8bc] ss:$44 sps:$4 sm:$0xff]  }
 0x2de   : > { %4425 = vmatmul.mubr.bf16.gmra.mrb[44].mxu1 %v9787_v25  ;;  %v9906_v25 = vld [vmem:[%s10784_s18 + $0x8fc] ss:$44 sps:$4 sm:$0xff]  }
 0x2df   : > { %5484 = vmatmul.mubr.bf16.gmra.mrb[44].mxu0 %v9788_v26  ;;  %4434 = vmatprep.mubr.bf16.mxu1 %v9789_v27  ;;  %v9908_v26 = vld [vmem:[%s10784_s18 + $0x914] ss:$44 sps:$4 sm:$0xff]   ;;  %v9910_v27 = vld [vmem:[%s10784_s18 + $0x8f8] ss:$44 sps:$4 sm:$0xff]  }
 0x2e0   : > { %5493 = vmatprep.mubr.bf16.mxu0 %v9791_v28  ;;  %v9914_v28 = vld [vmem:[%s10784_s18 + $0x910] ss:$44 sps:$4 sm:$0xff]  }
 0x2e6   : > { %4435 = vmatmul.mubr.bf16.gmra.mrb[48].mxu1 %v9793_v29  ;;  %v9915_v29 = vld [vmem:[%s10784_s18 + $0x954] ss:$44 sps:$4 sm:$0xff]  }
 0x2e7   : > { %5494 = vmatmul.mubr.bf16.gmra.mrb[48].mxu0 %v9797_v30  ;;  %4444 = vmatprep.mubr.bf16.mxu1 %v9801_v31  ;;  %v9917_v30 = vld [vmem:[%s10784_s18 + $0x96c] ss:$44 sps:$4 sm:$0xff]   ;;  %v9919_v31 = vld [vmem:[%s10784_s18 + $0x950] ss:$44 sps:$4 sm:$0xff]  }
 0x2e8   : > { %5503 = vmatprep.mubr.bf16.mxu0 %v9803_v32  ;;  %v9920_v32 = vld [vmem:[%s10784_s18 + $0x968] ss:$44 sps:$4 sm:$0xff]  }
 0x2ee   : > { %4445 = vmatmul.mubr.bf16.gmra.mrb[52].mxu1 %v9805_v37  ;;  %v9933_v37 = vld [vmem:[%s10784_s18 + $0xa04] ss:$44 sps:$4 sm:$0xff]  }
 0x2ef   : > { %5504 = vmatmul.mubr.bf16.gmra.mrb[52].mxu0 %v9806_v38  ;;  %4454 = vmatprep.mubr.bf16.mxu1 %v9807_v39  ;;  %v9935_v38 = vld [vmem:[%s10784_s18 + $0xa1c] ss:$44 sps:$4 sm:$0xff]   ;;  %v9937_v39 = vld [vmem:[%s10784_s18 + $0xa00] ss:$44 sps:$4 sm:$0xff]  }
 0x2f0   : > { %5513 = vmatprep.mubr.bf16.mxu0 %v9809_v40  ;;  %v9938_v40 = vld [vmem:[%s10784_s18 + $0xa18] ss:$44 sps:$4 sm:$0xff]  }
 0x2f6   : > { %4455 = vmatmul.mubr.bf16.gmra.mrb[56].mxu1 %v9811_v41  ;;  %v9939_v41 = vld [vmem:[%s10784_s18 + $0xa5c] ss:$44 sps:$4 sm:$0xff]  }
 0x2f7   : > { %5514 = vmatmul.mubr.bf16.gmra.mrb[56].mxu0 %v9815_v42  ;;  %4464 = vmatprep.mubr.bf16.mxu1 %v9816_v43  ;;  %v9941_v42 = vld [vmem:[%s10784_s18 + $0xa74] ss:$44 sps:$4 sm:$0xff]   ;;  %v9943_v43 = vld [vmem:[%s10784_s18 + $0xa58] ss:$44 sps:$4 sm:$0xff]  }
 0x2f8   : > { %5523 = vmatprep.mubr.bf16.mxu0 %v9818_v44  ;;  %v9947_v44 = vld [vmem:[%s10784_s18 + $0xa70] ss:$44 sps:$4 sm:$0xff]  }
 0x2fe   : > { %4465 = vmatmul.mubr.bf16.gmra.mrb[60].mxu1 %v9820_v47  ;;  %v9952_v47 = vld [vmem:[%s10784_s18 + $0xab0] ss:$44 sps:$4 sm:$0xff]  }
 0x2ff   : > { %5524 = vmatmul.mubr.bf16.gmra.mrb[60].mxu0 %v9821_v48  ;;  %4474 = vmatprep.mubr.bf16.mxu1 %v9822_v49  ;;  %v9953_v48 = vld [vmem:[%s10784_s18 + $0xac8] ss:$44 sps:$4 sm:$0xff]  }
 0x300   : > { %5533 = vmatprep.mubr.bf16.mxu0 %v9824_v50  ;;  %v9956_v49 = vld [vmem:[%s10784_s18 + $0x14] ss:$44 sps:$4 sm:$0xff]   ;;  %v10399_v50 = vmov 0  }
 0x306   : > { %4475 = vmatmul.mubr.bf16.gmra.mrb[64].mxu1 %v9826_v51  ;;  %v9954_v51 = vld [vmem:[%s10784_s18 + $0x10] ss:$44 sps:$4 sm:$0xff]  }
 0x307   : > { %5534 = vmatmul.mubr.bf16.gmra.mrb[64].mxu0 %v9830_v52  ;;  %4484 = vmatprep.mubr.bf16.mxu1 %v9834_v53  ;;  %v9957_v52 = vld [vmem:[%s10784_s18 + $0x28] ss:$44 sps:$4 sm:$0xff]   ;;  %v9958_v53 = vld [vmem:[%s10784_s18 + $0x6c] ss:$44 sps:$4 sm:$0xff]  }
 0x308   : > { %5543 = vmatprep.mubr.bf16.mxu0 %v9836_v54  ;;  %v9960_v54 = vld [vmem:[%s10784_s18 + $0x68] ss:$44 sps:$4 sm:$0xff]  }
 0x30e   : > { %4485 = vmatmul.mubr.bf16.gmra.mrb[68].mxu1 %v9838_v55  ;;  %v9961_v55 = vld [vmem:[%s10784_s18 + $0x80] ss:$44 sps:$4 sm:$0xff]  }
 0x30f   : > { %5544 = vmatmul.mubr.bf16.gmra.mrb[68].mxu0 %v9839_v56  ;;  %4494 = vmatprep.mubr.bf16.mxu1 %v9840_v57  ;;  %v9962_v56 = vld [vmem:[%s10784_s18 + $0xc4] ss:$44 sps:$4 sm:$0xff]   ;;  %v9964_v57 = vld [vmem:[%s10784_s18 + $0xc0] ss:$44 sps:$4 sm:$0xff]  }
 0x310   : > { %5553 = vmatprep.mubr.bf16.mxu0 %v9842_v58  ;;  %v9965_v58 = vld [vmem:[%s10784_s18 + $0xd8] ss:$44 sps:$4 sm:$0xff]  }
 0x316   : > { %4495 = vmatmul.mubr.bf16.gmra.mrb[72].mxu1 %v9844_v59  ;;  %v9966_v59 = vld [vmem:[%s10784_s18 + $0x11c] ss:$44 sps:$4 sm:$0xff]  }
 0x317   : > { %5554 = vmatmul.mubr.bf16.gmra.mrb[72].mxu0 %v9848_v60  ;;  %4504 = vmatprep.mubr.bf16.mxu1 %v9849_v61  ;;  %v9968_v60 = vld [vmem:[%s10784_s18 + $0x118] ss:$44 sps:$4 sm:$0xff]   ;;  %v9969_v61 = vld [vmem:[%s10784_s18 + $0x130] ss:$44 sps:$4 sm:$0xff]  }
 0x318   : > { %5563 = vmatprep.mubr.bf16.mxu0 %v9851_v62  ;;  %v9970_v62 = vld [vmem:[%s10784_s18 + $0x174] ss:$44 sps:$4 sm:$0xff]  }
 0x31e   : > { %4505 = vmatmul.mubr.bf16.gmra.mrb[76].mxu1 %v9853_v63  ;;  %v9972_v63 = vld [vmem:[%s10784_s18 + $0x170] ss:$44 sps:$4 sm:$0xff]  }
 0x31f   : > { %5564 = vmatmul.mubr.bf16.gmra.mrb[76].mxu0 %v9854_v0  ;;  %4514 = vmatprep.mubr.bf16.mxu1 %v9855_v1  ;;  %v9973_v0 = vld [vmem:[%s10784_s18 + $0x188] ss:$44 sps:$4 sm:$0xff]   ;;  %v9974_v1 = vld [vmem:[%s10784_s18 + $0x1cc] ss:$44 sps:$4 sm:$0xff]  }
 0x320   : > { %5573 = vmatprep.mubr.bf16.mxu0 %v9857_v2  ;;  %v9976_v2 = vld [vmem:[%s10784_s18 + $0x1c8] ss:$44 sps:$4 sm:$0xff]  }
 0x326   : > { %4515 = vmatmul.mubr.bf16.gmra.mrb[80].mxu1 %v9859_v3  ;;  %v9977_v3 = vld [vmem:[%s10784_s18 + $0x1e0] ss:$44 sps:$4 sm:$0xff]  }
 0x327   : > { %5574 = vmatmul.mubr.bf16.gmra.mrb[80].mxu0 %v9863_v4  ;;  %4524 = vmatprep.mubr.bf16.mxu1 %v9867_v5  ;;  %v9978_v4 = vld [vmem:[%s10784_s18 + $0x224] ss:$44 sps:$4 sm:$0xff]   ;;  %v9980_v5 = vld [vmem:[%s10784_s18 + $0x220] ss:$44 sps:$4 sm:$0xff]  }
 0x328   : > { %5583 = vmatprep.mubr.bf16.mxu0 %v9869_v6  ;;  %v9981_v6 = vld [vmem:[%s10784_s18 + $0x238] ss:$44 sps:$4 sm:$0xff]  }
 0x32e   : > { %4525 = vmatmul.mubr.bf16.gmra.mrb[84].mxu1 %v9871_v7  ;;  %v9982_v7 = vld [vmem:[%s10784_s18 + $0x27c] ss:$44 sps:$4 sm:$0xff]  }
 0x32f   : > { %5584 = vmatmul.mubr.bf16.gmra.mrb[84].mxu0 %v9872_v8  ;;  %4534 = vmatprep.mubr.bf16.mxu1 %v9873_v9  ;;  %v9984_v8 = vld [vmem:[%s10784_s18 + $0x278] ss:$44 sps:$4 sm:$0xff]   ;;  %v9985_v9 = vld [vmem:[%s10784_s18 + $0x290] ss:$44 sps:$4 sm:$0xff]  }
 0x330   : > { %5593 = vmatprep.mubr.bf16.mxu0 %v9875_v10  ;;  %v9986_v10 = vld [vmem:[%s10784_s18 + $0x2d4] ss:$44 sps:$4 sm:$0xff]  }
 0x336   : > { %4535 = vmatmul.mubr.bf16.gmra.mrb[88].mxu1 %v9877_v11  ;;  %v9988_v11 = vld [vmem:[%s10784_s18 + $0x2d0] ss:$44 sps:$4 sm:$0xff]  }
 0x337   : > { %5594 = vmatmul.mubr.bf16.gmra.mrb[88].mxu0 %v9881_v12  ;;  %4544 = vmatprep.mubr.bf16.mxu1 %v9882_v13  ;;  %v9989_v12 = vld [vmem:[%s10784_s18 + $0x2e8] ss:$44 sps:$4 sm:$0xff]   ;;  %v9990_v13 = vld [vmem:[%s10784_s18 + $0x32c] ss:$44 sps:$4 sm:$0xff]  }
 0x338   : > { %5603 = vmatprep.mubr.bf16.mxu0 %v9884_v14  ;;  %v9992_v14 = vld [vmem:[%s10784_s18 + $0x328] ss:$44 sps:$4 sm:$0xff]  }
 0x33e   : > { %4545 = vmatmul.mubr.bf16.gmra.mrb[92].mxu1 %v9886_v15  ;;  %v9993_v15 = vld [vmem:[%s10784_s18 + $0x340] ss:$44 sps:$4 sm:$0xff]  }
 0x33f   : > { %5604 = vmatmul.mubr.bf16.gmra.mrb[92].mxu0 %v9887_v16  ;;  %4554 = vmatprep.mubr.bf16.mxu1 %v9888_v17  ;;  %v9994_v16 = vld [vmem:[%s10784_s18 + $0x384] ss:$44 sps:$4 sm:$0xff]   ;;  %v9996_v17 = vld [vmem:[%s10784_s18 + $0x380] ss:$44 sps:$4 sm:$0xff]  }
 0x340   : > { %5613 = vmatprep.mubr.bf16.mxu0 %v9890_v18  ;;  %v9997_v18 = vld [vmem:[%s10784_s18 + $0x398] ss:$44 sps:$4 sm:$0xff]  }
 0x346   : > { %4555 = vmatmul.mubr.bf16.gmra.mrb[96].mxu1 %v9892_v19  ;;  %v9998_v19 = vld [vmem:[%s10784_s18 + $0x3dc] ss:$44 sps:$4 sm:$0xff]  }
 0x347   : > { %5614 = vmatmul.mubr.bf16.gmra.mrb[96].mxu0 %v9896_v20  ;;  %4564 = vmatprep.mubr.bf16.mxu1 %v9900_v21  ;;  %v10000_v20 = vld [vmem:[%s10784_s18 + $0x3d8] ss:$44 sps:$4 sm:$0xff]   ;;  %v10001_v21 = vld [vmem:[%s10784_s18 + $0x3f0] ss:$44 sps:$4 sm:$0xff]  }
 0x348   : > { %5623 = vmatprep.mubr.bf16.mxu0 %v9902_v22  ;;  %v10002_v22 = vld [vmem:[%s10784_s18 + $0x434] ss:$44 sps:$4 sm:$0xff]  }
 0x34e   : > { %4565 = vmatmul.mubr.bf16.gmra.mrb[100].mxu1 %v9904_v23  ;;  %v10004_v23 = vld [vmem:[%s10784_s18 + $0x430] ss:$44 sps:$4 sm:$0xff]  }
 0x34f   : > { %5624 = vmatmul.mubr.bf16.gmra.mrb[100].mxu0 %v9905_v24  ;;  %4574 = vmatprep.mubr.bf16.mxu1 %v9906_v25  ;;  %v10005_v24 = vld [vmem:[%s10784_s18 + $0x448] ss:$44 sps:$4 sm:$0xff]   ;;  %v10006_v25 = vld [vmem:[%s10784_s18 + $0x48c] ss:$44 sps:$4 sm:$0xff]  }
 0x350   : > { %5633 = vmatprep.mubr.bf16.mxu0 %v9908_v26  ;;  %v10008_v26 = vld [vmem:[%s10784_s18 + $0x488] ss:$44 sps:$4 sm:$0xff]  }
 0x356   : > { %4575 = vmatmul.mubr.bf16.gmra.mrb[104].mxu1 %v9910_v27  ;;  %v10009_v27 = vld [vmem:[%s10784_s18 + $0x4a0] ss:$44 sps:$4 sm:$0xff]  }
 0x357   : > { %5634 = vmatmul.mubr.bf16.gmra.mrb[104].mxu0 %v9914_v28  ;;  %4584 = vmatprep.mubr.bf16.mxu1 %v9915_v29  ;;  %v10010_v28 = vld [vmem:[%s10784_s18 + $0x4e4] ss:$44 sps:$4 sm:$0xff]   ;;  %v10012_v29 = vld [vmem:[%s10784_s18 + $0x4e0] ss:$44 sps:$4 sm:$0xff]  }
 0x358   : > { %5643 = vmatprep.mubr.bf16.mxu0 %v9917_v30  ;;  %v10013_v30 = vld [vmem:[%s10784_s18 + $0x4f8] ss:$44 sps:$4 sm:$0xff]  }
 0x35e   : > { %4585 = vmatmul.mubr.bf16.gmra.mrb[108].mxu1 %v9919_v31  ;;  %v10014_v31 = vld [vmem:[%s10784_s18 + $0x53c] ss:$44 sps:$4 sm:$0xff]  }
 0x35f   : > { %5644 = vmatmul.mubr.bf16.gmra.mrb[108].mxu0 %v9920_v32  ;;  %4594 = vmatprep.mubr.bf16.mxu1 %v9921_v33  ;;  %v10016_v32 = vld [vmem:[%s10784_s18 + $0x538] ss:$44 sps:$4 sm:$0xff]   ;;  %v10017_v33 = vld [vmem:[%s10784_s18 + $0x550] ss:$44 sps:$4 sm:$0xff]  }
 0x360   : > { %5653 = vmatprep.mubr.bf16.mxu0 %v9923_v34  ;;  %v10018_v34 = vld [vmem:[%s10784_s18 + $0x594] ss:$44 sps:$4 sm:$0xff]  }
 0x366   : > { %4595 = vmatmul.mubr.bf16.gmra.mrb[112].mxu1 %v9925_v35  ;;  %v10020_v35 = vld [vmem:[%s10784_s18 + $0x590] ss:$44 sps:$4 sm:$0xff]  }
 0x367   : > { %5654 = vmatmul.mubr.bf16.gmra.mrb[112].mxu0 %v9929_v36  ;;  %4604 = vmatprep.mubr.bf16.mxu1 %v9933_v37  ;;  %v10021_v36 = vld [vmem:[%s10784_s18 + $0x5a8] ss:$44 sps:$4 sm:$0xff]   ;;  %v10022_v37 = vld [vmem:[%s10784_s18 + $0x5ec] ss:$44 sps:$4 sm:$0xff]  }
 0x368   : > { %5663 = vmatprep.mubr.bf16.mxu0 %v9935_v38  ;;  %v10024_v38 = vld [vmem:[%s10784_s18 + $0x5e8] ss:$44 sps:$4 sm:$0xff]  }
 0x36e   : > { %4605 = vmatmul.mubr.bf16.gmra.mrb[116].mxu1 %v9937_v39  ;;  %v10025_v39 = vld [vmem:[%s10784_s18 + $0x600] ss:$44 sps:$4 sm:$0xff]  }
 0x36f   : > { %5664 = vmatmul.mubr.bf16.gmra.mrb[116].mxu0 %v9938_v40  ;;  %4614 = vmatprep.mubr.bf16.mxu1 %v9939_v41  ;;  %v10026_v40 = vld [vmem:[%s10784_s18 + $0x644] ss:$44 sps:$4 sm:$0xff]   ;;  %v10028_v41 = vld [vmem:[%s10784_s18 + $0x640] ss:$44 sps:$4 sm:$0xff]  }
 0x370   : > { %5673 = vmatprep.mubr.bf16.mxu0 %v9941_v42  ;;  %v10029_v42 = vld [vmem:[%s10784_s18 + $0x658] ss:$44 sps:$4 sm:$0xff]  }
 0x376   : > { %4615 = vmatmul.mubr.bf16.gmra.mrb[120].mxu1 %v9943_v43  ;;  %v10030_v43 = vld [vmem:[%s10784_s18 + $0x69c] ss:$44 sps:$4 sm:$0xff]  }
 0x377   : > { %5674 = vmatmul.mubr.bf16.gmra.mrb[120].mxu0 %v9947_v44  ;;  %4624 = vmatprep.mubr.bf16.mxu1 %v9948_v45  ;;  %v10032_v44 = vld [vmem:[%s10784_s18 + $0x698] ss:$44 sps:$4 sm:$0xff]   ;;  %v10033_v45 = vld [vmem:[%s10784_s18 + $0x6b0] ss:$44 sps:$4 sm:$0xff]  }
 0x378   : > { %5683 = vmatprep.mubr.bf16.mxu0 %v9950_v46  ;;  %v10034_v46 = vld [vmem:[%s10784_s18 + $0x6f4] ss:$44 sps:$4 sm:$0xff]  }
 0x37e   : > { %4625 = vmatmul.mubr.bf16.gmra.mrb[124].mxu1 %v9952_v47  ;;  %v10036_v47 = vld [vmem:[%s10784_s18 + $0x6f0] ss:$44 sps:$4 sm:$0xff]  }
 0x37f   : > { %5684 = vmatmul.mubr.bf16.gmra.mrb[124].mxu0 %v9953_v48  ;;  %4667 = vmatprep.mubr.bf16.mxu1 %v9956_v49  ;;  %v10037_v48 = vld [vmem:[%s10784_s18 + $0x708] ss:$44 sps:$4 sm:$0xff]   ;;  %v10038_v49 = vld [vmem:[%s10784_s18 + $0x74c] ss:$44 sps:$4 sm:$0xff]  }
 0x380   : > { %5726 = vmatprep.mubr.bf16.mxu0 %v10399_v50 }
 0x386   : > { %4668 = vmatmul.mubr.bf16.vlgmr.msra.gmra.mrb[0].mxu1 %v9954_v51  ;;  %v10040_v51 = vld [vmem:[%s10784_s18 + $0x748] ss:$44 sps:$4 sm:$0xff]  }
 0x387   : > { %5727 = vmatmul.mubr.bf16.vlgmr.msra.gmra.mrb[0].mxu0 %v9957_v52  ;;  %4677 = vmatprep.mubr.bf16.mxu1 %v9958_v53  ;;  %v10041_v52 = vld [vmem:[%s10784_s18 + $0x760] ss:$44 sps:$4 sm:$0xff]   ;;  %v10042_v53 = vld [vmem:[%s10784_s18 + $0x7a4] ss:$44 sps:$4 sm:$0xff]  }
 0x388   : > { %5736 = vmatprep.mubr.bf16.mxu0 %v10399_v50 }
 0x38e   : > { %4678 = vmatmul.mubr.bf16.gmra.mrb[4].mxu1 %v9960_v54  ;;  %v10044_v54 = vld [vmem:[%s10784_s18 + $0x7a0] ss:$44 sps:$4 sm:$0xff]  }
 0x38f   : > { %5737 = vmatmul.mubr.bf16.gmra.mrb[4].mxu0 %v9961_v55  ;;  %4687 = vmatprep.mubr.bf16.mxu1 %v9962_v56  ;;  %v10045_v55 = vld [vmem:[%s10784_s18 + $0x7b8] ss:$44 sps:$4 sm:$0xff]   ;;  %v10046_v56 = vld [vmem:[%s10784_s18 + $0x7fc] ss:$44 sps:$4 sm:$0xff]  }
 0x390   : > { %5746 = vmatprep.mubr.bf16.mxu0 %v10399_v50 }
 0x396   : > { %4688 = vmatmul.mubr.bf16.gmra.mrb[8].mxu1 %v9964_v57  ;;  %v10048_v57 = vld [vmem:[%s10784_s18 + $0x7f8] ss:$44 sps:$4 sm:$0xff]  }
 0x397   : > { %5747 = vmatmul.mubr.bf16.gmra.mrb[8].mxu0 %v9965_v58  ;;  %4697 = vmatprep.mubr.bf16.mxu1 %v9966_v59  ;;  %v10049_v58 = vld [vmem:[%s10784_s18 + $0x810] ss:$44 sps:$4 sm:$0xff]   ;;  %v10050_v59 = vld [vmem:[%s10784_s18 + $0x854] ss:$44 sps:$4 sm:$0xff]  }
 0x398   : > { %5756 = vmatprep.mubr.bf16.mxu0 %v10399_v50 }
 0x39e   : > { %4698 = vmatmul.mubr.bf16.gmra.mrb[12].mxu1 %v9968_v60  ;;  %v10052_v60 = vld [vmem:[%s10784_s18 + $0x850] ss:$44 sps:$4 sm:$0xff]  }
 0x39f   : > { %5757 = vmatmul.mubr.bf16.gmra.mrb[12].mxu0 %v9969_v61  ;;  %4707 = vmatprep.mubr.bf16.mxu1 %v9970_v62  ;;  %v10053_v61 = vld [vmem:[%s10784_s18 + $0x868] ss:$44 sps:$4 sm:$0xff]   ;;  %v10054_v62 = vld [vmem:[%s10784_s18 + $0x8ac] ss:$44 sps:$4 sm:$0xff]  }
 0x3a0   : > { %5766 = vmatprep.mubr.bf16.mxu0 %v10399_v50 }
 0x3a6   : > { %4708 = vmatmul.mubr.bf16.gmra.mrb[16].mxu1 %v9972_v63  ;;  %v10056_v63 = vld [vmem:[%s10784_s18 + $0x8a8] ss:$44 sps:$4 sm:$0xff]  }
 0x3a7   : > { %5767 = vmatmul.mubr.bf16.gmra.mrb[16].mxu0 %v9973_v0  ;;  %4717 = vmatprep.mubr.bf16.mxu1 %v9974_v1  ;;  %v10057_v0 = vld [vmem:[%s10784_s18 + $0x8c0] ss:$44 sps:$4 sm:$0xff]   ;;  %v10058_v1 = vld [vmem:[%s10784_s18 + $0x904] ss:$44 sps:$4 sm:$0xff]  }
 0x3a8   : > { %5776 = vmatprep.mubr.bf16.mxu0 %v10399_v50 }
 0x3ae   : > { %4718 = vmatmul.mubr.bf16.gmra.mrb[20].mxu1 %v9976_v2  ;;  %v10060_v2 = vld [vmem:[%s10784_s18 + $0x900] ss:$44 sps:$4 sm:$0xff]  }
 0x3af   : > { %5777 = vmatmul.mubr.bf16.gmra.mrb[20].mxu0 %v9977_v3  ;;  %4727 = vmatprep.mubr.bf16.mxu1 %v9978_v4  ;;  %v10061_v3 = vld [vmem:[%s10784_s18 + $0x918] ss:$44 sps:$4 sm:$0xff]   ;;  %v10062_v4 = vld [vmem:[%s10784_s18 + $0x95c] ss:$44 sps:$4 sm:$0xff]  }
 0x3b0   : > { %5786 = vmatprep.mubr.bf16.mxu0 %v10399_v50 }
 0x3b6   : > { %4728 = vmatmul.mubr.bf16.gmra.mrb[24].mxu1 %v9980_v5 }
 0x3b7   : > { %5787 = vmatmul.mubr.bf16.gmra.mrb[24].mxu0 %v9981_v6  ;;  %4737 = vmatprep.mubr.bf16.mxu1 %v9982_v7  ;;  %v569_v6 = vld [vmem:[#allocation2] sm:$0xff] }
 0x3b8   : > { %5796 = vmatprep.mubr.bf16.mxu0 %v10399_v50 }
 0x3be   : > { %4738 = vmatmul.mubr.bf16.gmra.mrb[28].mxu1 %v9984_v8  ;;  %v570_v8 = vld [vmem:[#allocation2 + $0x8] sm:$0xff] }
 0x3bf   : > { %5797 = vmatmul.mubr.bf16.gmra.mrb[28].mxu0 %v9985_v9  ;;  %4747 = vmatprep.mubr.bf16.mxu1 %v9986_v10 }
 0x3c0   : > { %5806 = vmatprep.mubr.bf16.mxu0 %v10399_v50 }
 0x3c6   : > { %4748 = vmatmul.mubr.bf16.gmra.mrb[32].mxu1 %v9988_v11 }
 0x3c7   : > { %5807 = vmatmul.mubr.bf16.gmra.mrb[32].mxu0 %v9989_v12  ;;  %4757 = vmatprep.mubr.bf16.mxu1 %v9990_v13  ;;  %v10064_v12 = vld [vmem:[%s10784_s18 + $0x958] ss:$44 sps:$4 sm:$0xff]   ;;  %v10065_v13 = vld [vmem:[%s10784_s18 + $0x970] ss:$44 sps:$4 sm:$0xff]  }
 0x3c8   : > { %5816 = vmatprep.mubr.bf16.mxu0 %v10399_v50 }
 0x3ce   : > { %4758 = vmatmul.mubr.bf16.gmra.mrb[36].mxu1 %v9992_v14 }
 0x3cf   : > { %5817 = vmatmul.mubr.bf16.gmra.mrb[36].mxu0 %v9993_v15  ;;  %4767 = vmatprep.mubr.bf16.mxu1 %v9994_v16  ;;  %v571_v16 = vld [vmem:[#allocation2 + $0x10] sm:$0xff] }
 0x3d0   : > { %5826 = vmatprep.mubr.bf16.mxu0 %v10399_v50 }
 0x3d6   : > { %4768 = vmatmul.mubr.bf16.gmra.mrb[40].mxu1 %v9996_v17 }
 0x3d7   : > { %5827 = vmatmul.mubr.bf16.gmra.mrb[40].mxu0 %v9997_v18  ;;  %4777 = vmatprep.mubr.bf16.mxu1 %v9998_v19  ;;  %v10066_v18 = vld [vmem:[%s10784_s18 + $0x9b4] ss:$44 sps:$4 sm:$0xff]  }
 0x3d8   : > { %5836 = vmatprep.mubr.bf16.mxu0 %v10399_v50 }
 0x3de   : > { %4778 = vmatmul.mubr.bf16.gmra.mrb[44].mxu1 %v10000_v20 }
 0x3df   : > { %5837 = vmatmul.mubr.bf16.gmra.mrb[44].mxu0 %v10001_v21  ;;  %4787 = vmatprep.mubr.bf16.mxu1 %v10002_v22  ;;  %v572_v22 = vld [vmem:[#allocation2 + $0x18] sm:$0xff] }
 0x3e0   : > { %5846 = vmatprep.mubr.bf16.mxu0 %v10399_v50 }
 0x3e6   : > { %4788 = vmatmul.mubr.bf16.gmra.mrb[48].mxu1 %v10004_v23 }
 0x3e7   : > { %5847 = vmatmul.mubr.bf16.gmra.mrb[48].mxu0 %v10005_v24  ;;  %4797 = vmatprep.mubr.bf16.mxu1 %v10006_v25 }
 0x3e8   : > { %5856 = vmatprep.mubr.bf16.mxu0 %v10399_v50 }
 0x3ee   : > { %4798 = vmatmul.mubr.bf16.gmra.mrb[52].mxu1 %v10008_v26 }
 0x3ef   : > { %5857 = vmatmul.mubr.bf16.gmra.mrb[52].mxu0 %v10009_v27  ;;  %4807 = vmatprep.mubr.bf16.mxu1 %v10010_v28 }
 0x3f0   : > { %5866 = vmatprep.mubr.bf16.mxu0 %v10399_v50 }
 0x3f6   : > { %4808 = vmatmul.mubr.bf16.gmra.mrb[56].mxu1 %v10012_v29  ;;  %v573_v29 = vld [vmem:[#allocation2 + $0x20] sm:$0xff] }
 0x3f7   : > { %5867 = vmatmul.mubr.bf16.gmra.mrb[56].mxu0 %v10013_v30  ;;  %4817 = vmatprep.mubr.bf16.mxu1 %v10014_v31  ;;  %v574_v31 = vld [vmem:[#allocation2 + $0x28] sm:$0xff] }
 0x3f8   : > { %5876 = vmatprep.mubr.bf16.mxu0 %v10399_v50 }
 0x3fe   : > { %4818 = vmatmul.mubr.bf16.gmra.mrb[60].mxu1 %v10016_v32 }
 0x3ff   : > { %5877 = vmatmul.mubr.bf16.gmra.mrb[60].mxu0 %v10017_v33  ;;  %4827 = vmatprep.mubr.bf16.mxu1 %v10018_v34 }
 0x400   : > { %5886 = vmatprep.mubr.bf16.mxu0 %v10399_v50 }
 0x406   : > { %4828 = vmatmul.mubr.bf16.gmra.mrb[64].mxu1 %v10020_v35  ;;  %v10068_v35 = vld [vmem:[%s10784_s18 + $0x9b0] ss:$44 sps:$4 sm:$0xff]  }
 0x407   : > { %5887 = vmatmul.mubr.bf16.gmra.mrb[64].mxu0 %v10021_v36  ;;  %4837 = vmatprep.mubr.bf16.mxu1 %v10022_v37  ;;  %v10069_v36 = vld [vmem:[%s10784_s18 + $0x9c8] ss:$44 sps:$4 sm:$0xff]  }
 0x408   : > { %5896 = vmatprep.mubr.bf16.mxu0 %v10399_v50 }
 0x40e   : > { %4838 = vmatmul.mubr.bf16.gmra.mrb[68].mxu1 %v10024_v38 }
 0x40f   : > { %5897 = vmatmul.mubr.bf16.gmra.mrb[68].mxu0 %v10025_v39  ;;  %4847 = vmatprep.mubr.bf16.mxu1 %v10026_v40  ;;  %v575_v39 = vld [vmem:[#allocation2 + $0x30] sm:$0xff] }
 0x410   : > { %5906 = vmatprep.mubr.bf16.mxu0 %v10399_v50 }
 0x416   : > { %4848 = vmatmul.mubr.bf16.gmra.mrb[72].mxu1 %v10028_v41  ;;  %v10070_v41 = vld [vmem:[%s10784_s18 + $0xa0c] ss:$44 sps:$4 sm:$0xff]  }
 0x417   : > { %5907 = vmatmul.mubr.bf16.gmra.mrb[72].mxu0 %v10029_v42  ;;  %4857 = vmatprep.mubr.bf16.mxu1 %v10030_v43 }
 0x418   : > { %5916 = vmatprep.mubr.bf16.mxu0 %v10399_v50 }
 0x41e   : > { %4858 = vmatmul.mubr.bf16.gmra.mrb[76].mxu1 %v10032_v44 }
 0x41f   : > { %5917 = vmatmul.mubr.bf16.gmra.mrb[76].mxu0 %v10033_v45  ;;  %4867 = vmatprep.mubr.bf16.mxu1 %v10034_v46  ;;  %v576_v45 = vld [vmem:[#allocation2 + $0x38] sm:$0xff] }
 0x420   : > { %5926 = vmatprep.mubr.bf16.mxu0 %v10399_v50 }
 0x426   : > { %4868 = vmatmul.mubr.bf16.gmra.mrb[80].mxu1 %v10036_v47 }
 0x427   : > { %5927 = vmatmul.mubr.bf16.gmra.mrb[80].mxu0 %v10037_v48  ;;  %4877 = vmatprep.mubr.bf16.mxu1 %v10038_v49 }
 0x428   : > { %5936 = vmatprep.mubr.bf16.mxu0 %v10399_v50 }
 0x42e   : > { %4878 = vmatmul.mubr.bf16.gmra.mrb[84].mxu1 %v10040_v51 }
 0x42f   : > { %5937 = vmatmul.mubr.bf16.gmra.mrb[84].mxu0 %v10041_v52  ;;  %4887 = vmatprep.mubr.bf16.mxu1 %v10042_v53  ;;  %v577_v53 = vld [vmem:[#allocation2 + $0x40] sm:$0xff] }
 0x430   : > { %5946 = vmatprep.mubr.bf16.mxu0 %v10399_v50 }
 0x436   : > { %4888 = vmatmul.mubr.bf16.gmra.mrb[88].mxu1 %v10044_v54 }
 0x437   : > { %5947 = vmatmul.mubr.bf16.gmra.mrb[88].mxu0 %v10045_v55  ;;  %4897 = vmatprep.mubr.bf16.mxu1 %v10046_v56  ;;  %v578_v55 = vld [vmem:[#allocation2 + $0x48] sm:$0xff] }
 0x438   : > { %5956 = vmatprep.mubr.bf16.mxu0 %v10399_v50 }
 0x43e   : > { %4898 = vmatmul.mubr.bf16.gmra.mrb[92].mxu1 %v10048_v57 }
 0x43f   : > { %5957 = vmatmul.mubr.bf16.gmra.mrb[92].mxu0 %v10049_v58  ;;  %4907 = vmatprep.mubr.bf16.mxu1 %v10050_v59  ;;  %v10072_v59 = vld [vmem:[%s10784_s18 + $0xa08] ss:$44 sps:$4 sm:$0xff]  }
 0x440   : > { %5966 = vmatprep.mubr.bf16.mxu0 %v10399_v50 }
 0x446   : > { %4908 = vmatmul.mubr.bf16.gmra.mrb[96].mxu1 %v10052_v60  ;;  %v10073_v60 = vld [vmem:[%s10784_s18 + $0xa20] ss:$44 sps:$4 sm:$0xff]  }
 0x447   : > { %5967 = vmatmul.mubr.bf16.gmra.mrb[96].mxu0 %v10053_v61  ;;  %4917 = vmatprep.mubr.bf16.mxu1 %v10054_v62 }
 0x448   : > { %5976 = vmatprep.mubr.bf16.mxu0 %v10399_v50 }
 0x44e   : > { %4918 = vmatmul.mubr.bf16.gmra.mrb[100].mxu1 %v10056_v63  ;;  %v579_v63 = vld [vmem:[#allocation2 + $0x50] sm:$0xff] }
 0x44f   : > { %5977 = vmatmul.mubr.bf16.gmra.mrb[100].mxu0 %v10057_v0  ;;  %4927 = vmatprep.mubr.bf16.mxu1 %v10058_v1  ;;  %v10074_v1 = vld [vmem:[%s10784_s18 + $0xa64] ss:$44 sps:$4 sm:$0xff]  }
 0x450   : > { %5986 = vmatprep.mubr.bf16.mxu0 %v10399_v50 }
 0x456   : > { %4928 = vmatmul.mubr.bf16.gmra.mrb[104].mxu1 %v10060_v2 }
 0x457   : > { %5987 = vmatmul.mubr.bf16.gmra.mrb[104].mxu0 %v10061_v3  ;;  %4937 = vmatprep.mubr.bf16.mxu1 %v10062_v4 }
 0x458   : > { %5996 = vmatprep.mubr.bf16.mxu0 %v10399_v50 }
 0x459   : > { %v4669_v5 = vpop.f32.mrb[0].mxu1 }
 0x45a   : > { %v5728_v7 = vpop.f32.mrb[0].mxu0  ;;  %v4671_v10 = vpop.f32.mrb[1].mxu1 }
 0x45b   : > { %v8507_v9 = vadd.f32 %v5728_v7, %v4669_v5  ;;  %v5730_v11 = vpop.f32.mrb[1].mxu0  ;;  %v4673_v15 = vpop.f32.mrb[2].mxu1  ;;  %v580_v5 = vld [vmem:[#allocation2 + $0x58] sm:$0xff] }
 0x45c   : > { %v8508_v14 = vadd.f32 %v5730_v11, %v4671_v10  ;;  %v5732_v17 = vpop.f32.mrb[2].mxu0  ;;  %v4675_v21 = vpop.f32.mrb[3].mxu1 }
 0x45d   : > { %v6047_v19 = vadd.f32 %v8507_v9, %v569_v6  ;;  %v8509_v20 = vadd.f32 %v5732_v17, %v4673_v15  ;;  %v5734_v23 = vpop.f32.mrb[3].mxu0 }
 0x45e   : > { %v6048_v24 = vadd.f32 %v8508_v14, %v570_v8  ;;  %v8510_v25 = vadd.f32 %v5734_v23, %v4675_v21  ;;  %4938 = vmatmul.mubr.bf16.gmra.mrb[108].mxu1 %v10064_v12  ;;  %v581_v12 = vld [vmem:[#allocation2 + $0x60] sm:$0xff]  ;;  %v582_v14 = vld [vmem:[#allocation2 + $0x68] sm:$0xff] }
 0x45f   : > { %6175 = vst [vmem:[#allocation2] sm:$0xff] %v6047_v19  ;;  %v6049_v26 = vadd.f32 %v8509_v20, %v571_v16  ;;  %5997 = vmatmul.mubr.bf16.gmra.mrb[108].mxu0 %v10065_v13  ;;  %4947 = vmatprep.mubr.bf16.mxu1 %v10066_v18  ;;  %v10076_v18 = vld [vmem:[%s10784_s18 + $0xa60] ss:$44 sps:$4 sm:$0xff]   ;;  %v10077_v19 = vld [vmem:[%s10784_s18 + $0xa78] ss:$44 sps:$4 sm:$0xff]  }
 0x460   : > { %6176 = vst [vmem:[#allocation2 + $0x8] sm:$0xff] %v6048_v24  ;;  %v6050_v27 = vadd.f32 %v8510_v25, %v572_v22  ;;  %6006 = vmatprep.mubr.bf16.mxu0 %v10399_v50  ;;  %v583_v22 = vld [vmem:[#allocation2 + $0x70] sm:$0xff]  ;;  %v10078_v24 = vld [vmem:[%s10784_s18 + $0xabc] ss:$44 sps:$4 sm:$0xff]  }
 0x461   : > { %6177 = vst [vmem:[#allocation2 + $0x10] sm:$0xff] %v6049_v26  ;;  %v4679_v28 = vpop.f32.mrb[4].mxu1 }
 0x462   : > { %6178 = vst [vmem:[#allocation2 + $0x18] sm:$0xff] %v6050_v27  ;;  %v5738_v30 = vpop.f32.mrb[4].mxu0  ;;  %v4681_v33 = vpop.f32.mrb[5].mxu1 }
 0x463   : > { %v8511_v32 = vadd.f32 %v5738_v30, %v4679_v28  ;;  %v5740_v34 = vpop.f32.mrb[5].mxu0  ;;  %v4683_v38 = vpop.f32.mrb[6].mxu1  ;;  %v584_v28 = vld [vmem:[#allocation2 + $0x78] sm:$0xff] }
 0x464   : > { %v8512_v37 = vadd.f32 %v5740_v34, %v4681_v33  ;;  %v5742_v40 = vpop.f32.mrb[6].mxu0  ;;  %v4685_v44 = vpop.f32.mrb[7].mxu1 }
 0x465   : > { %v6051_v42 = vadd.f32 %v8511_v32, %v573_v29  ;;  %v8513_v43 = vadd.f32 %v5742_v40, %v4683_v38  ;;  %v5744_v46 = vpop.f32.mrb[7].mxu0 }
 0x466   : > { %v6052_v47 = vadd.f32 %v8512_v37, %v574_v31  ;;  %v8514_v48 = vadd.f32 %v5744_v46, %v4685_v44  ;;  %4948 = vmatmul.mubr.bf16.gmra.mrb[112].mxu1 %v10068_v35  ;;  %v585_v35 = vld [vmem:[#allocation2 + $0x80] sm:$0xff]  ;;  %v586_v37 = vld [vmem:[#allocation2 + $0x88] sm:$0xff] }
 0x467   : > { %6179 = vst [vmem:[#allocation2 + $0x20] sm:$0xff] %v6051_v42  ;;  %v6053_v49 = vadd.f32 %v8513_v43, %v575_v39  ;;  %6007 = vmatmul.mubr.bf16.gmra.mrb[112].mxu0 %v10069_v36  ;;  %4957 = vmatprep.mubr.bf16.mxu1 %v10070_v41  ;;  %v10080_v41 = vld [vmem:[%s10784_s18 + $0xab8] ss:$44 sps:$4 sm:$0xff]   ;;  %v10081_v42 = vld [vmem:[%s10784_s18 + $0xad0] ss:$44 sps:$4 sm:$0xff]  }
 0x468   : > { %6180 = vst [vmem:[#allocation2 + $0x28] sm:$0xff] %v6052_v47  ;;  %v6054_v51 = vadd.f32 %v8514_v48, %v576_v45  ;;  %6016 = vmatprep.mubr.bf16.mxu0 %v10399_v50  ;;  %v587_v45 = vld [vmem:[#allocation2 + $0x90] sm:$0xff] }
 0x469   : > { %6181 = vst [vmem:[#allocation2 + $0x30] sm:$0xff] %v6053_v49  ;;  %v4689_v52 = vpop.f32.mrb[8].mxu1 }
 0x46a   : > { %6182 = vst [vmem:[#allocation2 + $0x38] sm:$0xff] %v6054_v51  ;;  %v5748_v54 = vpop.f32.mrb[8].mxu0  ;;  %v4691_v57 = vpop.f32.mrb[9].mxu1  ;;  %v588_v51 = vld [vmem:[#allocation2 + $0x98] sm:$0xff] }
 0x46b   : > { %v8515_v56 = vadd.f32 %v5748_v54, %v4689_v52  ;;  %v5750_v58 = vpop.f32.mrb[9].mxu0  ;;  %v4693_v62 = vpop.f32.mrb[10].mxu1 }
 0x46c   : > { %v8516_v61 = vadd.f32 %v5750_v58, %v4691_v57  ;;  %v5752_v0 = vpop.f32.mrb[10].mxu0  ;;  %v4695_v4 = vpop.f32.mrb[11].mxu1  ;;  %v589_v57 = vld [vmem:[#allocation2 + $0xa0] sm:$0xff] }
 0x46d   : > { %v6055_v2 = vadd.f32 %v8515_v56, %v577_v53  ;;  %v8517_v3 = vadd.f32 %v5752_v0, %v4693_v62  ;;  %v5754_v6 = vpop.f32.mrb[11].mxu0 }
 0x46e   : > { %v6056_v7 = vadd.f32 %v8516_v61, %v578_v55  ;;  %v8518_v8 = vadd.f32 %v5754_v6, %v4695_v4  ;;  %4958 = vmatmul.mubr.bf16.gmra.mrb[116].mxu1 %v10072_v59  ;;  %v590_v61 = vld [vmem:[#allocation2 + $0xa8] sm:$0xff]  ;;  %v592_v6 = vld [vmem:[#allocation2 + $0xb8] sm:$0xff] }
 0x46f   : > { %6183 = vst [vmem:[#allocation2 + $0x40] sm:$0xff] %v6055_v2  ;;  %v6057_v9 = vadd.f32 %v8517_v3, %v579_v63  ;;  %6017 = vmatmul.mubr.bf16.gmra.mrb[116].mxu0 %v10073_v60  ;;  %4967 = vmatprep.mubr.bf16.mxu1 %v10074_v1  ;;  %v591_v1 = vld [vmem:[#allocation2 + $0xb0] sm:$0xff] }
 0x470   : > { %6184 = vst [vmem:[#allocation2 + $0x48] sm:$0xff] %v6056_v7  ;;  %v6058_v10 = vadd.f32 %v8518_v8, %v580_v5  ;;  %6026 = vmatprep.mubr.bf16.mxu0 %v10399_v50 }
 0x471   : > { %6185 = vst [vmem:[#allocation2 + $0x50] sm:$0xff] %v6057_v9  ;;  %v4699_v11 = vpop.f32.mrb[12].mxu1 }
 0x472   : > { %6186 = vst [vmem:[#allocation2 + $0x58] sm:$0xff] %v6058_v10  ;;  %v5758_v13 = vpop.f32.mrb[12].mxu0  ;;  %v4701_v16 = vpop.f32.mrb[13].mxu1 }
 0x473   : > { %v8519_v15 = vadd.f32 %v5758_v13, %v4699_v11  ;;  %v5760_v17 = vpop.f32.mrb[13].mxu0  ;;  %v4703_v21 = vpop.f32.mrb[14].mxu1  ;;  %v593_v13 = vld [vmem:[#allocation2 + $0xc0] sm:$0xff] }
 0x474   : > { %v8520_v20 = vadd.f32 %v5760_v17, %v4701_v16  ;;  %v5762_v23 = vpop.f32.mrb[14].mxu0  ;;  %v4705_v27 = vpop.f32.mrb[15].mxu1  ;;  %v594_v17 = vld [vmem:[#allocation2 + $0xc8] sm:$0xff] }
 0x475   : > { %v6059_v25 = vadd.f32 %v8519_v15, %v581_v12  ;;  %v8521_v26 = vadd.f32 %v5762_v23, %v4703_v21  ;;  %v5764_v29 = vpop.f32.mrb[15].mxu0  ;;  %v595_v21 = vld [vmem:[#allocation2 + $0xd0] sm:$0xff] }
 0x476   : > { %v6060_v30 = vadd.f32 %v8520_v20, %v582_v14  ;;  %v8522_v31 = vadd.f32 %v5764_v29, %v4705_v27  ;;  %4968 = vmatmul.mubr.bf16.gmra.mrb[120].mxu1 %v10076_v18 }
 0x477   : > { %6187 = vst [vmem:[#allocation2 + $0x60] sm:$0xff] %v6059_v25  ;;  %v6061_v32 = vadd.f32 %v8521_v26, %v583_v22  ;;  %6027 = vmatmul.mubr.bf16.gmra.mrb[120].mxu0 %v10077_v19  ;;  %4977 = vmatprep.mubr.bf16.mxu1 %v10078_v24  ;;  %v596_v26 = vld [vmem:[#allocation2 + $0xd8] sm:$0xff] }
 0x478   : > { %6188 = vst [vmem:[#allocation2 + $0x68] sm:$0xff] %v6060_v30  ;;  %v6062_v33 = vadd.f32 %v8522_v31, %v584_v28  ;;  %6036 = vmatprep.mubr.bf16.mxu0 %v10399_v50 }
 0x479   : > { %6189 = vst [vmem:[#allocation2 + $0x70] sm:$0xff] %v6061_v32  ;;  %v4709_v34 = vpop.f32.mrb[16].mxu1 }
 0x47a   : > { %6190 = vst [vmem:[#allocation2 + $0x78] sm:$0xff] %v6062_v33  ;;  %v5768_v36 = vpop.f32.mrb[16].mxu0  ;;  %v4711_v39 = vpop.f32.mrb[17].mxu1  ;;  %v597_v33 = vld [vmem:[#allocation2 + $0xe0] sm:$0xff] }
 0x47b   : > { %v8523_v38 = vadd.f32 %v5768_v36, %v4709_v34  ;;  %v5770_v40 = vpop.f32.mrb[17].mxu0  ;;  %v4713_v44 = vpop.f32.mrb[18].mxu1 }
 0x47c   : > { %v8524_v43 = vadd.f32 %v5770_v40, %v4711_v39  ;;  %v5772_v46 = vpop.f32.mrb[18].mxu0  ;;  %v4715_v49 = vpop.f32.mrb[19].mxu1 }
 0x47d   : > { %v6063_v47 = vadd.f32 %v8523_v38, %v585_v35  ;;  %v8525_v48 = vadd.f32 %v5772_v46, %v4713_v44  ;;  %v5774_v50 = vpop.f32.mrb[19].mxu0  ;;  %v600_v46 = vld [vmem:[#allocation2 + $0xf8] sm:$0xff] }
 0x47e   : > { %v6064_v52 = vadd.f32 %v8524_v43, %v586_v37  ;;  %v8526_v53 = vadd.f32 %v5774_v50, %v4715_v49  ;;  %4978 = vmatmul.mubr.bf16.gmra.mrb[124].mxu1 %v10080_v41  ;;  %v598_v37 = vld [vmem:[#allocation2 + $0xe8] sm:$0xff]  ;;  %v599_v41 = vld [vmem:[#allocation2 + $0xf0] sm:$0xff] }
 0x47f   : > { %6191 = vst [vmem:[#allocation2 + $0x80] sm:$0xff] %v6063_v47  ;;  %v6065_v54 = vadd.f32 %v8525_v48, %v587_v45  ;;  %6037 = vmatmul.mubr.bf16.gmra.mrb[124].mxu0 %v10081_v42 }
 0x480   : > { %6192 = vst [vmem:[#allocation2 + $0x88] sm:$0xff] %v6064_v52  ;;  %v6066_v55 = vadd.f32 %v8526_v53, %v588_v51  ;;  %v601_v53 = vld [vmem:[#allocation2 + $0x100] sm:$0xff] }
 0x481   : > { %6193 = vst [vmem:[#allocation2 + $0x90] sm:$0xff] %v6065_v54  ;;  %v4719_v56 = vpop.f32.mrb[20].mxu1 }
 0x482   : > { %6194 = vst [vmem:[#allocation2 + $0x98] sm:$0xff] %v6066_v55  ;;  %v5778_v58 = vpop.f32.mrb[20].mxu0  ;;  %v4721_v60 = vpop.f32.mrb[21].mxu1 }
 0x483   : > { %v8527_v59 = vadd.f32 %v5778_v58, %v4719_v56  ;;  %v5780_v62 = vpop.f32.mrb[21].mxu0  ;;  %v4723_v0 = vpop.f32.mrb[22].mxu1 }
 0x484   : > { %v8528_v63 = vadd.f32 %v5780_v62, %v4721_v60  ;;  %v5782_v2 = vpop.f32.mrb[22].mxu0  ;;  %v4725_v5 = vpop.f32.mrb[23].mxu1 }
 0x485   : > { %v6067_v3 = vadd.f32 %v8527_v59, %v589_v57  ;;  %v8529_v4 = vadd.f32 %v5782_v2, %v4723_v0  ;;  %v5784_v7 = vpop.f32.mrb[23].mxu0  ;;  %v602_v57 = vld [vmem:[#allocation2 + $0x108] sm:$0xff]  ;;  %v604_v2 = vld [vmem:[#allocation2 + $0x118] sm:$0xff] }
 0x486   : > { %v6068_v8 = vadd.f32 %v8528_v63, %v590_v61  ;;  %v8530_v9 = vadd.f32 %v5784_v7, %v4725_v5  ;;  %v603_v61 = vld [vmem:[#allocation2 + $0x110] sm:$0xff] }
 0x487   : > { %6195 = vst [vmem:[#allocation2 + $0xa0] sm:$0xff] %v6067_v3  ;;  %v6069_v10 = vadd.f32 %v8529_v4, %v591_v1 }
 0x488   : > { %6196 = vst [vmem:[#allocation2 + $0xa8] sm:$0xff] %v6068_v8  ;;  %v6070_v11 = vadd.f32 %v8530_v9, %v592_v6  ;;  %v605_v9 = vld [vmem:[#allocation2 + $0x120] sm:$0xff] }
 0x489   : > { %6197 = vst [vmem:[#allocation2 + $0xb0] sm:$0xff] %v6069_v10  ;;  %v4729_v12 = vpop.f32.mrb[24].mxu1 }
 0x48a   : > { %6198 = vst [vmem:[#allocation2 + $0xb8] sm:$0xff] %v6070_v11  ;;  %v5788_v14 = vpop.f32.mrb[24].mxu0  ;;  %v4731_v16 = vpop.f32.mrb[25].mxu1 }
 0x48b   : > { %v8531_v15 = vadd.f32 %v5788_v14, %v4729_v12  ;;  %v5790_v18 = vpop.f32.mrb[25].mxu0  ;;  %v4733_v20 = vpop.f32.mrb[26].mxu1 }
 0x48c   : > { %v8532_v19 = vadd.f32 %v5790_v18, %v4731_v16  ;;  %v5792_v22 = vpop.f32.mrb[26].mxu0  ;;  %v4735_v25 = vpop.f32.mrb[27].mxu1 }
 0x48d   : > { %v6071_v23 = vadd.f32 %v8531_v15, %v593_v13  ;;  %v8533_v24 = vadd.f32 %v5792_v22, %v4733_v20  ;;  %v5794_v27 = vpop.f32.mrb[27].mxu0  ;;  %v606_v13 = vld [vmem:[#allocation2 + $0x128] sm:$0xff]  ;;  %v608_v22 = vld [vmem:[#allocation2 + $0x138] sm:$0xff] }
 0x48e   : > { %v6072_v28 = vadd.f32 %v8532_v19, %v594_v17  ;;  %v8534_v29 = vadd.f32 %v5794_v27, %v4735_v25  ;;  %v607_v17 = vld [vmem:[#allocation2 + $0x130] sm:$0xff] }
 0x48f   : > { %6199 = vst [vmem:[#allocation2 + $0xc0] sm:$0xff] %v6071_v23  ;;  %v6073_v30 = vadd.f32 %v8533_v24, %v595_v21 }
 0x490   : > { %6200 = vst [vmem:[#allocation2 + $0xc8] sm:$0xff] %v6072_v28  ;;  %v6074_v31 = vadd.f32 %v8534_v29, %v596_v26  ;;  %v609_v29 = vld [vmem:[#allocation2 + $0x140] sm:$0xff] }
 0x491   : > { %6201 = vst [vmem:[#allocation2 + $0xd0] sm:$0xff] %v6073_v30  ;;  %v4739_v32 = vpop.f32.mrb[28].mxu1 }
 0x492   : > { %6202 = vst [vmem:[#allocation2 + $0xd8] sm:$0xff] %v6074_v31  ;;  %v5798_v34 = vpop.f32.mrb[28].mxu0  ;;  %v4741_v36 = vpop.f32.mrb[29].mxu1 }
 0x493   : > { %v8535_v35 = vadd.f32 %v5798_v34, %v4739_v32  ;;  %v5800_v38 = vpop.f32.mrb[29].mxu0  ;;  %v4743_v40 = vpop.f32.mrb[30].mxu1 }
 0x494   : > { %v8536_v39 = vadd.f32 %v5800_v38, %v4741_v36  ;;  %v5802_v42 = vpop.f32.mrb[30].mxu0  ;;  %v4745_v45 = vpop.f32.mrb[31].mxu1 }
 0x495   : > { %v6075_v43 = vadd.f32 %v8535_v35, %v597_v33  ;;  %v8537_v44 = vadd.f32 %v5802_v42, %v4743_v40  ;;  %v5804_v47 = vpop.f32.mrb[31].mxu0  ;;  %v610_v33 = vld [vmem:[#allocation2 + $0x148] sm:$0xff]  ;;  %v612_v42 = vld [vmem:[#allocation2 + $0x158] sm:$0xff] }
 0x496   : > { %v6076_v48 = vadd.f32 %v8536_v39, %v598_v37  ;;  %v8538_v49 = vadd.f32 %v5804_v47, %v4745_v45  ;;  %v611_v37 = vld [vmem:[#allocation2 + $0x150] sm:$0xff] }
 0x497   : > { %6203 = vst [vmem:[#allocation2 + $0xe0] sm:$0xff] %v6075_v43  ;;  %v6077_v51 = vadd.f32 %v8537_v44, %v599_v41 }
 0x498   : > { %6204 = vst [vmem:[#allocation2 + $0xe8] sm:$0xff] %v6076_v48  ;;  %v6078_v50 = vadd.f32 %v8538_v49, %v600_v46  ;;  %v613_v49 = vld [vmem:[#allocation2 + $0x160] sm:$0xff] }
 0x499   : > { %6205 = vst [vmem:[#allocation2 + $0xf0] sm:$0xff] %v6077_v51  ;;  %v4749_v52 = vpop.f32.mrb[32].mxu1 }
 0x49a   : > { %6206 = vst [vmem:[#allocation2 + $0xf8] sm:$0xff] %v6078_v50  ;;  %v5808_v54 = vpop.f32.mrb[32].mxu0  ;;  %v4751_v56 = vpop.f32.mrb[33].mxu1 }
 0x49b   : > { %v8539_v55 = vadd.f32 %v5808_v54, %v4749_v52  ;;  %v5810_v58 = vpop.f32.mrb[33].mxu0  ;;  %v4753_v60 = vpop.f32.mrb[34].mxu1 }
 0x49c   : > { %v8540_v59 = vadd.f32 %v5810_v58, %v4751_v56  ;;  %v5812_v62 = vpop.f32.mrb[34].mxu0  ;;  %v4755_v1 = vpop.f32.mrb[35].mxu1 }
 0x49d   : > { %v6079_v63 = vadd.f32 %v8539_v55, %v601_v53  ;;  %v8541_v0 = vadd.f32 %v5812_v62, %v4753_v60  ;;  %v5814_v3 = vpop.f32.mrb[35].mxu0  ;;  %v614_v53 = vld [vmem:[#allocation2 + $0x168] sm:$0xff]  ;;  %v616_v62 = vld [vmem:[#allocation2 + $0x178] sm:$0xff] }
 0x49e   : > { %v6080_v4 = vadd.f32 %v8540_v59, %v602_v57  ;;  %v8542_v5 = vadd.f32 %v5814_v3, %v4755_v1  ;;  %v615_v57 = vld [vmem:[#allocation2 + $0x170] sm:$0xff] }
 0x49f   : > { %6207 = vst [vmem:[#allocation2 + $0x100] sm:$0xff] %v6079_v63  ;;  %v6081_v6 = vadd.f32 %v8541_v0, %v603_v61 }
 0x4a0   : > { %6208 = vst [vmem:[#allocation2 + $0x108] sm:$0xff] %v6080_v4  ;;  %v6082_v7 = vadd.f32 %v8542_v5, %v604_v2  ;;  %v617_v5 = vld [vmem:[#allocation2 + $0x180] sm:$0xff] }
 0x4a1   : > { %6209 = vst [vmem:[#allocation2 + $0x110] sm:$0xff] %v6081_v6  ;;  %v4759_v8 = vpop.f32.mrb[36].mxu1 }
 0x4a2   : > { %6210 = vst [vmem:[#allocation2 + $0x118] sm:$0xff] %v6082_v7  ;;  %v5818_v10 = vpop.f32.mrb[36].mxu0  ;;  %v4761_v12 = vpop.f32.mrb[37].mxu1 }
 0x4a3   : > { %v8543_v11 = vadd.f32 %v5818_v10, %v4759_v8  ;;  %v5820_v14 = vpop.f32.mrb[37].mxu0  ;;  %v4763_v16 = vpop.f32.mrb[38].mxu1 }
 0x4a4   : > { %v8544_v15 = vadd.f32 %v5820_v14, %v4761_v12  ;;  %v5822_v18 = vpop.f32.mrb[38].mxu0  ;;  %v4765_v21 = vpop.f32.mrb[39].mxu1 }
 0x4a5   : > { %v6083_v19 = vadd.f32 %v8543_v11, %v605_v9  ;;  %v8545_v20 = vadd.f32 %v5822_v18, %v4763_v16  ;;  %v5824_v23 = vpop.f32.mrb[39].mxu0  ;;  %v618_v9 = vld [vmem:[#allocation2 + $0x188] sm:$0xff]  ;;  %v620_v18 = vld [vmem:[#allocation2 + $0x198] sm:$0xff] }
 0x4a6   : > { %v6084_v24 = vadd.f32 %v8544_v15, %v606_v13  ;;  %v8546_v25 = vadd.f32 %v5824_v23, %v4765_v21  ;;  %v619_v13 = vld [vmem:[#allocation2 + $0x190] sm:$0xff] }
 0x4a7   : > { %6211 = vst [vmem:[#allocation2 + $0x120] sm:$0xff] %v6083_v19  ;;  %v6085_v26 = vadd.f32 %v8545_v20, %v607_v17 }
 0x4a8   : > { %6212 = vst [vmem:[#allocation2 + $0x128] sm:$0xff] %v6084_v24  ;;  %v6086_v27 = vadd.f32 %v8546_v25, %v608_v22  ;;  %v621_v25 = vld [vmem:[#allocation2 + $0x1a0] sm:$0xff] }
 0x4a9   : > { %6213 = vst [vmem:[#allocation2 + $0x130] sm:$0xff] %v6085_v26  ;;  %v4769_v28 = vpop.f32.mrb[40].mxu1 }
 0x4aa   : > { %6214 = vst [vmem:[#allocation2 + $0x138] sm:$0xff] %v6086_v27  ;;  %v5828_v30 = vpop.f32.mrb[40].mxu0  ;;  %v4771_v32 = vpop.f32.mrb[41].mxu1 }
 0x4ab   : > { %v8547_v31 = vadd.f32 %v5828_v30, %v4769_v28  ;;  %v5830_v34 = vpop.f32.mrb[41].mxu0  ;;  %v4773_v36 = vpop.f32.mrb[42].mxu1 }
 0x4ac   : > { %v8548_v35 = vadd.f32 %v5830_v34, %v4771_v32  ;;  %v5832_v38 = vpop.f32.mrb[42].mxu0  ;;  %v4775_v41 = vpop.f32.mrb[43].mxu1 }
 0x4ad   : > { %v6087_v39 = vadd.f32 %v8547_v31, %v609_v29  ;;  %v8549_v40 = vadd.f32 %v5832_v38, %v4773_v36  ;;  %v5834_v43 = vpop.f32.mrb[43].mxu0  ;;  %v622_v29 = vld [vmem:[#allocation2 + $0x1a8] sm:$0xff]  ;;  %v624_v38 = vld [vmem:[#allocation2 + $0x1b8] sm:$0xff] }
 0x4ae   : > { %v6088_v44 = vadd.f32 %v8548_v35, %v610_v33  ;;  %v8550_v45 = vadd.f32 %v5834_v43, %v4775_v41  ;;  %v623_v33 = vld [vmem:[#allocation2 + $0x1b0] sm:$0xff] }
 0x4af   : > { %6215 = vst [vmem:[#allocation2 + $0x140] sm:$0xff] %v6087_v39  ;;  %v6089_v46 = vadd.f32 %v8549_v40, %v611_v37 }
 0x4b0   : > { %6216 = vst [vmem:[#allocation2 + $0x148] sm:$0xff] %v6088_v44  ;;  %v6090_v47 = vadd.f32 %v8550_v45, %v612_v42  ;;  %v625_v45 = vld [vmem:[#allocation2 + $0x1c0] sm:$0xff] }
 0x4b1   : > { %6217 = vst [vmem:[#allocation2 + $0x150] sm:$0xff] %v6089_v46  ;;  %v4779_v48 = vpop.f32.mrb[44].mxu1 }
 0x4b2   : > { %6218 = vst [vmem:[#allocation2 + $0x158] sm:$0xff] %v6090_v47  ;;  %v5838_v51 = vpop.f32.mrb[44].mxu0  ;;  %v4781_v52 = vpop.f32.mrb[45].mxu1 }
 0x4b3   : > { %v8551_v50 = vadd.f32 %v5838_v51, %v4779_v48  ;;  %v5840_v54 = vpop.f32.mrb[45].mxu0  ;;  %v4783_v56 = vpop.f32.mrb[46].mxu1 }
 0x4b4   : > { %v8552_v55 = vadd.f32 %v5840_v54, %v4781_v52  ;;  %v5842_v58 = vpop.f32.mrb[46].mxu0  ;;  %v4785_v61 = vpop.f32.mrb[47].mxu1 }
 0x4b5   : > { %v6091_v59 = vadd.f32 %v8551_v50, %v613_v49  ;;  %v8553_v60 = vadd.f32 %v5842_v58, %v4783_v56  ;;  %v5844_v63 = vpop.f32.mrb[47].mxu0  ;;  %v626_v49 = vld [vmem:[#allocation2 + $0x1c8] sm:$0xff]  ;;  %v628_v58 = vld [vmem:[#allocation2 + $0x1d8] sm:$0xff] }
 0x4b6   : > { %v6092_v0 = vadd.f32 %v8552_v55, %v614_v53  ;;  %v8554_v1 = vadd.f32 %v5844_v63, %v4785_v61  ;;  %v627_v53 = vld [vmem:[#allocation2 + $0x1d0] sm:$0xff] }
 0x4b7   : > { %6219 = vst [vmem:[#allocation2 + $0x160] sm:$0xff] %v6091_v59  ;;  %v6093_v2 = vadd.f32 %v8553_v60, %v615_v57 }
 0x4b8   : > { %6220 = vst [vmem:[#allocation2 + $0x168] sm:$0xff] %v6092_v0  ;;  %v6094_v3 = vadd.f32 %v8554_v1, %v616_v62  ;;  %v629_v1 = vld [vmem:[#allocation2 + $0x1e0] sm:$0xff] }
 0x4b9   : > { %6221 = vst [vmem:[#allocation2 + $0x170] sm:$0xff] %v6093_v2  ;;  %v4789_v4 = vpop.f32.mrb[48].mxu1 }
 0x4ba   : > { %6222 = vst [vmem:[#allocation2 + $0x178] sm:$0xff] %v6094_v3  ;;  %v5848_v6 = vpop.f32.mrb[48].mxu0  ;;  %v4791_v8 = vpop.f32.mrb[49].mxu1 }
 0x4bb   : > { %v8555_v7 = vadd.f32 %v5848_v6, %v4789_v4  ;;  %v5850_v10 = vpop.f32.mrb[49].mxu0  ;;  %v4793_v12 = vpop.f32.mrb[50].mxu1 }
 0x4bc   : > { %v8556_v11 = vadd.f32 %v5850_v10, %v4791_v8  ;;  %v5852_v14 = vpop.f32.mrb[50].mxu0  ;;  %v4795_v17 = vpop.f32.mrb[51].mxu1 }
 0x4bd   : > { %v6095_v15 = vadd.f32 %v8555_v7, %v617_v5  ;;  %v8557_v16 = vadd.f32 %v5852_v14, %v4793_v12  ;;  %v5854_v19 = vpop.f32.mrb[51].mxu0  ;;  %v630_v5 = vld [vmem:[#allocation2 + $0x1e8] sm:$0xff]  ;;  %v632_v14 = vld [vmem:[#allocation2 + $0x1f8] sm:$0xff] }
 0x4be   : > { %v6096_v20 = vadd.f32 %v8556_v11, %v618_v9  ;;  %v8558_v21 = vadd.f32 %v5854_v19, %v4795_v17  ;;  %v631_v9 = vld [vmem:[#allocation2 + $0x1f0] sm:$0xff] }
 0x4bf   : > { %6223 = vst [vmem:[#allocation2 + $0x180] sm:$0xff] %v6095_v15  ;;  %v6097_v22 = vadd.f32 %v8557_v16, %v619_v13 }
 0x4c0   : > { %6224 = vst [vmem:[#allocation2 + $0x188] sm:$0xff] %v6096_v20  ;;  %v6098_v23 = vadd.f32 %v8558_v21, %v620_v18  ;;  %v633_v21 = vld [vmem:[#allocation2 + $0x200] sm:$0xff] }
 0x4c1   : > { %6225 = vst [vmem:[#allocation2 + $0x190] sm:$0xff] %v6097_v22  ;;  %v4799_v24 = vpop.f32.mrb[52].mxu1 }
 0x4c2   : > { %6226 = vst [vmem:[#allocation2 + $0x198] sm:$0xff] %v6098_v23  ;;  %v5858_v26 = vpop.f32.mrb[52].mxu0  ;;  %v4801_v28 = vpop.f32.mrb[53].mxu1 }
 0x4c3   : > { %v8559_v27 = vadd.f32 %v5858_v26, %v4799_v24  ;;  %v5860_v30 = vpop.f32.mrb[53].mxu0  ;;  %v4803_v32 = vpop.f32.mrb[54].mxu1 }
 0x4c4   : > { %v8560_v31 = vadd.f32 %v5860_v30, %v4801_v28  ;;  %v5862_v34 = vpop.f32.mrb[54].mxu0  ;;  %v4805_v37 = vpop.f32.mrb[55].mxu1 }
 0x4c5   : > { %v6099_v35 = vadd.f32 %v8559_v27, %v621_v25  ;;  %v8561_v36 = vadd.f32 %v5862_v34, %v4803_v32  ;;  %v5864_v39 = vpop.f32.mrb[55].mxu0  ;;  %v634_v25 = vld [vmem:[#allocation2 + $0x208] sm:$0xff]  ;;  %v636_v34 = vld [vmem:[#allocation2 + $0x218] sm:$0xff] }
 0x4c6   : > { %v6100_v40 = vadd.f32 %v8560_v31, %v622_v29  ;;  %v8562_v41 = vadd.f32 %v5864_v39, %v4805_v37  ;;  %v635_v29 = vld [vmem:[#allocation2 + $0x210] sm:$0xff] }
 0x4c7   : > { %6227 = vst [vmem:[#allocation2 + $0x1a0] sm:$0xff] %v6099_v35  ;;  %v6101_v42 = vadd.f32 %v8561_v36, %v623_v33 }
 0x4c8   : > { %6228 = vst [vmem:[#allocation2 + $0x1a8] sm:$0xff] %v6100_v40  ;;  %v6102_v43 = vadd.f32 %v8562_v41, %v624_v38  ;;  %v637_v41 = vld [vmem:[#allocation2 + $0x220] sm:$0xff] }
 0x4c9   : > { %6229 = vst [vmem:[#allocation2 + $0x1b0] sm:$0xff] %v6101_v42  ;;  %v4809_v44 = vpop.f32.mrb[56].mxu1 }
 0x4ca   : > { %6230 = vst [vmem:[#allocation2 + $0x1b8] sm:$0xff] %v6102_v43  ;;  %v5868_v46 = vpop.f32.mrb[56].mxu0  ;;  %v4811_v48 = vpop.f32.mrb[57].mxu1 }
 0x4cb   : > { %v8563_v47 = vadd.f32 %v5868_v46, %v4809_v44  ;;  %v5870_v51 = vpop.f32.mrb[57].mxu0  ;;  %v4813_v52 = vpop.f32.mrb[58].mxu1 }
 0x4cc   : > { %v8564_v50 = vadd.f32 %v5870_v51, %v4811_v48  ;;  %v5872_v54 = vpop.f32.mrb[58].mxu0  ;;  %v4815_v57 = vpop.f32.mrb[59].mxu1 }
 0x4cd   : > { %v6103_v55 = vadd.f32 %v8563_v47, %v625_v45  ;;  %v8565_v56 = vadd.f32 %v5872_v54, %v4813_v52  ;;  %v5874_v59 = vpop.f32.mrb[59].mxu0  ;;  %v638_v45 = vld [vmem:[#allocation2 + $0x228] sm:$0xff]  ;;  %v640_v54 = vld [vmem:[#allocation2 + $0x238] sm:$0xff] }
 0x4ce   : > { %v6104_v60 = vadd.f32 %v8564_v50, %v626_v49  ;;  %v8566_v61 = vadd.f32 %v5874_v59, %v4815_v57  ;;  %v639_v49 = vld [vmem:[#allocation2 + $0x230] sm:$0xff] }
 0x4cf   : > { %6231 = vst [vmem:[#allocation2 + $0x1c0] sm:$0xff] %v6103_v55  ;;  %v6105_v62 = vadd.f32 %v8565_v56, %v627_v53 }
 0x4d0   : > { %6232 = vst [vmem:[#allocation2 + $0x1c8] sm:$0xff] %v6104_v60  ;;  %v6106_v63 = vadd.f32 %v8566_v61, %v628_v58  ;;  %v641_v61 = vld [vmem:[#allocation2 + $0x240] sm:$0xff] }
 0x4d1   : > { %6233 = vst [vmem:[#allocation2 + $0x1d0] sm:$0xff] %v6105_v62  ;;  %v4819_v0 = vpop.f32.mrb[60].mxu1 }
 0x4d2   : > { %6234 = vst [vmem:[#allocation2 + $0x1d8] sm:$0xff] %v6106_v63  ;;  %v5878_v2 = vpop.f32.mrb[60].mxu0  ;;  %v4821_v4 = vpop.f32.mrb[61].mxu1 }
 0x4d3   : > { %v8567_v3 = vadd.f32 %v5878_v2, %v4819_v0  ;;  %v5880_v6 = vpop.f32.mrb[61].mxu0  ;;  %v4823_v8 = vpop.f32.mrb[62].mxu1 }
 0x4d4   : > { %v8568_v7 = vadd.f32 %v5880_v6, %v4821_v4  ;;  %v5882_v10 = vpop.f32.mrb[62].mxu0  ;;  %v4825_v13 = vpop.f32.mrb[63].mxu1 }
 0x4d5   : > { %v6107_v11 = vadd.f32 %v8567_v3, %v629_v1  ;;  %v8569_v12 = vadd.f32 %v5882_v10, %v4823_v8  ;;  %v5884_v15 = vpop.f32.mrb[63].mxu0  ;;  %v642_v1 = vld [vmem:[#allocation2 + $0x248] sm:$0xff]  ;;  %v644_v10 = vld [vmem:[#allocation2 + $0x258] sm:$0xff] }
 0x4d6   : > { %v6108_v16 = vadd.f32 %v8568_v7, %v630_v5  ;;  %v8570_v17 = vadd.f32 %v5884_v15, %v4825_v13  ;;  %v643_v5 = vld [vmem:[#allocation2 + $0x250] sm:$0xff] }
 0x4d7   : > { %6235 = vst [vmem:[#allocation2 + $0x1e0] sm:$0xff] %v6107_v11  ;;  %v6109_v18 = vadd.f32 %v8569_v12, %v631_v9 }
 0x4d8   : > { %6236 = vst [vmem:[#allocation2 + $0x1e8] sm:$0xff] %v6108_v16  ;;  %v6110_v19 = vadd.f32 %v8570_v17, %v632_v14  ;;  %v645_v17 = vld [vmem:[#allocation2 + $0x260] sm:$0xff] }
 0x4d9   : > { %6237 = vst [vmem:[#allocation2 + $0x1f0] sm:$0xff] %v6109_v18  ;;  %v4829_v20 = vpop.f32.mrb[64].mxu1 }
 0x4da   : > { %6238 = vst [vmem:[#allocation2 + $0x1f8] sm:$0xff] %v6110_v19  ;;  %v5888_v22 = vpop.f32.mrb[64].mxu0  ;;  %v4831_v24 = vpop.f32.mrb[65].mxu1 }
 0x4db   : > { %v8571_v23 = vadd.f32 %v5888_v22, %v4829_v20  ;;  %v5890_v26 = vpop.f32.mrb[65].mxu0  ;;  %v4833_v28 = vpop.f32.mrb[66].mxu1 }
 0x4dc   : > { %v8572_v27 = vadd.f32 %v5890_v26, %v4831_v24  ;;  %v5892_v30 = vpop.f32.mrb[66].mxu0  ;;  %v4835_v33 = vpop.f32.mrb[67].mxu1 }
 0x4dd   : > { %v6111_v31 = vadd.f32 %v8571_v23, %v633_v21  ;;  %v8573_v32 = vadd.f32 %v5892_v30, %v4833_v28  ;;  %v5894_v35 = vpop.f32.mrb[67].mxu0  ;;  %v646_v21 = vld [vmem:[#allocation2 + $0x268] sm:$0xff]  ;;  %v648_v30 = vld [vmem:[#allocation2 + $0x278] sm:$0xff] }
 0x4de   : > { %v6112_v36 = vadd.f32 %v8572_v27, %v634_v25  ;;  %v8574_v37 = vadd.f32 %v5894_v35, %v4835_v33  ;;  %v647_v25 = vld [vmem:[#allocation2 + $0x270] sm:$0xff] }
 0x4df   : > { %6239 = vst [vmem:[#allocation2 + $0x200] sm:$0xff] %v6111_v31  ;;  %v6113_v38 = vadd.f32 %v8573_v32, %v635_v29 }
 0x4e0   : > { %6240 = vst [vmem:[#allocation2 + $0x208] sm:$0xff] %v6112_v36  ;;  %v6114_v39 = vadd.f32 %v8574_v37, %v636_v34  ;;  %v649_v37 = vld [vmem:[#allocation2 + $0x280] sm:$0xff] }
 0x4e1   : > { %6241 = vst [vmem:[#allocation2 + $0x210] sm:$0xff] %v6113_v38  ;;  %v4839_v40 = vpop.f32.mrb[68].mxu1 }
 0x4e2   : > { %6242 = vst [vmem:[#allocation2 + $0x218] sm:$0xff] %v6114_v39  ;;  %v5898_v42 = vpop.f32.mrb[68].mxu0  ;;  %v4841_v44 = vpop.f32.mrb[69].mxu1 }
 0x4e3   : > { %v8575_v43 = vadd.f32 %v5898_v42, %v4839_v40  ;;  %v5900_v46 = vpop.f32.mrb[69].mxu0  ;;  %v4843_v48 = vpop.f32.mrb[70].mxu1 }
 0x4e4   : > { %v8576_v47 = vadd.f32 %v5900_v46, %v4841_v44  ;;  %v5902_v51 = vpop.f32.mrb[70].mxu0  ;;  %v4845_v53 = vpop.f32.mrb[71].mxu1 }
 0x4e5   : > { %v6115_v50 = vadd.f32 %v8575_v43, %v637_v41  ;;  %v8577_v52 = vadd.f32 %v5902_v51, %v4843_v48  ;;  %v5904_v55 = vpop.f32.mrb[71].mxu0  ;;  %v650_v41 = vld [vmem:[#allocation2 + $0x288] sm:$0xff]  ;;  %v652_v51 = vld [vmem:[#allocation2 + $0x298] sm:$0xff] }
 0x4e6   : > { %v6116_v56 = vadd.f32 %v8576_v47, %v638_v45  ;;  %v8578_v57 = vadd.f32 %v5904_v55, %v4845_v53  ;;  %v651_v45 = vld [vmem:[#allocation2 + $0x290] sm:$0xff] }
 0x4e7   : > { %6243 = vst [vmem:[#allocation2 + $0x220] sm:$0xff] %v6115_v50  ;;  %v6117_v58 = vadd.f32 %v8577_v52, %v639_v49 }
 0x4e8   : > { %6244 = vst [vmem:[#allocation2 + $0x228] sm:$0xff] %v6116_v56  ;;  %v6118_v59 = vadd.f32 %v8578_v57, %v640_v54  ;;  %v653_v57 = vld [vmem:[#allocation2 + $0x2a0] sm:$0xff] }
 0x4e9   : > { %6245 = vst [vmem:[#allocation2 + $0x230] sm:$0xff] %v6117_v58  ;;  %v4849_v60 = vpop.f32.mrb[72].mxu1 }
 0x4ea   : > { %6246 = vst [vmem:[#allocation2 + $0x238] sm:$0xff] %v6118_v59  ;;  %v5908_v62 = vpop.f32.mrb[72].mxu0  ;;  %v4851_v0 = vpop.f32.mrb[73].mxu1 }
 0x4eb   : > { %v8579_v63 = vadd.f32 %v5908_v62, %v4849_v60  ;;  %v5910_v2 = vpop.f32.mrb[73].mxu0  ;;  %v4853_v4 = vpop.f32.mrb[74].mxu1 }
 0x4ec   : > { %v8580_v3 = vadd.f32 %v5910_v2, %v4851_v0  ;;  %v5912_v6 = vpop.f32.mrb[74].mxu0  ;;  %v4855_v9 = vpop.f32.mrb[75].mxu1 }
 0x4ed   : > { %v6119_v7 = vadd.f32 %v8579_v63, %v641_v61  ;;  %v8581_v8 = vadd.f32 %v5912_v6, %v4853_v4  ;;  %v5914_v11 = vpop.f32.mrb[75].mxu0  ;;  %v654_v61 = vld [vmem:[#allocation2 + $0x2a8] sm:$0xff]  ;;  %v656_v6 = vld [vmem:[#allocation2 + $0x2b8] sm:$0xff] }
 0x4ee   : > { %v6120_v12 = vadd.f32 %v8580_v3, %v642_v1  ;;  %v8582_v13 = vadd.f32 %v5914_v11, %v4855_v9  ;;  %v655_v1 = vld [vmem:[#allocation2 + $0x2b0] sm:$0xff] }
 0x4ef   : > { %6247 = vst [vmem:[#allocation2 + $0x240] sm:$0xff] %v6119_v7  ;;  %v6121_v14 = vadd.f32 %v8581_v8, %v643_v5 }
 0x4f0   : > { %6248 = vst [vmem:[#allocation2 + $0x248] sm:$0xff] %v6120_v12  ;;  %v6122_v15 = vadd.f32 %v8582_v13, %v644_v10  ;;  %v657_v13 = vld [vmem:[#allocation2 + $0x2c0] sm:$0xff] }
 0x4f1   : > { %6249 = vst [vmem:[#allocation2 + $0x250] sm:$0xff] %v6121_v14  ;;  %v4859_v16 = vpop.f32.mrb[76].mxu1 }
 0x4f2   : > { %6250 = vst [vmem:[#allocation2 + $0x258] sm:$0xff] %v6122_v15  ;;  %v5918_v18 = vpop.f32.mrb[76].mxu0  ;;  %v4861_v20 = vpop.f32.mrb[77].mxu1 }
 0x4f3   : > { %v8583_v19 = vadd.f32 %v5918_v18, %v4859_v16  ;;  %v5920_v22 = vpop.f32.mrb[77].mxu0  ;;  %v4863_v24 = vpop.f32.mrb[78].mxu1 }
 0x4f4   : > { %v8584_v23 = vadd.f32 %v5920_v22, %v4861_v20  ;;  %v5922_v26 = vpop.f32.mrb[78].mxu0  ;;  %v4865_v29 = vpop.f32.mrb[79].mxu1 }
 0x4f5   : > { %v6123_v27 = vadd.f32 %v8583_v19, %v645_v17  ;;  %v8585_v28 = vadd.f32 %v5922_v26, %v4863_v24  ;;  %v5924_v31 = vpop.f32.mrb[79].mxu0  ;;  %v658_v17 = vld [vmem:[#allocation2 + $0x2c8] sm:$0xff]  ;;  %v660_v26 = vld [vmem:[#allocation2 + $0x2d8] sm:$0xff] }
 0x4f6   : > { %v6124_v32 = vadd.f32 %v8584_v23, %v646_v21  ;;  %v8586_v33 = vadd.f32 %v5924_v31, %v4865_v29  ;;  %v659_v21 = vld [vmem:[#allocation2 + $0x2d0] sm:$0xff] }
 0x4f7   : > { %6251 = vst [vmem:[#allocation2 + $0x260] sm:$0xff] %v6123_v27  ;;  %v6125_v34 = vadd.f32 %v8585_v28, %v647_v25 }
 0x4f8   : > { %6252 = vst [vmem:[#allocation2 + $0x268] sm:$0xff] %v6124_v32  ;;  %v6126_v35 = vadd.f32 %v8586_v33, %v648_v30  ;;  %v661_v33 = vld [vmem:[#allocation2 + $0x2e0] sm:$0xff] }
 0x4f9   : > { %6253 = vst [vmem:[#allocation2 + $0x270] sm:$0xff] %v6125_v34  ;;  %v4869_v36 = vpop.f32.mrb[80].mxu1 }
 0x4fa   : > { %6254 = vst [vmem:[#allocation2 + $0x278] sm:$0xff] %v6126_v35  ;;  %v5928_v38 = vpop.f32.mrb[80].mxu0  ;;  %v4871_v40 = vpop.f32.mrb[81].mxu1 }
 0x4fb   : > { %v8587_v39 = vadd.f32 %v5928_v38, %v4869_v36  ;;  %v5930_v42 = vpop.f32.mrb[81].mxu0  ;;  %v4873_v44 = vpop.f32.mrb[82].mxu1 }
 0x4fc   : > { %v8588_v43 = vadd.f32 %v5930_v42, %v4871_v40  ;;  %v5932_v46 = vpop.f32.mrb[82].mxu0  ;;  %v4875_v49 = vpop.f32.mrb[83].mxu1 }
 0x4fd   : > { %v6127_v47 = vadd.f32 %v8587_v39, %v649_v37  ;;  %v8589_v48 = vadd.f32 %v5932_v46, %v4873_v44  ;;  %v5934_v50 = vpop.f32.mrb[83].mxu0  ;;  %v662_v37 = vld [vmem:[#allocation2 + $0x2e8] sm:$0xff]  ;;  %v664_v46 = vld [vmem:[#allocation2 + $0x2f8] sm:$0xff] }
 0x4fe   : > { %v6128_v52 = vadd.f32 %v8588_v43, %v650_v41  ;;  %v8590_v53 = vadd.f32 %v5934_v50, %v4875_v49  ;;  %v663_v41 = vld [vmem:[#allocation2 + $0x2f0] sm:$0xff] }
 0x4ff   : > { %6255 = vst [vmem:[#allocation2 + $0x280] sm:$0xff] %v6127_v47  ;;  %v6129_v54 = vadd.f32 %v8589_v48, %v651_v45 }
 0x500   : > { %6256 = vst [vmem:[#allocation2 + $0x288] sm:$0xff] %v6128_v52  ;;  %v6130_v55 = vadd.f32 %v8590_v53, %v652_v51  ;;  %v665_v53 = vld [vmem:[#allocation2 + $0x300] sm:$0xff] }
 0x501   : > { %6257 = vst [vmem:[#allocation2 + $0x290] sm:$0xff] %v6129_v54  ;;  %v4879_v56 = vpop.f32.mrb[84].mxu1 }
 0x502   : > { %6258 = vst [vmem:[#allocation2 + $0x298] sm:$0xff] %v6130_v55  ;;  %v5938_v58 = vpop.f32.mrb[84].mxu0  ;;  %v4881_v60 = vpop.f32.mrb[85].mxu1 }
 0x503   : > { %v8591_v59 = vadd.f32 %v5938_v58, %v4879_v56  ;;  %v5940_v62 = vpop.f32.mrb[85].mxu0  ;;  %v4883_v0 = vpop.f32.mrb[86].mxu1 }
 0x504   : > { %v8592_v63 = vadd.f32 %v5940_v62, %v4881_v60  ;;  %v5942_v2 = vpop.f32.mrb[86].mxu0  ;;  %v4885_v5 = vpop.f32.mrb[87].mxu1 }
 0x505   : > { %v6131_v3 = vadd.f32 %v8591_v59, %v653_v57  ;;  %v8593_v4 = vadd.f32 %v5942_v2, %v4883_v0  ;;  %v5944_v7 = vpop.f32.mrb[87].mxu0  ;;  %v666_v57 = vld [vmem:[#allocation2 + $0x308] sm:$0xff]  ;;  %v668_v2 = vld [vmem:[#allocation2 + $0x318] sm:$0xff] }
 0x506   : > { %v6132_v8 = vadd.f32 %v8592_v63, %v654_v61  ;;  %v8594_v9 = vadd.f32 %v5944_v7, %v4885_v5  ;;  %v667_v61 = vld [vmem:[#allocation2 + $0x310] sm:$0xff] }
 0x507   : > { %6259 = vst [vmem:[#allocation2 + $0x2a0] sm:$0xff] %v6131_v3  ;;  %v6133_v10 = vadd.f32 %v8593_v4, %v655_v1 }
 0x508   : > { %6260 = vst [vmem:[#allocation2 + $0x2a8] sm:$0xff] %v6132_v8  ;;  %v6134_v11 = vadd.f32 %v8594_v9, %v656_v6  ;;  %v669_v9 = vld [vmem:[#allocation2 + $0x320] sm:$0xff] }
 0x509   : > { %6261 = vst [vmem:[#allocation2 + $0x2b0] sm:$0xff] %v6133_v10  ;;  %v4889_v12 = vpop.f32.mrb[88].mxu1 }
 0x50a   : > { %6262 = vst [vmem:[#allocation2 + $0x2b8] sm:$0xff] %v6134_v11  ;;  %v5948_v14 = vpop.f32.mrb[88].mxu0  ;;  %v4891_v16 = vpop.f32.mrb[89].mxu1 }
 0x50b   : > { %v8595_v15 = vadd.f32 %v5948_v14, %v4889_v12  ;;  %v5950_v18 = vpop.f32.mrb[89].mxu0  ;;  %v4893_v20 = vpop.f32.mrb[90].mxu1 }
 0x50c   : > { %v8596_v19 = vadd.f32 %v5950_v18, %v4891_v16  ;;  %v5952_v22 = vpop.f32.mrb[90].mxu0  ;;  %v4895_v25 = vpop.f32.mrb[91].mxu1 }
 0x50d   : > { %v6135_v23 = vadd.f32 %v8595_v15, %v657_v13  ;;  %v8597_v24 = vadd.f32 %v5952_v22, %v4893_v20  ;;  %v5954_v27 = vpop.f32.mrb[91].mxu0  ;;  %v670_v13 = vld [vmem:[#allocation2 + $0x328] sm:$0xff]  ;;  %v672_v22 = vld [vmem:[#allocation2 + $0x338] sm:$0xff] }
 0x50e   : > { %v6136_v28 = vadd.f32 %v8596_v19, %v658_v17  ;;  %v8598_v29 = vadd.f32 %v5954_v27, %v4895_v25  ;;  %v671_v17 = vld [vmem:[#allocation2 + $0x330] sm:$0xff] }
 0x50f   : > { %6263 = vst [vmem:[#allocation2 + $0x2c0] sm:$0xff] %v6135_v23  ;;  %v6137_v30 = vadd.f32 %v8597_v24, %v659_v21 }
 0x510   : > { %6264 = vst [vmem:[#allocation2 + $0x2c8] sm:$0xff] %v6136_v28  ;;  %v6138_v31 = vadd.f32 %v8598_v29, %v660_v26  ;;  %v673_v29 = vld [vmem:[#allocation2 + $0x340] sm:$0xff] }
 0x511   : > { %6265 = vst [vmem:[#allocation2 + $0x2d0] sm:$0xff] %v6137_v30  ;;  %v4899_v32 = vpop.f32.mrb[92].mxu1 }
 0x512   : > { %6266 = vst [vmem:[#allocation2 + $0x2d8] sm:$0xff] %v6138_v31  ;;  %v5958_v34 = vpop.f32.mrb[92].mxu0  ;;  %v4901_v36 = vpop.f32.mrb[93].mxu1 }
 0x513   : > { %v8599_v35 = vadd.f32 %v5958_v34, %v4899_v32  ;;  %v5960_v38 = vpop.f32.mrb[93].mxu0  ;;  %v4903_v40 = vpop.f32.mrb[94].mxu1 }
 0x514   : > { %v8600_v39 = vadd.f32 %v5960_v38, %v4901_v36  ;;  %v5962_v42 = vpop.f32.mrb[94].mxu0  ;;  %v4905_v45 = vpop.f32.mrb[95].mxu1 }
 0x515   : > { %v6139_v43 = vadd.f32 %v8599_v35, %v661_v33  ;;  %v8601_v44 = vadd.f32 %v5962_v42, %v4903_v40  ;;  %v5964_v47 = vpop.f32.mrb[95].mxu0  ;;  %v674_v33 = vld [vmem:[#allocation2 + $0x348] sm:$0xff]  ;;  %v676_v42 = vld [vmem:[#allocation2 + $0x358] sm:$0xff] }
 0x516   : > { %v6140_v48 = vadd.f32 %v8600_v39, %v662_v37  ;;  %v8602_v49 = vadd.f32 %v5964_v47, %v4905_v45  ;;  %v675_v37 = vld [vmem:[#allocation2 + $0x350] sm:$0xff] }
 0x517   : > { %6267 = vst [vmem:[#allocation2 + $0x2e0] sm:$0xff] %v6139_v43  ;;  %v6141_v51 = vadd.f32 %v8601_v44, %v663_v41 }
 0x518   : > { %6268 = vst [vmem:[#allocation2 + $0x2e8] sm:$0xff] %v6140_v48  ;;  %v6142_v50 = vadd.f32 %v8602_v49, %v664_v46  ;;  %v677_v49 = vld [vmem:[#allocation2 + $0x360] sm:$0xff] }
 0x519   : > { %6269 = vst [vmem:[#allocation2 + $0x2f0] sm:$0xff] %v6141_v51  ;;  %v4909_v52 = vpop.f32.mrb[96].mxu1 }
 0x51a   : > { %6270 = vst [vmem:[#allocation2 + $0x2f8] sm:$0xff] %v6142_v50  ;;  %v5968_v54 = vpop.f32.mrb[96].mxu0  ;;  %v4911_v56 = vpop.f32.mrb[97].mxu1 }
 0x51b   : > { %v8603_v55 = vadd.f32 %v5968_v54, %v4909_v52  ;;  %v5970_v58 = vpop.f32.mrb[97].mxu0  ;;  %v4913_v60 = vpop.f32.mrb[98].mxu1 }
 0x51c   : > { %v8604_v59 = vadd.f32 %v5970_v58, %v4911_v56  ;;  %v5972_v62 = vpop.f32.mrb[98].mxu0  ;;  %v4915_v1 = vpop.f32.mrb[99].mxu1 }
 0x51d   : > { %v6143_v63 = vadd.f32 %v8603_v55, %v665_v53  ;;  %v8605_v0 = vadd.f32 %v5972_v62, %v4913_v60  ;;  %v5974_v3 = vpop.f32.mrb[99].mxu0  ;;  %v678_v53 = vld [vmem:[#allocation2 + $0x368] sm:$0xff]  ;;  %v680_v62 = vld [vmem:[#allocation2 + $0x378] sm:$0xff] }
 0x51e   : > { %v6144_v4 = vadd.f32 %v8604_v59, %v666_v57  ;;  %v8606_v5 = vadd.f32 %v5974_v3, %v4915_v1  ;;  %v679_v57 = vld [vmem:[#allocation2 + $0x370] sm:$0xff] }
 0x51f   : > { %6271 = vst [vmem:[#allocation2 + $0x300] sm:$0xff] %v6143_v63  ;;  %v6145_v6 = vadd.f32 %v8605_v0, %v667_v61 }
 0x520   : > { %6272 = vst [vmem:[#allocation2 + $0x308] sm:$0xff] %v6144_v4  ;;  %v6146_v7 = vadd.f32 %v8606_v5, %v668_v2  ;;  %v681_v5 = vld [vmem:[#allocation2 + $0x380] sm:$0xff] }
 0x521   : > { %6273 = vst [vmem:[#allocation2 + $0x310] sm:$0xff] %v6145_v6  ;;  %v4919_v8 = vpop.f32.mrb[100].mxu1 }
 0x522   : > { %6274 = vst [vmem:[#allocation2 + $0x318] sm:$0xff] %v6146_v7  ;;  %v5978_v10 = vpop.f32.mrb[100].mxu0  ;;  %v4921_v12 = vpop.f32.mrb[101].mxu1 }
 0x523   : > { %v8607_v11 = vadd.f32 %v5978_v10, %v4919_v8  ;;  %v5980_v14 = vpop.f32.mrb[101].mxu0  ;;  %v4923_v16 = vpop.f32.mrb[102].mxu1 }
 0x524   : > { %v8608_v15 = vadd.f32 %v5980_v14, %v4921_v12  ;;  %v5982_v18 = vpop.f32.mrb[102].mxu0  ;;  %v4925_v21 = vpop.f32.mrb[103].mxu1 }
 0x525   : > { %v6147_v19 = vadd.f32 %v8607_v11, %v669_v9  ;;  %v8609_v20 = vadd.f32 %v5982_v18, %v4923_v16  ;;  %v5984_v23 = vpop.f32.mrb[103].mxu0  ;;  %v682_v9 = vld [vmem:[#allocation2 + $0x388] sm:$0xff]  ;;  %v684_v18 = vld [vmem:[#allocation2 + $0x398] sm:$0xff] }
 0x526   : > { %v6148_v24 = vadd.f32 %v8608_v15, %v670_v13  ;;  %v8610_v25 = vadd.f32 %v5984_v23, %v4925_v21  ;;  %v683_v13 = vld [vmem:[#allocation2 + $0x390] sm:$0xff] }
 0x527   : > { %6275 = vst [vmem:[#allocation2 + $0x320] sm:$0xff] %v6147_v19  ;;  %v6149_v26 = vadd.f32 %v8609_v20, %v671_v17 }
 0x528   : > { %6276 = vst [vmem:[#allocation2 + $0x328] sm:$0xff] %v6148_v24  ;;  %v6150_v27 = vadd.f32 %v8610_v25, %v672_v22  ;;  %v685_v25 = vld [vmem:[#allocation2 + $0x3a0] sm:$0xff] }
 0x529   : > { %6277 = vst [vmem:[#allocation2 + $0x330] sm:$0xff] %v6149_v26  ;;  %v4929_v28 = vpop.f32.mrb[104].mxu1 }
 0x52a   : > { %6278 = vst [vmem:[#allocation2 + $0x338] sm:$0xff] %v6150_v27  ;;  %v5988_v30 = vpop.f32.mrb[104].mxu0  ;;  %v4931_v32 = vpop.f32.mrb[105].mxu1 }
 0x52b   : > { %v8611_v31 = vadd.f32 %v5988_v30, %v4929_v28  ;;  %v5990_v34 = vpop.f32.mrb[105].mxu0  ;;  %v4933_v36 = vpop.f32.mrb[106].mxu1 }
 0x52c   : > { %v8612_v35 = vadd.f32 %v5990_v34, %v4931_v32  ;;  %v5992_v38 = vpop.f32.mrb[106].mxu0  ;;  %v4935_v41 = vpop.f32.mrb[107].mxu1 }
 0x52d   : > { %v6151_v39 = vadd.f32 %v8611_v31, %v673_v29  ;;  %v8613_v40 = vadd.f32 %v5992_v38, %v4933_v36  ;;  %v5994_v43 = vpop.f32.mrb[107].mxu0  ;;  %v686_v29 = vld [vmem:[#allocation2 + $0x3a8] sm:$0xff]  ;;  %v688_v38 = vld [vmem:[#allocation2 + $0x3b8] sm:$0xff] }
 0x52e   : > { %v6152_v44 = vadd.f32 %v8612_v35, %v674_v33  ;;  %v8614_v45 = vadd.f32 %v5994_v43, %v4935_v41  ;;  %v687_v33 = vld [vmem:[#allocation2 + $0x3b0] sm:$0xff] }
 0x52f   : > { %6279 = vst [vmem:[#allocation2 + $0x340] sm:$0xff] %v6151_v39  ;;  %v6153_v46 = vadd.f32 %v8613_v40, %v675_v37 }
 0x530   : > { %6280 = vst [vmem:[#allocation2 + $0x348] sm:$0xff] %v6152_v44  ;;  %v6154_v47 = vadd.f32 %v8614_v45, %v676_v42  ;;  %v689_v45 = vld [vmem:[#allocation2 + $0x3c0] sm:$0xff] }
 0x531   : > { %6281 = vst [vmem:[#allocation2 + $0x350] sm:$0xff] %v6153_v46  ;;  %v4939_v48 = vpop.f32.mrb[108].mxu1 }
 0x532   : > { %6282 = vst [vmem:[#allocation2 + $0x358] sm:$0xff] %v6154_v47  ;;  %v5998_v51 = vpop.f32.mrb[108].mxu0  ;;  %v4941_v52 = vpop.f32.mrb[109].mxu1 }
 0x533   : > { %v8615_v50 = vadd.f32 %v5998_v51, %v4939_v48  ;;  %v6000_v54 = vpop.f32.mrb[109].mxu0  ;;  %v4943_v56 = vpop.f32.mrb[110].mxu1 }
 0x534   : > { %v8616_v55 = vadd.f32 %v6000_v54, %v4941_v52  ;;  %v6002_v58 = vpop.f32.mrb[110].mxu0  ;;  %v4945_v61 = vpop.f32.mrb[111].mxu1 }
 0x535   : > { %v6155_v59 = vadd.f32 %v8615_v50, %v677_v49  ;;  %v8617_v60 = vadd.f32 %v6002_v58, %v4943_v56  ;;  %v6004_v63 = vpop.f32.mrb[111].mxu0  ;;  %v690_v49 = vld [vmem:[#allocation2 + $0x3c8] sm:$0xff]  ;;  %v692_v58 = vld [vmem:[#allocation2 + $0x3d8] sm:$0xff] }
 0x536   : > { %v6156_v0 = vadd.f32 %v8616_v55, %v678_v53  ;;  %v8618_v1 = vadd.f32 %v6004_v63, %v4945_v61  ;;  %v691_v53 = vld [vmem:[#allocation2 + $0x3d0] sm:$0xff] }
 0x537   : > { %6283 = vst [vmem:[#allocation2 + $0x360] sm:$0xff] %v6155_v59  ;;  %v6157_v2 = vadd.f32 %v8617_v60, %v679_v57 }
 0x538   : > { %6284 = vst [vmem:[#allocation2 + $0x368] sm:$0xff] %v6156_v0  ;;  %v6158_v3 = vadd.f32 %v8618_v1, %v680_v62  ;;  %v693_v1 = vld [vmem:[#allocation2 + $0x3e0] sm:$0xff] }
 0x539   : > { %6285 = vst [vmem:[#allocation2 + $0x370] sm:$0xff] %v6157_v2  ;;  %v4949_v4 = vpop.f32.mrb[112].mxu1 }
 0x53a   : > { %6286 = vst [vmem:[#allocation2 + $0x378] sm:$0xff] %v6158_v3  ;;  %v6008_v6 = vpop.f32.mrb[112].mxu0  ;;  %v4951_v8 = vpop.f32.mrb[113].mxu1 }
 0x53b   : > { %v8619_v7 = vadd.f32 %v6008_v6, %v4949_v4  ;;  %v6010_v10 = vpop.f32.mrb[113].mxu0  ;;  %v4953_v12 = vpop.f32.mrb[114].mxu1 }
 0x53c   : > { %v8620_v11 = vadd.f32 %v6010_v10, %v4951_v8  ;;  %v6012_v14 = vpop.f32.mrb[114].mxu0  ;;  %v4955_v17 = vpop.f32.mrb[115].mxu1 }
 0x53d   : > { %v6159_v15 = vadd.f32 %v8619_v7, %v681_v5  ;;  %v8621_v16 = vadd.f32 %v6012_v14, %v4953_v12  ;;  %v6014_v19 = vpop.f32.mrb[115].mxu0  ;;  %v694_v5 = vld [vmem:[#allocation2 + $0x3e8] sm:$0xff]  ;;  %v696_v14 = vld [vmem:[#allocation2 + $0x3f8] sm:$0xff] }
 0x53e   : > { %v6160_v20 = vadd.f32 %v8620_v11, %v682_v9  ;;  %v8622_v21 = vadd.f32 %v6014_v19, %v4955_v17  ;;  %v695_v9 = vld [vmem:[#allocation2 + $0x3f0] sm:$0xff] }
 0x53f   : > { %6287 = vst [vmem:[#allocation2 + $0x380] sm:$0xff] %v6159_v15  ;;  %v6161_v22 = vadd.f32 %v8621_v16, %v683_v13 }
 0x540   : > { %6288 = vst [vmem:[#allocation2 + $0x388] sm:$0xff] %v6160_v20  ;;  %v6162_v23 = vadd.f32 %v8622_v21, %v684_v18  ;;  %v6437_v20 = vlaneseq (!%p8358_p5)  ;;  %v6715_v21 = vld [vmem:[%s10808_s24] sm:$0xff] (!%p8358_p5) }
 0x541   : > { %6289 = vst [vmem:[#allocation2 + $0x390] sm:$0xff] %v6161_v22  ;;  %v4959_v24 = vpop.f32.mrb[116].mxu1 }
 0x542   : > { %6290 = vst [vmem:[#allocation2 + $0x398] sm:$0xff] %v6162_v23  ;;  %v6018_v26 = vpop.f32.mrb[116].mxu0  ;;  %v4961_v28 = vpop.f32.mrb[117].mxu1  ;;  %v6438_v22 = vshrl.u32 (!%p8358_p5), %v6437_v20, 7  ;;  %v6716_v23 = vld [vmem:[%s10808_s24 + $0x8] sm:$0xff] (!%p8358_p5) }
 0x543   : > { %v8623_v27 = vadd.f32 %v6018_v26, %v4959_v24  ;;  %v6020_v30 = vpop.f32.mrb[117].mxu0  ;;  %v4963_v32 = vpop.f32.mrb[118].mxu1  ;;  %v6307_v24 = vld [vmem:[#allocation2] sm:$0xff] (!%p8358_p5) }
 0x544   : > { %v8624_v31 = vadd.f32 %v6020_v30, %v4961_v28  ;;  %v6022_v34 = vpop.f32.mrb[118].mxu0  ;;  %v4965_v37 = vpop.f32.mrb[119].mxu1  ;;  %v6435_v26 = vld [vmem:[#allocation8] sm:$0x3] (!%p8358_p5)  ;;  %v6779_v28 = vunpack.c.l.bf16 (!%p8358_p5), %v6715_v21  ;;  %v6717_v30 = vld [vmem:[%s10808_s24 + $0x10] sm:$0xff] (!%p8358_p5) }
 0x545   : > { %v6163_v35 = vadd.f32 %v8623_v27, %v685_v25  ;;  %v8625_v36 = vadd.f32 %v6022_v34, %v4963_v32  ;;  %v6024_v39 = vpop.f32.mrb[119].mxu0  ;;  %v6308_v25 = vld [vmem:[#allocation2 + $0x8] sm:$0xff] (!%p8358_p5)  ;;  %v6575_v27 = vld [vmem:[#allocation9] sm:$0x3] (!%p8358_p5)  ;;  %v6443_v32 = vsub.s32 (!%p8358_p5), 1, %v6438_v22  ;;  %v6310_v34 = vld [vmem:[#allocation2 + $0x18] sm:$0xff] (!%p8358_p5) }
 0x546   : > { %v6164_v40 = vadd.f32 %v8624_v31, %v686_v29  ;;  %v8626_v41 = vadd.f32 %v6024_v39, %v4965_v37  ;;  %v6780_v29 = vunpack.c.h.bf16 (!%p8358_p5), %v6715_v21  ;;  %v6439_v31 = vsub.s32 (!%p8358_p5), 0, %v6438_v22  ;;  %v6718_v37 = vld [vmem:[%s10808_s24 + $0x18] sm:$0xff] (!%p8358_p5)  ;;  %v6312_v39 = vld [vmem:[#allocation2 + $0x28] sm:$0xff] (!%p8358_p5)  ;;  %v6317_v22 = vld [vmem:[#allocation2 + $0x50] sm:$0xff] (!%p8358_p5) }
 0x547   : > { %6291 = vst [vmem:[#allocation2 + $0x3a0] sm:$0xff] %v6163_v35  ;;  %v6165_v42 = vadd.f32 %v8625_v36, %v687_v33  ;;  %v6309_v33 = vld [vmem:[#allocation2 + $0x10] sm:$0xff] (!%p8358_p5)  ;;  %v6781_v35 = vunpack.c.l.bf16 (!%p8358_p5), %v6716_v23  ;;  %v6782_v36 = vunpack.c.h.bf16 (!%p8358_p5), %v6716_v23  ;;  %v6318_v23 = vld [vmem:[#allocation2 + $0x58] sm:$0xff] (!%p8358_p5) }
 0x548   : > { %6292 = vst [vmem:[#allocation2 + $0x3a8] sm:$0xff] %v6164_v40  ;;  %v6166_v43 = vadd.f32 %v8626_v41, %v688_v38  ;;  %v6311_v38 = vld [vmem:[#allocation2 + $0x20] sm:$0xff] (!%p8358_p5)  ;;  %v6783_v40 = vunpack.c.l.bf16 (!%p8358_p5), %v6717_v30  ;;  %v6784_v41 = vunpack.c.h.bf16 (!%p8358_p5), %v6717_v30 }
 0x549   : > { %6293 = vst [vmem:[#allocation2 + $0x3b0] sm:$0xff] %v6165_v42  ;;  %v4969_v44 = vpop.f32.mrb[120].mxu1  ;;  %v6785_v42 = vunpack.c.l.bf16 (!%p8358_p5), %v6718_v37 }
 0x54a   : > { %6294 = vst [vmem:[#allocation2 + $0x3b8] sm:$0xff] %v6166_v43  ;;  %v6028_v46 = vpop.f32.mrb[120].mxu0  ;;  %v4971_v48 = vpop.f32.mrb[121].mxu1  ;;  %v6786_v43 = vunpack.c.h.bf16 (!%p8358_p5), %v6718_v37 }
 0x54b   : > { %v8627_v47 = vadd.f32 %v6028_v46, %v4969_v44  ;;  %v6030_v51 = vpop.f32.mrb[121].mxu0  ;;  %v4973_v52 = vpop.f32.mrb[122].mxu1  ;;  %v11511_v44 = vld [vmem:[%s10808_s24 + $0x20] sm:$0xff] (!%p8358_p5)  ;;  %v11515_v46 = vrot.slane (!%p8358_p5), %v6435_v26, %v6443_v32 }
 0x54c   : > { %v8628_v50 = vadd.f32 %v6030_v51, %v4971_v48  ;;  %v6032_v54 = vpop.f32.mrb[122].mxu0  ;;  %v4975_v57 = vpop.f32.mrb[123].mxu1  ;;  %v11519_v48 = vrot.slane (!%p8358_p5), %v6575_v27, %v6443_v32  ;;  %v6314_v51 = vld [vmem:[#allocation2 + $0x38] sm:$0xff] (!%p8358_p5) }
 0x54d   : > { %v6167_v55 = vadd.f32 %v8627_v47, %v689_v45  ;;  %v8629_v56 = vadd.f32 %v6032_v54, %v4973_v52  ;;  %v6034_v59 = vpop.f32.mrb[123].mxu0  ;;  %v11513_v45 = vrot.slane (!%p8358_p5), %v6435_v26, %v6439_v31  ;;  %v11517_v47 = vrot.slane (!%p8358_p5), %v6575_v27, %v6439_v31 }
 0x54e   : > { %v6168_v60 = vadd.f32 %v8628_v50, %v690_v49  ;;  %v8630_v61 = vadd.f32 %v6034_v59, %v4975_v57  ;;  %v6313_v49 = vld [vmem:[#allocation2 + $0x30] sm:$0xff] (!%p8358_p5)  ;;  %v6787_v52 = vunpack.c.l.bf16 (!%p8358_p5), %v11511_v44  ;;  %v6448_v57 = vmul.f32 (!%p8358_p5), %v11515_v46, %v6308_v25 }
 0x54f   : > { %6295 = vst [vmem:[#allocation2 + $0x3c0] sm:$0xff] %v6167_v55  ;;  %v6169_v62 = vadd.f32 %v8629_v56, %v691_v53  ;;  %v11522_v50 = vld [vmem:[%s10808_s24 + $0x28] sm:$0xff] (!%p8358_p5)  ;;  %v6788_v53 = vunpack.c.h.bf16 (!%p8358_p5), %v11511_v44  ;;  %v6447_v56 = vmul.f32 (!%p8358_p5), %v11513_v45, %v6307_v24  ;;  %v6450_v59 = vmul.f32 (!%p8358_p5), %v11515_v46, %v6310_v34  ;;  %v6721_v34 = vld [vmem:[%s10808_s24 + $0x30] sm:$0xff] (!%p8358_p5) }
 0x550   : > { %6296 = vst [vmem:[#allocation2 + $0x3c8] sm:$0xff] %v6168_v60  ;;  %v6170_v63 = vadd.f32 %v8630_v61, %v692_v58  ;;  %v6789_v54 = vunpack.c.l.bf16 (!%p8358_p5), %v11522_v50  ;;  %v6790_v55 = vunpack.c.h.bf16 (!%p8358_p5), %v11522_v50  ;;  %v6449_v58 = vmul.f32 (!%p8358_p5), %v11513_v45, %v6309_v33 }
 0x551   : > { %6297 = vst [vmem:[#allocation2 + $0x3d0] sm:$0xff] %v6169_v62  ;;  %v4979_v0 = vpop.f32.mrb[124].mxu1  ;;  %v6451_v60 = vmul.f32 (!%p8358_p5), %v11513_v45, %v6311_v38  ;;  %v6452_v61 = vmul.f32 (!%p8358_p5), %v11515_v46, %v6312_v39  ;;  %v6453_v62 = vmul.f32 (!%p8358_p5), %v11513_v45, %v6313_v49  ;;  %v6457_v37 = vmul.f32 (!%p8358_p5), %v11513_v45, %v6317_v22  ;;  %v6322_v49 = vld [vmem:[#allocation2 + $0x78] sm:$0xff] (!%p8358_p5) }
 0x552   : > { %6298 = vst [vmem:[#allocation2 + $0x3d8] sm:$0xff] %v6170_v63  ;;  %v6038_v2 = vpop.f32.mrb[124].mxu0  ;;  %v4981_v4 = vpop.f32.mrb[125].mxu1  ;;  %v6454_v63 = vmul.f32 (!%p8358_p5), %v11515_v46, %v6314_v51  ;;  %v6458_v38 = vmul.f32 (!%p8358_p5), %v11515_v46, %v6318_v23 }
 0x553   : > { %v8631_v3 = vadd.f32 %v6038_v2, %v4979_v0  ;;  %v6040_v6 = vpop.f32.mrb[125].mxu0  ;;  %v4983_v8 = vpop.f32.mrb[126].mxu1  ;;  %v6587_v0 = vadd.f32 (!%p8358_p5), %v11517_v47, %v6447_v56  ;;  %v6589_v2 = vadd.f32 (!%p8358_p5), %v11517_v47, %v6449_v58  ;;  %v6597_v51 = vadd.f32 (!%p8358_p5), %v11517_v47, %v6457_v37 }
 0x554   : > { %v8632_v7 = vadd.f32 %v6040_v6, %v4981_v4  ;;  %v6042_v10 = vpop.f32.mrb[126].mxu0  ;;  %v4985_v13 = vpop.f32.mrb[127].mxu1  ;;  %6306 = sbr.rel (%p8358_p5) target bundleno = 1542 (0x606), region = 68  ;;  %v6591_v4 = vadd.f32 (!%p8358_p5), %v11517_v47, %v6451_v60  ;;  %v6593_v6 = vadd.f32 (!%p8358_p5), %v11517_v47, %v6453_v62  ;;  %v6598_v56 = vadd.f32 (!%p8358_p5), %v11519_v48, %v6458_v38 }
 0x555   : > { %v6171_v11 = vadd.f32 %v8631_v3, %v693_v1  ;;  %v8633_v12 = vadd.f32 %v6042_v10, %v4983_v8  ;;  %v6044_v15 = vpop.f32.mrb[127].mxu0  ;;  %v6588_v1 = vadd.f32 (!%p8358_p5), %v11519_v48, %v6448_v57  ;;  %v6590_v3 = vadd.f32 (!%p8358_p5), %v11519_v48, %v6450_v59 }
 0x556   : > { %v6172_v16 = vadd.f32 %v8632_v7, %v694_v5  ;;  %v8634_v17 = vadd.f32 %v6044_v15, %v4985_v13  ;;  %v6592_v5 = vadd.f32 (!%p8358_p5), %v11519_v48, %v6452_v61  ;;  %v6594_v7 = vadd.f32 (!%p8358_p5), %v11519_v48, %v6454_v63 }
 0x557   : > { %6299 = vst [vmem:[#allocation2 + $0x3e0] sm:$0xff] %v6171_v11  ;;  %v6173_v18 = vadd.f32 %v8633_v12, %v695_v9  ;;  %v6907_v8 = vadd.f32 (!%p8358_p5), %v6779_v28, %v6587_v0  ;;  %v6908_v9 = vadd.f32 (!%p8358_p5), %v6780_v29, %v6588_v1  ;;  %v6909_v10 = vadd.f32 (!%p8358_p5), %v6781_v35, %v6589_v2  ;;  %v6319_v28 = vld [vmem:[#allocation2 + $0x60] sm:$0xff] (!%p8358_p5)  ;;  %v6320_v29 = vld [vmem:[#allocation2 + $0x68] sm:$0xff] (!%p8358_p5) }
 0x558   : > { %6300 = vst [vmem:[#allocation2 + $0x3e8] sm:$0xff] %v6172_v16  ;;  %v6174_v19 = vadd.f32 %v8634_v17, %v696_v14  ;;  %v6910_v11 = vadd.f32 (!%p8358_p5), %v6782_v36, %v6590_v3  ;;  %v6911_v12 = vadd.f32 (!%p8358_p5), %v6783_v40, %v6591_v4  ;;  %v6912_v13 = vadd.f32 (!%p8358_p5), %v6784_v41, %v6592_v5  ;;  %v6315_v16 = vld [vmem:[#allocation2 + $0x40] sm:$0xff] (!%p8358_p5)  ;;  %v6316_v17 = vld [vmem:[#allocation2 + $0x48] sm:$0xff] (!%p8358_p5) }
 0x559   : > { %6301 = vst [vmem:[#allocation2 + $0x3f0] sm:$0xff] %v6173_v18  ;;  %v6913_v14 = vadd.f32 (!%p8358_p5), %v6785_v42, %v6593_v6  ;;  %v6914_v15 = vadd.f32 (!%p8358_p5), %v6786_v43, %v6594_v7  ;;  %v7035_v18 = vmax.f32 (!%p8358_p5), %v6907_v8, 0.0  ;;  %v7037_v20 = vmax.f32 (!%p8358_p5), %v6909_v10, 0.0  ;;  %v6321_v43 = vld [vmem:[#allocation2 + $0x70] sm:$0xff] (!%p8358_p5)  ;;  %v6722_v3 = vld [vmem:[%s10808_s24 + $0x38] sm:$0xff] (!%p8358_p5)  ;;  %v6324_v6 = vld [vmem:[#allocation2 + $0x88] sm:$0xff] (!%p8358_p5) }
 0x55a   : > { %6302 = vst [vmem:[#allocation2 + $0x3f8] sm:$0xff] %v6174_v19  ;;  %v7036_v19 = vmax.f32 (!%p8358_p5), %v6908_v9, 0.0  ;;  %v7038_v21 = vmax.f32 (!%p8358_p5), %v6910_v11, 0.0  ;;  %v7039_v24 = vmax.f32 (!%p8358_p5), %v6911_v12, 0.0  ;;  %v7040_v25 = vmax.f32 (!%p8358_p5), %v6912_v13, 0.0  ;;  %v6323_v5 = vld [vmem:[#allocation2 + $0x80] sm:$0xff] (!%p8358_p5) }
 0x55b   : > { %v7041_v26 = vmax.f32 %v6913_v14, 0.0  ;;  %v7042_v27 = vmax.f32 %v6914_v15, 0.0  ;;  %v6455_v32 = vmul.f32 %v11513_v45, %v6315_v16  ;;  %v6456_v33 = vmul.f32 %v11515_v46, %v6316_v17  ;;  %v6325_v13 = vld [vmem:[#allocation2 + $0x90] sm:$0xff] }
 0x55c   : > { %v8439_v30 = vpack.c.bf16 %v7036_v19, %v7035_v18  ;;  %v8440_v31 = vpack.c.bf16 %v7038_v21, %v7037_v20  ;;  %v8441_v35 = vpack.c.bf16 %v7040_v25, %v7039_v24  ;;  %v6459_v41 = vmul.f32 %v11513_v45, %v6319_v28  ;;  %v6326_v18 = vld [vmem:[#allocation2 + $0x98] sm:$0xff]  ;;  %v6724_v19 = vld [vmem:[%s10808_s24 + $0x48] sm:$0xff]  ;;  %v6327_v28 = vld [vmem:[#allocation2 + $0xa0] sm:$0xff] }
 0x55d   : > { %v8442_v36 = vpack.c.bf16 %v7042_v27, %v7041_v26  ;;  %v6595_v39 = vadd.f32 %v11517_v47, %v6455_v32  ;;  %v6596_v40 = vadd.f32 %v11519_v48, %v6456_v33  ;;  %v6460_v42 = vmul.f32 %v11515_v46, %v6320_v29  ;;  %v6328_v29 = vld [vmem:[#allocation2 + $0xa8] sm:$0xff] }
 0x55e   : > { %7547 = vst [vmem:[%s10814_s17] sm:$0xff] %v8439_v30  ;;  %7548 = vst [vmem:[%s10814_s17 + $0x8] sm:$0xff] %v8440_v31  ;;  %v6791_v57 = vunpack.c.l.bf16 %v6721_v34  ;;  %v6792_v58 = vunpack.c.h.bf16 %v6721_v34  ;;  %v6599_v61 = vadd.f32 %v11517_v47, %v6459_v41  ;;  %v6917_v63 = vadd.f32 %v6789_v54, %v6597_v51  ;;  %v6725_v30 = vld [vmem:[%s10808_s24 + $0x50] sm:$0xff] }
 0x55f   : > { %7549 = vst [vmem:[%s10814_s17 + $0x10] sm:$0xff] %v8441_v35  ;;  %7550 = vst [vmem:[%s10814_s17 + $0x18] sm:$0xff] %v8442_v36  ;;  %v6915_v59 = vadd.f32 %v6787_v52, %v6595_v39  ;;  %v6916_v60 = vadd.f32 %v6788_v53, %v6596_v40  ;;  %v6600_v62 = vadd.f32 %v11519_v48, %v6460_v42  ;;  %v6793_v12 = vunpack.c.l.bf16 %v6722_v3 }
 0x560   : > { %v6918_v0 = vadd.f32 %v6790_v55, %v6598_v56  ;;  %v6461_v1 = vmul.f32 %v11513_v45, %v6321_v43  ;;  %v6462_v2 = vmul.f32 %v11515_v46, %v6322_v49  ;;  %v6919_v44 = vadd.f32 %v6791_v57, %v6599_v61  ;;  %v6723_v55 = vld [vmem:[%s10808_s24 + $0x40] sm:$0xff]  ;;  %v6329_v43 = vld [vmem:[#allocation2 + $0xb0] sm:$0xff]  ;;  %v6330_v49 = vld [vmem:[#allocation2 + $0xb8] sm:$0xff] }
 0x561   : > { %v7043_v52 = vmax.f32 %v6915_v59, 0.0  ;;  %v7044_v4 = vmax.f32 %v6916_v60, 0.0  ;;  %v6920_v53 = vadd.f32 %v6792_v58, %v6600_v62  ;;  %v7045_v7 = vmax.f32 %v6917_v63, 0.0  ;;  %v6726_v59 = vld [vmem:[%s10808_s24 + $0x58] sm:$0xff] }
 0x562   : > { %v7046_v8 = vmax.f32 %v6918_v0, 0.0  ;;  %v6601_v54 = vadd.f32 %v11517_v47, %v6461_v1  ;;  %v6602_v50 = vadd.f32 %v11519_v48, %v6462_v2  ;;  %v7047_v10 = vmax.f32 %v6919_v44, 0.0  ;;  %v6331_v0 = vld [vmem:[#allocation2 + $0xc0] sm:$0xff] }
 0x563   : > { %v8443_v9 = vpack.c.bf16 %v7044_v4, %v7043_v52  ;;  %v7048_v11 = vmax.f32 %v6920_v53, 0.0  ;;  %v6794_v15 = vunpack.c.h.bf16 %v6722_v3  ;;  %v6463_v16 = vmul.f32 %v11513_v45, %v6323_v5  ;;  %v6332_v4 = vld [vmem:[#allocation2 + $0xc8] sm:$0xff] }
 0x564   : > { %v8444_v14 = vpack.c.bf16 %v7046_v8, %v7045_v7  ;;  %v6464_v17 = vmul.f32 %v11515_v46, %v6324_v6  ;;  %v6921_v21 = vadd.f32 %v6793_v12, %v6601_v54  ;;  %v6795_v22 = vunpack.c.l.bf16 %v6723_v55  ;;  %v6727_v7 = vld [vmem:[%s10808_s24 + $0x60] sm:$0xff] }
 0x565   : > { %7551 = vst [vmem:[%s10814_s17 + $0x20] sm:$0xff] %v8443_v9  ;;  %v8445_v20 = vpack.c.bf16 %v7048_v11, %v7047_v10  ;;  %v6796_v23 = vunpack.c.h.bf16 %v6723_v55  ;;  %v6922_v24 = vadd.f32 %v6794_v15, %v6602_v50  ;;  %v6603_v25 = vadd.f32 %v11517_v47, %v6463_v16  ;;  %v6333_v9 = vld [vmem:[#allocation2 + $0xd0] sm:$0xff] }
 0x566   : > { %7552 = vst [vmem:[%s10814_s17 + $0x28] sm:$0xff] %v8444_v14  ;;  %v6604_v26 = vadd.f32 %v11519_v48, %v6464_v17  ;;  %v6465_v27 = vmul.f32 %v11513_v45, %v6325_v13  ;;  %v7049_v31 = vmax.f32 %v6921_v21, 0.0  ;;  %v6466_v32 = vmul.f32 %v11515_v46, %v6326_v18  ;;  %v6334_v14 = vld [vmem:[#allocation2 + $0xd8] sm:$0xff] }
 0x567   : > { %7553 = vst [vmem:[%s10814_s17 + $0x30] sm:$0xff] %v8445_v20  ;;  %v6797_v33 = vunpack.c.l.bf16 %v6724_v19  ;;  %v6798_v34 = vunpack.c.h.bf16 %v6724_v19  ;;  %v7050_v35 = vmax.f32 %v6922_v24, 0.0  ;;  %v6923_v36 = vadd.f32 %v6795_v22, %v6603_v25  ;;  %v6728_v19 = vld [vmem:[%s10808_s24 + $0x68] sm:$0xff]  ;;  %v6335_v24 = vld [vmem:[#allocation2 + $0xe0] sm:$0xff] }
 0x568   : > { %v6924_v37 = vadd.f32 %v6796_v23, %v6604_v26  ;;  %v6605_v38 = vadd.f32 %v11517_v47, %v6465_v27  ;;  %v6606_v39 = vadd.f32 %v11519_v48, %v6466_v32  ;;  %v6467_v40 = vmul.f32 %v11513_v45, %v6327_v28 }
 0x569   : > { %v6468_v41 = vmul.f32 %v11515_v46, %v6328_v29  ;;  %v6799_v42 = vunpack.c.l.bf16 %v6725_v30  ;;  %v8446_v51 = vpack.c.bf16 %v7050_v35, %v7049_v31  ;;  %v7051_v56 = vmax.f32 %v6923_v36, 0.0  ;;  %v6336_v29 = vld [vmem:[#allocation2 + $0xe8] sm:$0xff]  ;;  %v6337_v35 = vld [vmem:[#allocation2 + $0xf0] sm:$0xff] }
 0x56a   : > { %v7052_v57 = vmax.f32 %v6924_v37, 0.0  ;;  %v6925_v58 = vadd.f32 %v6797_v33, %v6605_v38  ;;  %v6926_v60 = vadd.f32 %v6798_v34, %v6606_v39  ;;  %v6607_v61 = vadd.f32 %v11517_v47, %v6467_v40  ;;  %v6338_v40 = vld [vmem:[#allocation2 + $0xf8] sm:$0xff] }
 0x56b   : > { %v6608_v62 = vadd.f32 %v11519_v48, %v6468_v41  ;;  %v6800_v63 = vunpack.c.h.bf16 %v6725_v30  ;;  %7554 = vst [vmem:[%s10814_s17 + $0x38] sm:$0xff] %v8446_v51  ;;  %v6469_v3 = vmul.f32 %v11513_v45, %v6329_v43  ;;  %v6470_v52 = vmul.f32 %v11515_v46, %v6330_v49  ;;  %v6729_v30 = vld [vmem:[%s10808_s24 + $0x70] sm:$0xff]  ;;  %v6730_v51 = vld [vmem:[%s10808_s24 + $0x78] sm:$0xff] }
 0x56c   : > { %v8447_v1 = vpack.c.bf16 %v7052_v57, %v7051_v56  ;;  %v7053_v2 = vmax.f32 %v6925_v58, 0.0  ;;  %v7054_v44 = vmax.f32 %v6926_v60, 0.0  ;;  %v6927_v53 = vadd.f32 %v6799_v42, %v6607_v61  ;;  %v6339_v60 = vld [vmem:[#allocation2 + $0x100] sm:$0xff] }
 0x56d   : > { %v6928_v5 = vadd.f32 %v6800_v63, %v6608_v62  ;;  %v6801_v6 = vunpack.c.l.bf16 %v6726_v59  ;;  %v6609_v8 = vadd.f32 %v11517_v47, %v6469_v3  ;;  %v6610_v54 = vadd.f32 %v11519_v48, %v6470_v52 }
 0x56e   : > { %7555 = vst [vmem:[%s10814_s17 + $0x40] sm:$0xff] %v8447_v1  ;;  %v6802_v50 = vunpack.c.h.bf16 %v6726_v59  ;;  %v6471_v55 = vmul.f32 %v11513_v45, %v6331_v0  ;;  %v8448_v10 = vpack.c.bf16 %v7054_v44, %v7053_v2  ;;  %v7055_v11 = vmax.f32 %v6927_v53, 0.0  ;;  %v6340_v1 = vld [vmem:[#allocation2 + $0x108] sm:$0xff] }
 0x56f   : > { %v7056_v12 = vmax.f32 %v6928_v5, 0.0  ;;  %v6472_v13 = vmul.f32 %v11515_v46, %v6332_v4  ;;  %v6929_v15 = vadd.f32 %v6801_v6, %v6609_v8  ;;  %v6803_v18 = vunpack.c.l.bf16 %v6727_v7  ;;  %v6731_v44 = vld [vmem:[%s10808_s24 + $0x80] sm:$0xff]  ;;  %v6341_v8 = vld [vmem:[#allocation2 + $0x110] sm:$0xff] }
 0x570   : > { %v6930_v16 = vadd.f32 %v6802_v50, %v6610_v54  ;;  %v6611_v17 = vadd.f32 %v11517_v47, %v6471_v55  ;;  %7556 = vst [vmem:[%s10814_s17 + $0x48] sm:$0xff] %v8448_v10  ;;  %v6804_v22 = vunpack.c.h.bf16 %v6727_v7  ;;  %v6473_v23 = vmul.f32 %v11513_v45, %v6333_v9  ;;  %v6342_v10 = vld [vmem:[#allocation2 + $0x118] sm:$0xff] }
 0x571   : > { %v8449_v20 = vpack.c.bf16 %v7056_v12, %v7055_v11  ;;  %v6612_v21 = vadd.f32 %v11519_v48, %v6472_v13  ;;  %v7057_v25 = vmax.f32 %v6929_v15, 0.0  ;;  %v6474_v28 = vmul.f32 %v11515_v46, %v6334_v14  ;;  %v6732_v15 = vld [vmem:[%s10808_s24 + $0x88] sm:$0xff] }
 0x572   : > { %v7058_v26 = vmax.f32 %v6930_v16, 0.0  ;;  %v6931_v27 = vadd.f32 %v6803_v18, %v6611_v17  ;;  %v6613_v32 = vadd.f32 %v11517_v47, %v6473_v23  ;;  %v6805_v33 = vunpack.c.l.bf16 %v6728_v19 }
 0x573   : > { %7557 = vst [vmem:[%s10814_s17 + $0x50] sm:$0xff] %v8449_v20  ;;  %v6932_v31 = vadd.f32 %v6804_v22, %v6612_v21  ;;  %v6806_v34 = vunpack.c.h.bf16 %v6728_v19  ;;  %v6614_v38 = vadd.f32 %v11519_v48, %v6474_v28  ;;  %v6475_v39 = vmul.f32 %v11513_v45, %v6335_v24  ;;  %v6343_v20 = vld [vmem:[#allocation2 + $0x120] sm:$0xff] }
 0x574   : > { %v8450_v36 = vpack.c.bf16 %v7058_v26, %v7057_v25  ;;  %v7059_v37 = vmax.f32 %v6931_v27, 0.0  ;;  %v6933_v42 = vadd.f32 %v6805_v33, %v6613_v32  ;;  %v6476_v43 = vmul.f32 %v11515_v46, %v6336_v29  ;;  %v6344_v25 = vld [vmem:[#allocation2 + $0x128] sm:$0xff]  ;;  %v6733_v26 = vld [vmem:[%s10808_s24 + $0x90] sm:$0xff] }
 0x575   : > { %v7060_v41 = vmax.f32 %v6932_v31, 0.0  ;;  %v6807_v49 = vunpack.c.l.bf16 %v6729_v30  ;;  %v6934_v56 = vadd.f32 %v6806_v34, %v6614_v38  ;;  %v6615_v57 = vadd.f32 %v11517_v47, %v6475_v39  ;;  %v6345_v31 = vld [vmem:[#allocation2 + $0x130] sm:$0xff] }
 0x576   : > { %7558 = vst [vmem:[%s10814_s17 + $0x58] sm:$0xff] %v8450_v36  ;;  %v6808_v58 = vunpack.c.h.bf16 %v6729_v30  ;;  %v6477_v59 = vmul.f32 %v11513_v45, %v6337_v35  ;;  %v7061_v62 = vmax.f32 %v6933_v42, 0.0  ;;  %v6616_v63 = vadd.f32 %v11519_v48, %v6476_v43  ;;  %v6346_v36 = vld [vmem:[#allocation2 + $0x138] sm:$0xff] }
 0x577   : > { %v8451_v61 = vpack.c.bf16 %v7060_v41, %v7059_v37  ;;  %v6478_v0 = vmul.f32 %v11515_v46, %v6338_v40  ;;  %v7062_v2 = vmax.f32 %v6934_v56, 0.0  ;;  %v6935_v3 = vadd.f32 %v6807_v49, %v6615_v57  ;;  %v6734_v41 = vld [vmem:[%s10808_s24 + $0x98] sm:$0xff] }
 0x578   : > { %v6617_v52 = vadd.f32 %v11517_v47, %v6477_v59  ;;  %v6809_v4 = vunpack.c.l.bf16 %v6730_v51  ;;  %v6936_v53 = vadd.f32 %v6808_v58, %v6616_v63  ;;  %v6810_v6 = vunpack.c.h.bf16 %v6730_v51  ;;  %v6347_v56 = vld [vmem:[#allocation2 + $0x140] sm:$0xff] }
 0x579   : > { %7559 = vst [vmem:[%s10814_s17 + $0x60] sm:$0xff] %v8451_v61  ;;  %v6618_v5 = vadd.f32 %v11519_v48, %v6478_v0  ;;  %v6479_v7 = vmul.f32 %v11513_v45, %v6339_v60  ;;  %v8452_v54 = vpack.c.bf16 %v7062_v2, %v7061_v62  ;;  %v7063_v50 = vmax.f32 %v6935_v3, 0.0  ;;  %v6348_v61 = vld [vmem:[#allocation2 + $0x148] sm:$0xff] }
 0x57a   : > { %v6937_v55 = vadd.f32 %v6809_v4, %v6617_v52  ;;  %v6480_v9 = vmul.f32 %v11515_v46, %v6340_v1  ;;  %v7064_v11 = vmax.f32 %v6936_v53, 0.0  ;;  %v6811_v14 = vunpack.c.l.bf16 %v6731_v44  ;;  %v6735_v2 = vld [vmem:[%s10808_s24 + $0xa0] sm:$0xff]  ;;  %v6349_v53 = vld [vmem:[#allocation2 + $0x150] sm:$0xff] }
 0x57b   : > { %v6938_v12 = vadd.f32 %v6810_v6, %v6618_v5  ;;  %v6619_v13 = vadd.f32 %v11517_v47, %v6479_v7  ;;  %7560 = vst [vmem:[%s10814_s17 + $0x68] sm:$0xff] %v8452_v54  ;;  %v6812_v18 = vunpack.c.h.bf16 %v6731_v44  ;;  %v6481_v19 = vmul.f32 %v11513_v45, %v6341_v8  ;;  %v6350_v54 = vld [vmem:[#allocation2 + $0x158] sm:$0xff] }
 0x57c   : > { %v7065_v16 = vmax.f32 %v6937_v55, 0.0  ;;  %v6620_v17 = vadd.f32 %v11519_v48, %v6480_v9  ;;  %v8453_v21 = vpack.c.bf16 %v7064_v11, %v7063_v50  ;;  %v6482_v24 = vmul.f32 %v11515_v46, %v6342_v10  ;;  %v6736_v11 = vld [vmem:[%s10808_s24 + $0xa8] sm:$0xff] }
 0x57d   : > { %v7066_v22 = vmax.f32 %v6938_v12, 0.0  ;;  %v6939_v23 = vadd.f32 %v6811_v14, %v6619_v13  ;;  %v6621_v28 = vadd.f32 %v11517_v47, %v6481_v19  ;;  %v6813_v29 = vunpack.c.l.bf16 %v6732_v15 }
 0x57e   : > { %v6940_v27 = vadd.f32 %v6812_v18, %v6620_v17  ;;  %v6814_v30 = vunpack.c.h.bf16 %v6732_v15  ;;  %7561 = vst [vmem:[%s10814_s17 + $0x70] sm:$0xff] %v8453_v21  ;;  %v6622_v34 = vadd.f32 %v11519_v48, %v6482_v24  ;;  %v6483_v35 = vmul.f32 %v11513_v45, %v6343_v20  ;;  %v6352_v21 = vld [vmem:[#allocation2 + $0x168] sm:$0xff] }
 0x57f   : > { %v8454_v32 = vpack.c.bf16 %v7066_v22, %v7065_v16  ;;  %v7067_v33 = vmax.f32 %v6939_v23, 0.0  ;;  %v6941_v38 = vadd.f32 %v6813_v29, %v6621_v28  ;;  %v6484_v39 = vmul.f32 %v11515_v46, %v6344_v25  ;;  %v6351_v16 = vld [vmem:[#allocation2 + $0x160] sm:$0xff]  ;;  %v6737_v22 = vld [vmem:[%s10808_s24 + $0xb0] sm:$0xff] }
 0x580   : > { %v7068_v37 = vmax.f32 %v6940_v27, 0.0  ;;  %v6815_v40 = vunpack.c.l.bf16 %v6733_v26  ;;  %v6942_v42 = vadd.f32 %v6814_v30, %v6622_v34  ;;  %v6623_v43 = vadd.f32 %v11517_v47, %v6483_v35  ;;  %v6353_v27 = vld [vmem:[#allocation2 + $0x170] sm:$0xff] }
 0x581   : > { %7562 = vst [vmem:[%s10814_s17 + $0x78] sm:$0xff] %v8454_v32  ;;  %v6816_v49 = vunpack.c.h.bf16 %v6733_v26  ;;  %v6485_v51 = vmul.f32 %v11513_v45, %v6345_v31  ;;  %v7069_v58 = vmax.f32 %v6941_v38, 0.0  ;;  %v6624_v59 = vadd.f32 %v11519_v48, %v6484_v39  ;;  %v6354_v32 = vld [vmem:[#allocation2 + $0x178] sm:$0xff] }
 0x582   : > { %v8455_v57 = vpack.c.bf16 %v7068_v37, %v7067_v33  ;;  %v6486_v60 = vmul.f32 %v11515_v46, %v6346_v36  ;;  %v7070_v62 = vmax.f32 %v6942_v42, 0.0  ;;  %v6943_v63 = vadd.f32 %v6815_v40, %v6623_v43  ;;  %v6738_v37 = vld [vmem:[%s10808_s24 + $0xb8] sm:$0xff] }
 0x583   : > { %v6625_v0 = vadd.f32 %v11517_v47, %v6485_v51  ;;  %v6817_v1 = vunpack.c.l.bf16 %v6734_v41  ;;  %v6944_v3 = vadd.f32 %v6816_v49, %v6624_v59  ;;  %v6818_v4 = vunpack.c.h.bf16 %v6734_v41  ;;  %v6355_v42 = vld [vmem:[#allocation2 + $0x180] sm:$0xff] }
 0x584   : > { %7563 = vst [vmem:[%s10814_s17 + $0x80] sm:$0xff] %v8455_v57  ;;  %v6626_v52 = vadd.f32 %v11519_v48, %v6486_v60  ;;  %v6487_v44 = vmul.f32 %v11513_v45, %v6347_v56  ;;  %v8456_v5 = vpack.c.bf16 %v7070_v62, %v7069_v58  ;;  %v7071_v6 = vmax.f32 %v6943_v63, 0.0  ;;  %v6356_v57 = vld [vmem:[#allocation2 + $0x188] sm:$0xff] }
 0x585   : > { %v6945_v7 = vadd.f32 %v6817_v1, %v6625_v0  ;;  %v6488_v8 = vmul.f32 %v11515_v46, %v6348_v61  ;;  %v7072_v50 = vmax.f32 %v6944_v3, 0.0  ;;  %v6819_v10 = vunpack.c.l.bf16 %v6735_v2  ;;  %v6739_v62 = vld [vmem:[%s10808_s24 + $0xc0] sm:$0xff]  ;;  %v6357_v3 = vld [vmem:[#allocation2 + $0x190] sm:$0xff] }
 0x586   : > { %v6946_v55 = vadd.f32 %v6818_v4, %v6626_v52  ;;  %v6627_v9 = vadd.f32 %v11517_v47, %v6487_v44  ;;  %7564 = vst [vmem:[%s10814_s17 + $0x88] sm:$0xff] %v8456_v5  ;;  %v6820_v14 = vunpack.c.h.bf16 %v6735_v2  ;;  %v6489_v15 = vmul.f32 %v11513_v45, %v6349_v53  ;;  %v6358_v5 = vld [vmem:[#allocation2 + $0x198] sm:$0xff] }
 0x587   : > { %v7073_v12 = vmax.f32 %v6945_v7, 0.0  ;;  %v6628_v13 = vadd.f32 %v11519_v48, %v6488_v8  ;;  %v8457_v17 = vpack.c.bf16 %v7072_v50, %v7071_v6  ;;  %v6490_v20 = vmul.f32 %v11515_v46, %v6350_v54  ;;  %v6740_v50 = vld [vmem:[%s10808_s24 + $0xc8] sm:$0xff] }
 0x588   : > { %v7074_v18 = vmax.f32 %v6946_v55, 0.0  ;;  %v6947_v19 = vadd.f32 %v6819_v10, %v6627_v9  ;;  %v6629_v24 = vadd.f32 %v11517_v47, %v6489_v15  ;;  %v6821_v25 = vunpack.c.l.bf16 %v6736_v11 }
 0x589   : > { %v6948_v23 = vadd.f32 %v6820_v14, %v6628_v13  ;;  %v6822_v26 = vunpack.c.h.bf16 %v6736_v11  ;;  %7565 = vst [vmem:[%s10814_s17 + $0x90] sm:$0xff] %v8457_v17  ;;  %v6630_v30 = vadd.f32 %v11519_v48, %v6490_v20  ;;  %v6491_v31 = vmul.f32 %v11513_v45, %v6351_v16  ;;  %v6360_v17 = vld [vmem:[#allocation2 + $0x1a8] sm:$0xff] }
 0x58a   : > { %v8458_v28 = vpack.c.bf16 %v7074_v18, %v7073_v12  ;;  %v7075_v29 = vmax.f32 %v6947_v19, 0.0  ;;  %v6949_v34 = vadd.f32 %v6821_v25, %v6629_v24  ;;  %v6492_v35 = vmul.f32 %v11515_v46, %v6352_v21  ;;  %v6359_v12 = vld [vmem:[#allocation2 + $0x1a0] sm:$0xff]  ;;  %v6741_v18 = vld [vmem:[%s10808_s24 + $0xd0] sm:$0xff] }
 0x58b   : > { %v7076_v33 = vmax.f32 %v6948_v23, 0.0  ;;  %v6823_v36 = vunpack.c.l.bf16 %v6737_v22  ;;  %v6950_v38 = vadd.f32 %v6822_v26, %v6630_v30  ;;  %v6631_v39 = vadd.f32 %v11517_v47, %v6491_v31  ;;  %v6361_v23 = vld [vmem:[#allocation2 + $0x1b0] sm:$0xff] }
 0x58c   : > { %7566 = vst [vmem:[%s10814_s17 + $0x98] sm:$0xff] %v8458_v28  ;;  %v6824_v40 = vunpack.c.h.bf16 %v6737_v22  ;;  %v6493_v41 = vmul.f32 %v11513_v45, %v6353_v27  ;;  %v7077_v49 = vmax.f32 %v6949_v34, 0.0  ;;  %v6632_v51 = vadd.f32 %v11519_v48, %v6492_v35  ;;  %v6362_v28 = vld [vmem:[#allocation2 + $0x1b8] sm:$0xff] }
 0x58d   : > { %v8459_v43 = vpack.c.bf16 %v7076_v33, %v7075_v29  ;;  %v6494_v56 = vmul.f32 %v11515_v46, %v6354_v32  ;;  %v7078_v58 = vmax.f32 %v6950_v38, 0.0  ;;  %v6951_v59 = vadd.f32 %v6823_v36, %v6631_v39  ;;  %v6742_v33 = vld [vmem:[%s10808_s24 + $0xd8] sm:$0xff] }
 0x58e   : > { %v6633_v60 = vadd.f32 %v11517_v47, %v6493_v41  ;;  %v6825_v61 = vunpack.c.l.bf16 %v6738_v37  ;;  %v6952_v63 = vadd.f32 %v6824_v40, %v6632_v51  ;;  %v6826_v1 = vunpack.c.h.bf16 %v6738_v37  ;;  %v6363_v38 = vld [vmem:[#allocation2 + $0x1c0] sm:$0xff] }
 0x58f   : > { %7567 = vst [vmem:[%s10814_s17 + $0xa0] sm:$0xff] %v8459_v43  ;;  %v6634_v0 = vadd.f32 %v11519_v48, %v6494_v56  ;;  %v6495_v2 = vmul.f32 %v11513_v45, %v6355_v42  ;;  %v8460_v52 = vpack.c.bf16 %v7078_v58, %v7077_v49  ;;  %v7079_v4 = vmax.f32 %v6951_v59, 0.0  ;;  %v6364_v43 = vld [vmem:[#allocation2 + $0x1c8] sm:$0xff] }
 0x590   : > { %v6953_v44 = vadd.f32 %v6825_v61, %v6633_v60  ;;  %v6496_v53 = vmul.f32 %v11515_v46, %v6356_v57  ;;  %v7080_v6 = vmax.f32 %v6952_v63, 0.0  ;;  %v6827_v54 = vunpack.c.l.bf16 %v6739_v62  ;;  %v6743_v58 = vld [vmem:[%s10808_s24 + $0xe0] sm:$0xff]  ;;  %v6365_v63 = vld [vmem:[#allocation2 + $0x1d0] sm:$0xff] }
 0x591   : > { %v6954_v7 = vadd.f32 %v6826_v1, %v6634_v0  ;;  %v6635_v8 = vadd.f32 %v11517_v47, %v6495_v2  ;;  %7568 = vst [vmem:[%s10814_s17 + $0xa8] sm:$0xff] %v8460_v52  ;;  %v6828_v10 = vunpack.c.h.bf16 %v6739_v62  ;;  %v6497_v11 = vmul.f32 %v11513_v45, %v6357_v3  ;;  %v6366_v52 = vld [vmem:[#allocation2 + $0x1d8] sm:$0xff] }
 0x592   : > { %v7081_v55 = vmax.f32 %v6953_v44, 0.0  ;;  %v6636_v9 = vadd.f32 %v11519_v48, %v6496_v53  ;;  %v8461_v13 = vpack.c.bf16 %v7080_v6, %v7079_v4  ;;  %v6498_v16 = vmul.f32 %v11515_v46, %v6358_v5  ;;  %v6744_v6 = vld [vmem:[%s10808_s24 + $0xe8] sm:$0xff] }
 0x593   : > { %v7082_v14 = vmax.f32 %v6954_v7, 0.0  ;;  %v6955_v15 = vadd.f32 %v6827_v54, %v6635_v8  ;;  %v6637_v20 = vadd.f32 %v11517_v47, %v6497_v11  ;;  %v6829_v21 = vunpack.c.l.bf16 %v6740_v50 }
 0x594   : > { %v6956_v19 = vadd.f32 %v6828_v10, %v6636_v9  ;;  %v6830_v22 = vunpack.c.h.bf16 %v6740_v50  ;;  %7569 = vst [vmem:[%s10814_s17 + $0xb0] sm:$0xff] %v8461_v13  ;;  %v6638_v26 = vadd.f32 %v11519_v48, %v6498_v16  ;;  %v6499_v27 = vmul.f32 %v11513_v45, %v6359_v12  ;;  %v6368_v13 = vld [vmem:[#allocation2 + $0x1e8] sm:$0xff] }
 0x595   : > { %v8462_v24 = vpack.c.bf16 %v7082_v14, %v7081_v55  ;;  %v7083_v25 = vmax.f32 %v6955_v15, 0.0  ;;  %v6957_v30 = vadd.f32 %v6829_v21, %v6637_v20  ;;  %v6500_v31 = vmul.f32 %v11515_v46, %v6360_v17  ;;  %v6367_v55 = vld [vmem:[#allocation2 + $0x1e0] sm:$0xff]  ;;  %v6745_v14 = vld [vmem:[%s10808_s24 + $0xf0] sm:$0xff] }
 0x596   : > { %v7084_v29 = vmax.f32 %v6956_v19, 0.0  ;;  %v6831_v32 = vunpack.c.l.bf16 %v6741_v18  ;;  %v6958_v34 = vadd.f32 %v6830_v22, %v6638_v26  ;;  %v6639_v35 = vadd.f32 %v11517_v47, %v6499_v27  ;;  %v6369_v19 = vld [vmem:[#allocation2 + $0x1f0] sm:$0xff] }
 0x597   : > { %7570 = vst [vmem:[%s10814_s17 + $0xb8] sm:$0xff] %v8462_v24  ;;  %v6832_v36 = vunpack.c.h.bf16 %v6741_v18  ;;  %v6501_v37 = vmul.f32 %v11513_v45, %v6361_v23  ;;  %v7085_v40 = vmax.f32 %v6957_v30, 0.0  ;;  %v6640_v41 = vadd.f32 %v11519_v48, %v6500_v31  ;;  %v6370_v24 = vld [vmem:[#allocation2 + $0x1f8] sm:$0xff] }
 0x598   : > { %v8463_v39 = vpack.c.bf16 %v7084_v29, %v7083_v25  ;;  %v6502_v42 = vmul.f32 %v11515_v46, %v6362_v28  ;;  %v7086_v49 = vmax.f32 %v6958_v34, 0.0  ;;  %v6959_v51 = vadd.f32 %v6831_v32, %v6639_v35  ;;  %v6746_v29 = vld [vmem:[%s10808_s24 + $0xf8] sm:$0xff] }
 0x599   : > { %v6641_v56 = vadd.f32 %v11517_v47, %v6501_v37  ;;  %v6833_v57 = vunpack.c.l.bf16 %v6742_v33  ;;  %v6960_v59 = vadd.f32 %v6832_v36, %v6640_v41  ;;  %v6834_v61 = vunpack.c.h.bf16 %v6742_v33  ;;  %v6371_v34 = vld [vmem:[#allocation2 + $0x200] sm:$0xff] }
 0x59a   : > { %7571 = vst [vmem:[%s10814_s17 + $0xc0] sm:$0xff] %v8463_v39  ;;  %v6642_v60 = vadd.f32 %v11519_v48, %v6502_v42  ;;  %v6503_v62 = vmul.f32 %v11513_v45, %v6363_v38  ;;  %v8464_v0 = vpack.c.bf16 %v7086_v49, %v7085_v40  ;;  %v7087_v1 = vmax.f32 %v6959_v51, 0.0  ;;  %v6372_v39 = vld [vmem:[#allocation2 + $0x208] sm:$0xff] }
 0x59b   : > { %v6961_v2 = vadd.f32 %v6833_v57, %v6641_v56  ;;  %v6504_v3 = vmul.f32 %v11515_v46, %v6364_v43  ;;  %v7088_v4 = vmax.f32 %v6960_v59, 0.0  ;;  %v6835_v5 = vunpack.c.l.bf16 %v6743_v58  ;;  %v6747_v49 = vld [vmem:[%s10808_s24 + $0x100] sm:$0xff]  ;;  %v6373_v59 = vld [vmem:[#allocation2 + $0x210] sm:$0xff] }
 0x59c   : > { %v6962_v44 = vadd.f32 %v6834_v61, %v6642_v60  ;;  %v6643_v53 = vadd.f32 %v11517_v47, %v6503_v62  ;;  %7572 = vst [vmem:[%s10814_s17 + $0xc8] sm:$0xff] %v8464_v0  ;;  %v6836_v54 = vunpack.c.h.bf16 %v6743_v58  ;;  %v6505_v50 = vmul.f32 %v11513_v45, %v6365_v63  ;;  %v6374_v0 = vld [vmem:[#allocation2 + $0x218] sm:$0xff] }
 0x59d   : > { %v7089_v7 = vmax.f32 %v6961_v2, 0.0  ;;  %v6644_v8 = vadd.f32 %v11519_v48, %v6504_v3  ;;  %v8465_v9 = vpack.c.bf16 %v7088_v4, %v7087_v1  ;;  %v6506_v12 = vmul.f32 %v11515_v46, %v6366_v52  ;;  %v6748_v4 = vld [vmem:[%s10808_s24 + $0x108] sm:$0xff] }
 0x59e   : > { %v7090_v10 = vmax.f32 %v6962_v44, 0.0  ;;  %v6963_v11 = vadd.f32 %v6835_v5, %v6643_v53  ;;  %v6645_v16 = vadd.f32 %v11517_v47, %v6505_v50  ;;  %v6837_v17 = vunpack.c.l.bf16 %v6744_v6 }
 0x59f   : > { %v6964_v15 = vadd.f32 %v6836_v54, %v6644_v8  ;;  %v6838_v18 = vunpack.c.h.bf16 %v6744_v6  ;;  %7573 = vst [vmem:[%s10814_s17 + $0xd0] sm:$0xff] %v8465_v9  ;;  %v6646_v22 = vadd.f32 %v11519_v48, %v6506_v12  ;;  %v6507_v23 = vmul.f32 %v11513_v45, %v6367_v55  ;;  %v6376_v9 = vld [vmem:[#allocation2 + $0x228] sm:$0xff] }
 0x5a0   : > { %v8466_v20 = vpack.c.bf16 %v7090_v10, %v7089_v7  ;;  %v7091_v21 = vmax.f32 %v6963_v11, 0.0  ;;  %v6965_v26 = vadd.f32 %v6837_v17, %v6645_v16  ;;  %v6508_v27 = vmul.f32 %v11515_v46, %v6368_v13  ;;  %v6375_v7 = vld [vmem:[#allocation2 + $0x220] sm:$0xff]  ;;  %v6749_v10 = vld [vmem:[%s10808_s24 + $0x110] sm:$0xff] }
 0x5a1   : > { %v7092_v25 = vmax.f32 %v6964_v15, 0.0  ;;  %v6839_v28 = vunpack.c.l.bf16 %v6745_v14  ;;  %v6966_v30 = vadd.f32 %v6838_v18, %v6646_v22  ;;  %v6647_v31 = vadd.f32 %v11517_v47, %v6507_v23  ;;  %v6377_v15 = vld [vmem:[#allocation2 + $0x230] sm:$0xff] }
 0x5a2   : > { %7574 = vst [vmem:[%s10814_s17 + $0xd8] sm:$0xff] %v8466_v20  ;;  %v6840_v32 = vunpack.c.h.bf16 %v6745_v14  ;;  %v6509_v33 = vmul.f32 %v11513_v45, %v6369_v19  ;;  %v7093_v36 = vmax.f32 %v6965_v26, 0.0  ;;  %v6648_v37 = vadd.f32 %v11519_v48, %v6508_v27  ;;  %v6378_v20 = vld [vmem:[#allocation2 + $0x238] sm:$0xff] }
 0x5a3   : > { %v8467_v35 = vpack.c.bf16 %v7092_v25, %v7091_v21  ;;  %v6510_v38 = vmul.f32 %v11515_v46, %v6370_v24  ;;  %v7094_v40 = vmax.f32 %v6966_v30, 0.0  ;;  %v6967_v41 = vadd.f32 %v6839_v28, %v6647_v31  ;;  %v6750_v25 = vld [vmem:[%s10808_s24 + $0x118] sm:$0xff] }
 0x5a4   : > { %v6649_v42 = vadd.f32 %v11517_v47, %v6509_v33  ;;  %v6841_v43 = vunpack.c.l.bf16 %v6746_v29  ;;  %v6968_v51 = vadd.f32 %v6840_v32, %v6648_v37  ;;  %v6842_v57 = vunpack.c.h.bf16 %v6746_v29  ;;  %v6379_v30 = vld [vmem:[#allocation2 + $0x240] sm:$0xff] }
 0x5a5   : > { %7575 = vst [vmem:[%s10814_s17 + $0xe0] sm:$0xff] %v8467_v35  ;;  %v6650_v56 = vadd.f32 %v11519_v48, %v6510_v38  ;;  %v6511_v58 = vmul.f32 %v11513_v45, %v6371_v34  ;;  %v8468_v60 = vpack.c.bf16 %v7094_v40, %v7093_v36  ;;  %v7095_v61 = vmax.f32 %v6967_v41, 0.0  ;;  %v6380_v35 = vld [vmem:[#allocation2 + $0x248] sm:$0xff] }
 0x5a6   : > { %v6969_v62 = vadd.f32 %v6841_v43, %v6649_v42  ;;  %v6512_v63 = vmul.f32 %v11515_v46, %v6372_v39  ;;  %v7096_v1 = vmax.f32 %v6968_v51, 0.0  ;;  %v6843_v52 = vunpack.c.l.bf16 %v6747_v49  ;;  %v6751_v40 = vld [vmem:[%s10808_s24 + $0x120] sm:$0xff]  ;;  %v6381_v51 = vld [vmem:[#allocation2 + $0x250] sm:$0xff] }
 0x5a7   : > { %v6970_v2 = vadd.f32 %v6842_v57, %v6650_v56  ;;  %v6651_v3 = vadd.f32 %v11517_v47, %v6511_v58  ;;  %7576 = vst [vmem:[%s10814_s17 + $0xe8] sm:$0xff] %v8468_v60  ;;  %v6844_v5 = vunpack.c.h.bf16 %v6747_v49  ;;  %v6513_v6 = vmul.f32 %v11513_v45, %v6373_v59  ;;  %v6382_v60 = vld [vmem:[#allocation2 + $0x258] sm:$0xff] }
 0x5a8   : > { %v7097_v44 = vmax.f32 %v6969_v62, 0.0  ;;  %v6652_v53 = vadd.f32 %v11519_v48, %v6512_v63  ;;  %v8469_v8 = vpack.c.bf16 %v7096_v1, %v7095_v61  ;;  %v6514_v55 = vmul.f32 %v11515_v46, %v6374_v0  ;;  %v6752_v1 = vld [vmem:[%s10808_s24 + $0x128] sm:$0xff] }
 0x5a9   : > { %v7098_v54 = vmax.f32 %v6970_v2, 0.0  ;;  %v6971_v50 = vadd.f32 %v6843_v52, %v6651_v3  ;;  %v6653_v12 = vadd.f32 %v11517_v47, %v6513_v6  ;;  %v6845_v13 = vunpack.c.l.bf16 %v6748_v4 }
 0x5aa   : > { %v6972_v11 = vadd.f32 %v6844_v5, %v6652_v53  ;;  %v6846_v14 = vunpack.c.h.bf16 %v6748_v4  ;;  %7577 = vst [vmem:[%s10814_s17 + $0xf0] sm:$0xff] %v8469_v8  ;;  %v6654_v18 = vadd.f32 %v11519_v48, %v6514_v55  ;;  %v6515_v19 = vmul.f32 %v11513_v45, %v6375_v7  ;;  %v6384_v8 = vld [vmem:[#allocation2 + $0x268] sm:$0xff] }
 0x5ab   : > { %v8470_v16 = vpack.c.bf16 %v7098_v54, %v7097_v44  ;;  %v7099_v17 = vmax.f32 %v6971_v50, 0.0  ;;  %v6973_v22 = vadd.f32 %v6845_v13, %v6653_v12  ;;  %v6516_v23 = vmul.f32 %v11515_v46, %v6376_v9  ;;  %v6383_v44 = vld [vmem:[#allocation2 + $0x260] sm:$0xff]  ;;  %v6753_v54 = vld [vmem:[%s10808_s24 + $0x130] sm:$0xff] }
 0x5ac   : > { %v7100_v21 = vmax.f32 %v6972_v11, 0.0  ;;  %v6847_v24 = vunpack.c.l.bf16 %v6749_v10  ;;  %v6974_v26 = vadd.f32 %v6846_v14, %v6654_v18  ;;  %v6655_v27 = vadd.f32 %v11517_v47, %v6515_v19  ;;  %v6385_v11 = vld [vmem:[#allocation2 + $0x270] sm:$0xff] }
 0x5ad   : > { %7578 = vst [vmem:[%s10814_s17 + $0xf8] sm:$0xff] %v8470_v16  ;;  %v6848_v28 = vunpack.c.h.bf16 %v6749_v10  ;;  %v6517_v29 = vmul.f32 %v11513_v45, %v6377_v15  ;;  %v7101_v32 = vmax.f32 %v6973_v22, 0.0  ;;  %v6656_v33 = vadd.f32 %v11519_v48, %v6516_v23  ;;  %v6386_v16 = vld [vmem:[#allocation2 + $0x278] sm:$0xff] }
 0x5ae   : > { %v8471_v31 = vpack.c.bf16 %v7100_v21, %v7099_v17  ;;  %v6518_v34 = vmul.f32 %v11515_v46, %v6378_v20  ;;  %v7102_v36 = vmax.f32 %v6974_v26, 0.0  ;;  %v6975_v37 = vadd.f32 %v6847_v24, %v6655_v27  ;;  %v6754_v21 = vld [vmem:[%s10808_s24 + $0x138] sm:$0xff] }
 0x5af   : > { %v6657_v38 = vadd.f32 %v11517_v47, %v6517_v29  ;;  %v6849_v39 = vunpack.c.l.bf16 %v6750_v25  ;;  %v6976_v41 = vadd.f32 %v6848_v28, %v6656_v33  ;;  %v6850_v43 = vunpack.c.h.bf16 %v6750_v25  ;;  %v6387_v26 = vld [vmem:[#allocation2 + $0x280] sm:$0xff] }
 0x5b0   : > { %7579 = vst [vmem:[%s10814_s17 + $0x100] sm:$0xff] %v8471_v31  ;;  %v6658_v42 = vadd.f32 %v11519_v48, %v6518_v34  ;;  %v6519_v49 = vmul.f32 %v11513_v45, %v6379_v30  ;;  %v8472_v56 = vpack.c.bf16 %v7102_v36, %v7101_v32  ;;  %v7103_v57 = vmax.f32 %v6975_v37, 0.0  ;;  %v6388_v31 = vld [vmem:[#allocation2 + $0x288] sm:$0xff] }
 0x5b1   : > { %v6977_v58 = vadd.f32 %v6849_v39, %v6657_v38  ;;  %v6520_v59 = vmul.f32 %v11515_v46, %v6380_v35  ;;  %v7104_v61 = vmax.f32 %v6976_v41, 0.0  ;;  %v6851_v0 = vunpack.c.l.bf16 %v6751_v40  ;;  %v6755_v36 = vld [vmem:[%s10808_s24 + $0x140] sm:$0xff]  ;;  %v6389_v41 = vld [vmem:[#allocation2 + $0x290] sm:$0xff] }
 0x5b2   : > { %v6978_v62 = vadd.f32 %v6850_v43, %v6658_v42  ;;  %v6659_v63 = vadd.f32 %v11517_v47, %v6519_v49  ;;  %7580 = vst [vmem:[%s10814_s17 + $0x108] sm:$0xff] %v8472_v56  ;;  %v6852_v52 = vunpack.c.h.bf16 %v6751_v40  ;;  %v6521_v4 = vmul.f32 %v11513_v45, %v6381_v51  ;;  %v6390_v56 = vld [vmem:[#allocation2 + $0x298] sm:$0xff] }
 0x5b3   : > { %v7105_v2 = vmax.f32 %v6977_v58, 0.0  ;;  %v6660_v3 = vadd.f32 %v11519_v48, %v6520_v59  ;;  %v8473_v53 = vpack.c.bf16 %v7104_v61, %v7103_v57  ;;  %v6522_v7 = vmul.f32 %v11515_v46, %v6382_v60  ;;  %v6756_v61 = vld [vmem:[%s10808_s24 + $0x148] sm:$0xff] }
 0x5b4   : > { %v7106_v5 = vmax.f32 %v6978_v62, 0.0  ;;  %v6979_v6 = vadd.f32 %v6851_v0, %v6659_v63  ;;  %v6661_v55 = vadd.f32 %v11517_v47, %v6521_v4  ;;  %v6853_v9 = vunpack.c.l.bf16 %v6752_v1 }
 0x5b5   : > { %v6980_v50 = vadd.f32 %v6852_v52, %v6660_v3  ;;  %v6854_v10 = vunpack.c.h.bf16 %v6752_v1  ;;  %7581 = vst [vmem:[%s10814_s17 + $0x110] sm:$0xff] %v8473_v53  ;;  %v6662_v14 = vadd.f32 %v11519_v48, %v6522_v7  ;;  %v6523_v15 = vmul.f32 %v11513_v45, %v6383_v44  ;;  %v6392_v53 = vld [vmem:[#allocation2 + $0x2a8] sm:$0xff] }
 0x5b6   : > { %v8474_v12 = vpack.c.bf16 %v7106_v5, %v7105_v2  ;;  %v7107_v13 = vmax.f32 %v6979_v6, 0.0  ;;  %v6981_v18 = vadd.f32 %v6853_v9, %v6661_v55  ;;  %v6524_v19 = vmul.f32 %v11515_v46, %v6384_v8  ;;  %v6391_v2 = vld [vmem:[#allocation2 + $0x2a0] sm:$0xff]  ;;  %v6757_v5 = vld [vmem:[%s10808_s24 + $0x150] sm:$0xff] }
 0x5b7   : > { %v7108_v17 = vmax.f32 %v6980_v50, 0.0  ;;  %v6855_v20 = vunpack.c.l.bf16 %v6753_v54  ;;  %v6982_v22 = vadd.f32 %v6854_v10, %v6662_v14  ;;  %v6663_v23 = vadd.f32 %v11517_v47, %v6523_v15  ;;  %v6393_v50 = vld [vmem:[#allocation2 + $0x2b0] sm:$0xff] }
 0x5b8   : > { %7582 = vst [vmem:[%s10814_s17 + $0x118] sm:$0xff] %v8474_v12  ;;  %v6856_v24 = vunpack.c.h.bf16 %v6753_v54  ;;  %v6525_v25 = vmul.f32 %v11513_v45, %v6385_v11  ;;  %v7109_v28 = vmax.f32 %v6981_v18, 0.0  ;;  %v6664_v29 = vadd.f32 %v11519_v48, %v6524_v19  ;;  %v6394_v12 = vld [vmem:[#allocation2 + $0x2b8] sm:$0xff] }
 0x5b9   : > { %v8475_v27 = vpack.c.bf16 %v7108_v17, %v7107_v13  ;;  %v6526_v30 = vmul.f32 %v11515_v46, %v6386_v16  ;;  %v7110_v32 = vmax.f32 %v6982_v22, 0.0  ;;  %v6983_v33 = vadd.f32 %v6855_v20, %v6663_v23  ;;  %v6758_v17 = vld [vmem:[%s10808_s24 + $0x158] sm:$0xff] }
 0x5ba   : > { %v6665_v34 = vadd.f32 %v11517_v47, %v6525_v25  ;;  %v6857_v35 = vunpack.c.l.bf16 %v6754_v21  ;;  %v6984_v37 = vadd.f32 %v6856_v24, %v6664_v29  ;;  %v6858_v39 = vunpack.c.h.bf16 %v6754_v21  ;;  %v6395_v22 = vld [vmem:[#allocation2 + $0x2c0] sm:$0xff] }
 0x5bb   : > { %7583 = vst [vmem:[%s10814_s17 + $0x120] sm:$0xff] %v8475_v27  ;;  %v6666_v38 = vadd.f32 %v11519_v48, %v6526_v30  ;;  %v6527_v40 = vmul.f32 %v11513_v45, %v6387_v26  ;;  %v8476_v42 = vpack.c.bf16 %v7110_v32, %v7109_v28  ;;  %v7111_v43 = vmax.f32 %v6983_v33, 0.0  ;;  %v6396_v27 = vld [vmem:[#allocation2 + $0x2c8] sm:$0xff] }
 0x5bc   : > { %v6985_v49 = vadd.f32 %v6857_v35, %v6665_v34  ;;  %v6528_v51 = vmul.f32 %v11515_v46, %v6388_v31  ;;  %v7112_v57 = vmax.f32 %v6984_v37, 0.0  ;;  %v6859_v60 = vunpack.c.l.bf16 %v6755_v36  ;;  %v6759_v32 = vld [vmem:[%s10808_s24 + $0x160] sm:$0xff]  ;;  %v6397_v37 = vld [vmem:[#allocation2 + $0x2d0] sm:$0xff] }
 0x5bd   : > { %v6986_v58 = vadd.f32 %v6858_v39, %v6666_v38  ;;  %v6667_v59 = vadd.f32 %v11517_v47, %v6527_v40  ;;  %7584 = vst [vmem:[%s10814_s17 + $0x128] sm:$0xff] %v8476_v42  ;;  %v6860_v0 = vunpack.c.h.bf16 %v6755_v36  ;;  %v6529_v1 = vmul.f32 %v11513_v45, %v6389_v41  ;;  %v6398_v42 = vld [vmem:[#allocation2 + $0x2d8] sm:$0xff] }
 0x5be   : > { %v7113_v62 = vmax.f32 %v6985_v49, 0.0  ;;  %v6668_v63 = vadd.f32 %v11519_v48, %v6528_v51  ;;  %v8477_v3 = vpack.c.bf16 %v7112_v57, %v7111_v43  ;;  %v6530_v44 = vmul.f32 %v11515_v46, %v6390_v56  ;;  %v6760_v57 = vld [vmem:[%s10808_s24 + $0x168] sm:$0xff] }
 0x5bf   : > { %v7114_v52 = vmax.f32 %v6986_v58, 0.0  ;;  %v6987_v4 = vadd.f32 %v6859_v60, %v6667_v59  ;;  %v6669_v7 = vadd.f32 %v11517_v47, %v6529_v1  ;;  %v6861_v8 = vunpack.c.l.bf16 %v6756_v61 }
 0x5c0   : > { %v6988_v6 = vadd.f32 %v6860_v0, %v6668_v63  ;;  %v6862_v54 = vunpack.c.h.bf16 %v6756_v61  ;;  %7585 = vst [vmem:[%s10814_s17 + $0x130] sm:$0xff] %v8477_v3  ;;  %v6670_v10 = vadd.f32 %v11519_v48, %v6530_v44  ;;  %v6531_v11 = vmul.f32 %v11513_v45, %v6391_v2  ;;  %v6400_v3 = vld [vmem:[#allocation2 + $0x2e8] sm:$0xff] }
 0x5c1   : > { %v8478_v55 = vpack.c.bf16 %v7114_v52, %v7113_v62  ;;  %v7115_v9 = vmax.f32 %v6987_v4, 0.0  ;;  %v6989_v14 = vadd.f32 %v6861_v8, %v6669_v7  ;;  %v6532_v15 = vmul.f32 %v11515_v46, %v6392_v53  ;;  %v6399_v62 = vld [vmem:[#allocation2 + $0x2e0] sm:$0xff]  ;;  %v6761_v52 = vld [vmem:[%s10808_s24 + $0x170] sm:$0xff] }
 0x5c2   : > { %v7116_v13 = vmax.f32 %v6988_v6, 0.0  ;;  %v6863_v16 = vunpack.c.l.bf16 %v6757_v5  ;;  %v6990_v18 = vadd.f32 %v6862_v54, %v6670_v10  ;;  %v6671_v19 = vadd.f32 %v11517_v47, %v6531_v11  ;;  %v6401_v6 = vld [vmem:[#allocation2 + $0x2f0] sm:$0xff] }
 0x5c3   : > { %7586 = vst [vmem:[%s10814_s17 + $0x138] sm:$0xff] %v8478_v55  ;;  %v6864_v20 = vunpack.c.h.bf16 %v6757_v5  ;;  %v6533_v21 = vmul.f32 %v11513_v45, %v6393_v50  ;;  %v7117_v24 = vmax.f32 %v6989_v14, 0.0  ;;  %v6672_v25 = vadd.f32 %v11519_v48, %v6532_v15  ;;  %v6402_v55 = vld [vmem:[#allocation2 + $0x2f8] sm:$0xff] }
 0x5c4   : > { %v8479_v23 = vpack.c.bf16 %v7116_v13, %v7115_v9  ;;  %v6534_v26 = vmul.f32 %v11515_v46, %v6394_v12  ;;  %v7118_v28 = vmax.f32 %v6990_v18, 0.0  ;;  %v6991_v29 = vadd.f32 %v6863_v16, %v6671_v19  ;;  %v6762_v13 = vld [vmem:[%s10808_s24 + $0x178] sm:$0xff] }
 0x5c5   : > { %v6673_v30 = vadd.f32 %v11517_v47, %v6533_v21  ;;  %v6865_v31 = vunpack.c.l.bf16 %v6758_v17  ;;  %v6992_v33 = vadd.f32 %v6864_v20, %v6672_v25  ;;  %v6866_v35 = vunpack.c.h.bf16 %v6758_v17  ;;  %v6403_v18 = vld [vmem:[#allocation2 + $0x300] sm:$0xff] }
 0x5c6   : > { %7587 = vst [vmem:[%s10814_s17 + $0x140] sm:$0xff] %v8479_v23  ;;  %v6674_v34 = vadd.f32 %v11519_v48, %v6534_v26  ;;  %v6535_v36 = vmul.f32 %v11513_v45, %v6395_v22  ;;  %v8480_v38 = vpack.c.bf16 %v7118_v28, %v7117_v24  ;;  %v7119_v39 = vmax.f32 %v6991_v29, 0.0  ;;  %v6404_v23 = vld [vmem:[#allocation2 + $0x308] sm:$0xff] }
 0x5c7   : > { %v6993_v40 = vadd.f32 %v6865_v31, %v6673_v30  ;;  %v6536_v41 = vmul.f32 %v11515_v46, %v6396_v27  ;;  %v7120_v43 = vmax.f32 %v6992_v33, 0.0  ;;  %v6867_v56 = vunpack.c.l.bf16 %v6759_v32  ;;  %v6763_v28 = vld [vmem:[%s10808_s24 + $0x180] sm:$0xff]  ;;  %v6405_v33 = vld [vmem:[#allocation2 + $0x310] sm:$0xff] }
 0x5c8   : > { %v6994_v49 = vadd.f32 %v6866_v35, %v6674_v34  ;;  %v6675_v51 = vadd.f32 %v11517_v47, %v6535_v36  ;;  %7588 = vst [vmem:[%s10814_s17 + $0x148] sm:$0xff] %v8480_v38  ;;  %v6868_v60 = vunpack.c.h.bf16 %v6759_v32  ;;  %v6537_v61 = vmul.f32 %v11513_v45, %v6397_v37  ;;  %v6406_v38 = vld [vmem:[#allocation2 + $0x318] sm:$0xff] }
 0x5c9   : > { %v7121_v58 = vmax.f32 %v6993_v40, 0.0  ;;  %v6676_v59 = vadd.f32 %v11519_v48, %v6536_v41  ;;  %v8481_v63 = vpack.c.bf16 %v7120_v43, %v7119_v39  ;;  %v6538_v2 = vmul.f32 %v11515_v46, %v6398_v42  ;;  %v6764_v43 = vld [vmem:[%s10808_s24 + $0x188] sm:$0xff] }
 0x5ca   : > { %v7122_v0 = vmax.f32 %v6994_v49, 0.0  ;;  %v6995_v1 = vadd.f32 %v6867_v56, %v6675_v51  ;;  %v6677_v44 = vadd.f32 %v11517_v47, %v6537_v61  ;;  %v6869_v53 = vunpack.c.l.bf16 %v6760_v57 }
 0x5cb   : > { %v6996_v4 = vadd.f32 %v6868_v60, %v6676_v59  ;;  %v6870_v5 = vunpack.c.h.bf16 %v6760_v57  ;;  %7589 = vst [vmem:[%s10814_s17 + $0x150] sm:$0xff] %v8481_v63  ;;  %v6678_v54 = vadd.f32 %v11519_v48, %v6538_v2  ;;  %v6539_v50 = vmul.f32 %v11513_v45, %v6399_v62  ;;  %v6408_v63 = vld [vmem:[#allocation2 + $0x328] sm:$0xff] }
 0x5cc   : > { %v8482_v7 = vpack.c.bf16 %v7122_v0, %v7121_v58  ;;  %v7123_v8 = vmax.f32 %v6995_v1, 0.0  ;;  %v6997_v10 = vadd.f32 %v6869_v53, %v6677_v44  ;;  %v6540_v11 = vmul.f32 %v11515_v46, %v6400_v3  ;;  %v6407_v58 = vld [vmem:[#allocation2 + $0x320] sm:$0xff]  ;;  %v6765_v0 = vld [vmem:[%s10808_s24 + $0x190] sm:$0xff] }
 0x5cd   : > { %v7124_v9 = vmax.f32 %v6996_v4, 0.0  ;;  %v6871_v12 = vunpack.c.l.bf16 %v6761_v52  ;;  %v6998_v14 = vadd.f32 %v6870_v5, %v6678_v54  ;;  %v6679_v15 = vadd.f32 %v11517_v47, %v6539_v50  ;;  %v6409_v4 = vld [vmem:[#allocation2 + $0x330] sm:$0xff] }
 0x5ce   : > { %7590 = vst [vmem:[%s10814_s17 + $0x158] sm:$0xff] %v8482_v7  ;;  %v6872_v16 = vunpack.c.h.bf16 %v6761_v52  ;;  %v6541_v17 = vmul.f32 %v11513_v45, %v6401_v6  ;;  %v7125_v20 = vmax.f32 %v6997_v10, 0.0  ;;  %v6680_v21 = vadd.f32 %v11519_v48, %v6540_v11  ;;  %v6410_v7 = vld [vmem:[#allocation2 + $0x338] sm:$0xff] }
 0x5cf   : > { %v8483_v19 = vpack.c.bf16 %v7124_v9, %v7123_v8  ;;  %v6542_v22 = vmul.f32 %v11515_v46, %v6402_v55  ;;  %v7126_v24 = vmax.f32 %v6998_v14, 0.0  ;;  %v6999_v25 = vadd.f32 %v6871_v12, %v6679_v15  ;;  %v6766_v9 = vld [vmem:[%s10808_s24 + $0x198] sm:$0xff] }
 0x5d0   : > { %v6681_v26 = vadd.f32 %v11517_v47, %v6541_v17  ;;  %v6873_v27 = vunpack.c.l.bf16 %v6762_v13  ;;  %v7000_v29 = vadd.f32 %v6872_v16, %v6680_v21  ;;  %v6874_v31 = vunpack.c.h.bf16 %v6762_v13  ;;  %v6411_v14 = vld [vmem:[#allocation2 + $0x340] sm:$0xff] }
 0x5d1   : > { %7591 = vst [vmem:[%s10814_s17 + $0x160] sm:$0xff] %v8483_v19  ;;  %v6682_v30 = vadd.f32 %v11519_v48, %v6542_v22  ;;  %v6543_v32 = vmul.f32 %v11513_v45, %v6403_v18  ;;  %v8484_v34 = vpack.c.bf16 %v7126_v24, %v7125_v20  ;;  %v7127_v35 = vmax.f32 %v6999_v25, 0.0  ;;  %v6412_v19 = vld [vmem:[#allocation2 + $0x348] sm:$0xff] }
 0x5d2   : > { %v7001_v36 = vadd.f32 %v6873_v27, %v6681_v26  ;;  %v6544_v37 = vmul.f32 %v11515_v46, %v6404_v23  ;;  %v7128_v39 = vmax.f32 %v7000_v29, 0.0  ;;  %v6875_v42 = vunpack.c.l.bf16 %v6763_v28  ;;  %v6767_v24 = vld [vmem:[%s10808_s24 + $0x1a0] sm:$0xff]  ;;  %v6413_v29 = vld [vmem:[#allocation2 + $0x350] sm:$0xff] }
 0x5d3   : > { %v7002_v40 = vadd.f32 %v6874_v31, %v6682_v30  ;;  %v6683_v41 = vadd.f32 %v11517_v47, %v6543_v32  ;;  %7592 = vst [vmem:[%s10814_s17 + $0x168] sm:$0xff] %v8484_v34  ;;  %v6876_v56 = vunpack.c.h.bf16 %v6763_v28  ;;  %v6545_v57 = vmul.f32 %v11513_v45, %v6405_v33  ;;  %v6414_v34 = vld [vmem:[#allocation2 + $0x358] sm:$0xff] }
 0x5d4   : > { %v7129_v49 = vmax.f32 %v7001_v36, 0.0  ;;  %v6684_v51 = vadd.f32 %v11519_v48, %v6544_v37  ;;  %v8485_v59 = vpack.c.bf16 %v7128_v39, %v7127_v35  ;;  %v6546_v62 = vmul.f32 %v11515_v46, %v6406_v38  ;;  %v6768_v39 = vld [vmem:[%s10808_s24 + $0x1a8] sm:$0xff] }
 0x5d5   : > { %v7130_v60 = vmax.f32 %v7002_v40, 0.0  ;;  %v7003_v61 = vadd.f32 %v6875_v42, %v6683_v41  ;;  %v6685_v2 = vadd.f32 %v11517_v47, %v6545_v57  ;;  %v6877_v3 = vunpack.c.l.bf16 %v6764_v43 }
 0x5d6   : > { %v7004_v1 = vadd.f32 %v6876_v56, %v6684_v51  ;;  %v6878_v52 = vunpack.c.h.bf16 %v6764_v43  ;;  %7593 = vst [vmem:[%s10814_s17 + $0x170] sm:$0xff] %v8485_v59  ;;  %v6686_v5 = vadd.f32 %v11519_v48, %v6546_v62  ;;  %v6547_v6 = vmul.f32 %v11513_v45, %v6407_v58  ;;  %v6416_v59 = vld [vmem:[#allocation2 + $0x368] sm:$0xff] }
 0x5d7   : > { %v8486_v44 = vpack.c.bf16 %v7130_v60, %v7129_v49  ;;  %v7131_v53 = vmax.f32 %v7003_v61, 0.0  ;;  %v7005_v54 = vadd.f32 %v6877_v3, %v6685_v2  ;;  %v6548_v50 = vmul.f32 %v11515_v46, %v6408_v63  ;;  %v6415_v49 = vld [vmem:[#allocation2 + $0x360] sm:$0xff]  ;;  %v6769_v60 = vld [vmem:[%s10808_s24 + $0x1b0] sm:$0xff] }
 0x5d8   : > { %v7132_v8 = vmax.f32 %v7004_v1, 0.0  ;;  %v6879_v55 = vunpack.c.l.bf16 %v6765_v0  ;;  %v7006_v10 = vadd.f32 %v6878_v52, %v6686_v5  ;;  %v6687_v11 = vadd.f32 %v11517_v47, %v6547_v6  ;;  %v6417_v1 = vld [vmem:[#allocation2 + $0x370] sm:$0xff] }
 0x5d9   : > { %7594 = vst [vmem:[%s10814_s17 + $0x178] sm:$0xff] %v8486_v44  ;;  %v6880_v12 = vunpack.c.h.bf16 %v6765_v0  ;;  %v6549_v13 = vmul.f32 %v11513_v45, %v6409_v4  ;;  %v7133_v16 = vmax.f32 %v7005_v54, 0.0  ;;  %v6688_v17 = vadd.f32 %v11519_v48, %v6548_v50  ;;  %v6418_v44 = vld [vmem:[#allocation2 + $0x378] sm:$0xff] }
 0x5da   : > { %v8487_v15 = vpack.c.bf16 %v7132_v8, %v7131_v53  ;;  %v6550_v18 = vmul.f32 %v11515_v46, %v6410_v7  ;;  %v7134_v20 = vmax.f32 %v7006_v10, 0.0  ;;  %v7007_v21 = vadd.f32 %v6879_v55, %v6687_v11  ;;  %v6770_v8 = vld [vmem:[%s10808_s24 + $0x1b8] sm:$0xff] }
 0x5db   : > { %v6689_v22 = vadd.f32 %v11517_v47, %v6549_v13  ;;  %v6881_v23 = vunpack.c.l.bf16 %v6766_v9  ;;  %v7008_v25 = vadd.f32 %v6880_v12, %v6688_v17  ;;  %v6882_v27 = vunpack.c.h.bf16 %v6766_v9  ;;  %v6419_v10 = vld [vmem:[#allocation2 + $0x380] sm:$0xff] }
 0x5dc   : > { %7595 = vst [vmem:[%s10814_s17 + $0x180] sm:$0xff] %v8487_v15  ;;  %v6690_v26 = vadd.f32 %v11519_v48, %v6550_v18  ;;  %v6551_v28 = vmul.f32 %v11513_v45, %v6411_v14  ;;  %v8488_v30 = vpack.c.bf16 %v7134_v20, %v7133_v16  ;;  %v7135_v31 = vmax.f32 %v7007_v21, 0.0  ;;  %v6420_v15 = vld [vmem:[#allocation2 + $0x388] sm:$0xff] }
 0x5dd   : > { %v7009_v32 = vadd.f32 %v6881_v23, %v6689_v22  ;;  %v6552_v33 = vmul.f32 %v11515_v46, %v6412_v19  ;;  %v7136_v35 = vmax.f32 %v7008_v25, 0.0  ;;  %v6883_v38 = vunpack.c.l.bf16 %v6767_v24  ;;  %v6771_v20 = vld [vmem:[%s10808_s24 + $0x1c0] sm:$0xff]  ;;  %v6421_v25 = vld [vmem:[#allocation2 + $0x390] sm:$0xff] }
 0x5de   : > { %v7010_v36 = vadd.f32 %v6882_v27, %v6690_v26  ;;  %v6691_v37 = vadd.f32 %v11517_v47, %v6551_v28  ;;  %7596 = vst [vmem:[%s10814_s17 + $0x188] sm:$0xff] %v8488_v30  ;;  %v6884_v42 = vunpack.c.h.bf16 %v6767_v24  ;;  %v6553_v43 = vmul.f32 %v11513_v45, %v6413_v29  ;;  %v6422_v30 = vld [vmem:[#allocation2 + $0x398] sm:$0xff] }
 0x5df   : > { %v7137_v40 = vmax.f32 %v7009_v32, 0.0  ;;  %v6692_v41 = vadd.f32 %v11519_v48, %v6552_v33  ;;  %v8489_v51 = vpack.c.bf16 %v7136_v35, %v7135_v31  ;;  %v6554_v58 = vmul.f32 %v11515_v46, %v6414_v34  ;;  %v6772_v35 = vld [vmem:[%s10808_s24 + $0x1c8] sm:$0xff] }
 0x5e0   : > { %v7138_v56 = vmax.f32 %v7010_v36, 0.0  ;;  %v7011_v57 = vadd.f32 %v6883_v38, %v6691_v37  ;;  %v6693_v62 = vadd.f32 %v11517_v47, %v6553_v43  ;;  %v6885_v63 = vunpack.c.l.bf16 %v6768_v39 }
 0x5e1   : > { %v7012_v61 = vadd.f32 %v6884_v42, %v6692_v41  ;;  %v6886_v0 = vunpack.c.h.bf16 %v6768_v39  ;;  %7597 = vst [vmem:[%s10814_s17 + $0x190] sm:$0xff] %v8489_v51  ;;  %v6694_v52 = vadd.f32 %v11519_v48, %v6554_v58  ;;  %v6555_v4 = vmul.f32 %v11513_v45, %v6415_v49  ;;  %v6424_v51 = vld [vmem:[#allocation2 + $0x3a8] sm:$0xff] }
 0x5e2   : > { %v8490_v2 = vpack.c.bf16 %v7138_v56, %v7137_v40  ;;  %v7139_v3 = vmax.f32 %v7011_v57, 0.0  ;;  %v7013_v5 = vadd.f32 %v6885_v63, %v6693_v62  ;;  %v6556_v6 = vmul.f32 %v11515_v46, %v6416_v59  ;;  %v6423_v40 = vld [vmem:[#allocation2 + $0x3a0] sm:$0xff]  ;;  %v6773_v56 = vld [vmem:[%s10808_s24 + $0x1d0] sm:$0xff] }
 0x5e3   : > { %v7140_v53 = vmax.f32 %v7012_v61, 0.0  ;;  %v6887_v7 = vunpack.c.l.bf16 %v6769_v60  ;;  %v7014_v54 = vadd.f32 %v6886_v0, %v6694_v52  ;;  %v6695_v50 = vadd.f32 %v11517_v47, %v6555_v4  ;;  %v6425_v61 = vld [vmem:[#allocation2 + $0x3b0] sm:$0xff] }
 0x5e4   : > { %7598 = vst [vmem:[%s10814_s17 + $0x198] sm:$0xff] %v8490_v2  ;;  %v6888_v55 = vunpack.c.h.bf16 %v6769_v60  ;;  %v6557_v9 = vmul.f32 %v11513_v45, %v6417_v1  ;;  %v7141_v12 = vmax.f32 %v7013_v5, 0.0  ;;  %v6696_v13 = vadd.f32 %v11519_v48, %v6556_v6  ;;  %v6426_v2 = vld [vmem:[#allocation2 + $0x3b8] sm:$0xff] }
 0x5e5   : > { %v8491_v11 = vpack.c.bf16 %v7140_v53, %v7139_v3  ;;  %v6558_v14 = vmul.f32 %v11515_v46, %v6418_v44  ;;  %v7142_v16 = vmax.f32 %v7014_v54, 0.0  ;;  %v7015_v17 = vadd.f32 %v6887_v7, %v6695_v50  ;;  %v6774_v53 = vld [vmem:[%s10808_s24 + $0x1d8] sm:$0xff] }
 0x5e6   : > { %v6697_v18 = vadd.f32 %v11517_v47, %v6557_v9  ;;  %v6889_v19 = vunpack.c.l.bf16 %v6770_v8  ;;  %v7016_v21 = vadd.f32 %v6888_v55, %v6696_v13  ;;  %v6890_v23 = vunpack.c.h.bf16 %v6770_v8  ;;  %v6427_v54 = vld [vmem:[#allocation2 + $0x3c0] sm:$0xff] }
 0x5e7   : > { %7599 = vst [vmem:[%s10814_s17 + $0x1a0] sm:$0xff] %v8491_v11  ;;  %v6698_v22 = vadd.f32 %v11519_v48, %v6558_v14  ;;  %v6559_v24 = vmul.f32 %v11513_v45, %v6419_v10  ;;  %v8492_v26 = vpack.c.bf16 %v7142_v16, %v7141_v12  ;;  %v7143_v27 = vmax.f32 %v7015_v17, 0.0  ;;  %v6428_v11 = vld [vmem:[#allocation2 + $0x3c8] sm:$0xff] }
 0x5e8   : > { %v7017_v28 = vadd.f32 %v6889_v19, %v6697_v18  ;;  %v6560_v29 = vmul.f32 %v11515_v46, %v6420_v15  ;;  %v7144_v31 = vmax.f32 %v7016_v21, 0.0  ;;  %v6891_v34 = vunpack.c.l.bf16 %v6771_v20  ;;  %v6775_v16 = vld [vmem:[%s10808_s24 + $0x1e0] sm:$0xff]  ;;  %v6429_v21 = vld [vmem:[#allocation2 + $0x3d0] sm:$0xff] }
 0x5e9   : > { %v7018_v32 = vadd.f32 %v6890_v23, %v6698_v22  ;;  %v6699_v33 = vadd.f32 %v11517_v47, %v6559_v24  ;;  %7600 = vst [vmem:[%s10814_s17 + $0x1a8] sm:$0xff] %v8492_v26  ;;  %v6892_v38 = vunpack.c.h.bf16 %v6771_v20  ;;  %v6561_v39 = vmul.f32 %v11513_v45, %v6421_v25  ;;  %v6430_v26 = vld [vmem:[#allocation2 + $0x3d8] sm:$0xff] }
 0x5ea   : > { %v7145_v36 = vmax.f32 %v7017_v28, 0.0  ;;  %v6700_v37 = vadd.f32 %v11519_v48, %v6560_v29  ;;  %v8493_v41 = vpack.c.bf16 %v7144_v31, %v7143_v27  ;;  %v6562_v49 = vmul.f32 %v11515_v46, %v6422_v30  ;;  %v6776_v31 = vld [vmem:[%s10808_s24 + $0x1e8] sm:$0xff] }
 0x5eb   : > { %v7146_v42 = vmax.f32 %v7018_v32, 0.0  ;;  %v7019_v43 = vadd.f32 %v6891_v34, %v6699_v33  ;;  %v6701_v58 = vadd.f32 %v11517_v47, %v6561_v39  ;;  %v6893_v59 = vunpack.c.l.bf16 %v6772_v35 }
 0x5ec   : > { %v7020_v57 = vadd.f32 %v6892_v38, %v6700_v37  ;;  %v6894_v60 = vunpack.c.h.bf16 %v6772_v35  ;;  %7601 = vst [vmem:[%s10814_s17 + $0x1b0] sm:$0xff] %v8493_v41  ;;  %v6702_v0 = vadd.f32 %v11519_v48, %v6562_v49  ;;  %v6563_v1 = vmul.f32 %v11513_v45, %v6423_v40  ;;  %v6432_v41 = vld [vmem:[#allocation2 + $0x3e8] sm:$0xff] }
 0x5ed   : > { %v8494_v62 = vpack.c.bf16 %v7146_v42, %v7145_v36  ;;  %v7147_v63 = vmax.f32 %v7019_v43, 0.0  ;;  %v7021_v52 = vadd.f32 %v6893_v59, %v6701_v58  ;;  %v6564_v4 = vmul.f32 %v11515_v46, %v6424_v51  ;;  %v6431_v36 = vld [vmem:[#allocation2 + $0x3e0] sm:$0xff]  ;;  %v6777_v42 = vld [vmem:[%s10808_s24 + $0x1f0] sm:$0xff] }
 0x5ee   : > { %v7148_v3 = vmax.f32 %v7020_v57, 0.0  ;;  %v6895_v44 = vunpack.c.l.bf16 %v6773_v56  ;;  %v7022_v5 = vadd.f32 %v6894_v60, %v6702_v0  ;;  %v6703_v6 = vadd.f32 %v11517_v47, %v6563_v1  ;;  %v6433_v57 = vld [vmem:[#allocation2 + $0x3f0] sm:$0xff] }
 0x5ef   : > { %7602 = vst [vmem:[%s10814_s17 + $0x1b8] sm:$0xff] %v8494_v62  ;;  %v6896_v7 = vunpack.c.h.bf16 %v6773_v56  ;;  %v6565_v8 = vmul.f32 %v11513_v45, %v6425_v61  ;;  %v7149_v55 = vmax.f32 %v7021_v52, 0.0  ;;  %v6704_v9 = vadd.f32 %v11519_v48, %v6564_v4  ;;  %v6434_v62 = vld [vmem:[#allocation2 + $0x3f8] sm:$0xff] }
 0x5f0   : > { %v8495_v50 = vpack.c.bf16 %v7148_v3, %v7147_v63  ;;  %v6566_v10 = vmul.f32 %v11515_v46, %v6426_v2  ;;  %v7150_v12 = vmax.f32 %v7022_v5, 0.0  ;;  %v7023_v13 = vadd.f32 %v6895_v44, %v6703_v6  ;;  %v6778_v3 = vld [vmem:[%s10808_s24 + $0x1f8] sm:$0xff] }
 0x5f1   : > { %v6705_v14 = vadd.f32 %v11517_v47, %v6565_v8  ;;  %v6897_v15 = vunpack.c.l.bf16 %v6774_v53  ;;  %v7024_v17 = vadd.f32 %v6896_v7, %v6704_v9  ;;  %v6898_v19 = vunpack.c.h.bf16 %v6774_v53 }
 0x5f2   : > { %7603 = vst [vmem:[%s10814_s17 + $0x1c0] sm:$0xff] %v8495_v50  ;;  %v6706_v18 = vadd.f32 %v11519_v48, %v6566_v10  ;;  %v6567_v20 = vmul.f32 %v11513_v45, %v6427_v54  ;;  %v8496_v22 = vpack.c.bf16 %v7150_v12, %v7149_v55  ;;  %v7151_v23 = vmax.f32 %v7023_v13, 0.0 }
 0x5f3   : > { %v7025_v24 = vadd.f32 %v6897_v15, %v6705_v14  ;;  %v6568_v25 = vmul.f32 %v11515_v46, %v6428_v11  ;;  %v7152_v27 = vmax.f32 %v7024_v17, 0.0  ;;  %v6899_v30 = vunpack.c.l.bf16 %v6775_v16 }
 0x5f4   : > { %v7026_v28 = vadd.f32 %v6898_v19, %v6706_v18  ;;  %v6707_v29 = vadd.f32 %v11517_v47, %v6567_v20  ;;  %7604 = vst [vmem:[%s10814_s17 + $0x1c8] sm:$0xff] %v8496_v22  ;;  %v6900_v34 = vunpack.c.h.bf16 %v6775_v16  ;;  %v6569_v35 = vmul.f32 %v11513_v45, %v6429_v21 }
 0x5f5   : > { %v7153_v32 = vmax.f32 %v7025_v24, 0.0  ;;  %v6708_v33 = vadd.f32 %v11519_v48, %v6568_v25  ;;  %v8497_v37 = vpack.c.bf16 %v7152_v27, %v7151_v23  ;;  %v6570_v40 = vmul.f32 %v11515_v46, %v6430_v26 }
 0x5f6   : > { %v7154_v38 = vmax.f32 %v7026_v28, 0.0  ;;  %v7027_v39 = vadd.f32 %v6899_v30, %v6707_v29  ;;  %v6709_v49 = vadd.f32 %v11517_v47, %v6569_v35  ;;  %v6901_v51 = vunpack.c.l.bf16 %v6776_v31 }
 0x5f7   : > { %v7028_v43 = vadd.f32 %v6900_v34, %v6708_v33  ;;  %v6902_v56 = vunpack.c.h.bf16 %v6776_v31  ;;  %7605 = vst [vmem:[%s10814_s17 + $0x1d0] sm:$0xff] %v8497_v37  ;;  %v6710_v60 = vadd.f32 %v11519_v48, %v6570_v40  ;;  %v6571_v61 = vmul.f32 %v11513_v45, %v6431_v36 }
 0x5f8   : > { %v8498_v58 = vpack.c.bf16 %v7154_v38, %v7153_v32  ;;  %v7155_v59 = vmax.f32 %v7027_v39, 0.0  ;;  %v7029_v0 = vadd.f32 %v6901_v51, %v6709_v49  ;;  %v6572_v1 = vmul.f32 %v11515_v46, %v6432_v41 }
 0x5f9   : > { %v7156_v63 = vmax.f32 %v7028_v43, 0.0  ;;  %v6903_v2 = vunpack.c.l.bf16 %v6777_v42  ;;  %v7030_v52 = vadd.f32 %v6902_v56, %v6710_v60  ;;  %v6711_v4 = vadd.f32 %v11517_v47, %v6571_v61 }
 0x5fa   : > { %7606 = vst [vmem:[%s10814_s17 + $0x1d8] sm:$0xff] %v8498_v58  ;;  %v6904_v44 = vunpack.c.h.bf16 %v6777_v42  ;;  %v6573_v53 = vmul.f32 %v11513_v45, %v6433_v57  ;;  %v7157_v6 = vmax.f32 %v7029_v0, 0.0  ;;  %v6712_v7 = vadd.f32 %v11519_v48, %v6572_v1 }
 0x5fb   : > { %v8499_v5 = vpack.c.bf16 %v7156_v63, %v7155_v59  ;;  %v6574_v8 = vmul.f32 %v11515_v46, %v6434_v62  ;;  %v7158_v54 = vmax.f32 %v7030_v52, 0.0  ;;  %v7031_v50 = vadd.f32 %v6903_v2, %v6711_v4 }
 0x5fc   : > { %v6713_v55 = vadd.f32 %v11517_v47, %v6573_v53  ;;  %v6905_v9 = vunpack.c.l.bf16 %v6778_v3  ;;  %v7032_v10 = vadd.f32 %v6904_v44, %v6712_v7  ;;  %v6906_v12 = vunpack.c.h.bf16 %v6778_v3 }
 0x5fd   : > { %7607 = vst [vmem:[%s10814_s17 + $0x1e0] sm:$0xff] %v8499_v5  ;;  %v6714_v11 = vadd.f32 %v11519_v48, %v6574_v8  ;;  %v8500_v45 = vpack.c.bf16 %v7158_v54, %v7157_v6  ;;  %v7159_v13 = vmax.f32 %v7031_v50, 0.0 }
 0x5fe   : > { %v7033_v14 = vadd.f32 %v6905_v9, %v6713_v55  ;;  %v7160_v15 = vmax.f32 %v7032_v10, 0.0 }
 0x5ff   : > { %v7034_v16 = vadd.f32 %v6906_v12, %v6714_v11  ;;  %7608 = vst [vmem:[%s10814_s17 + $0x1e8] sm:$0xff] %v8500_v45 }
 0x600   : > { %v7161_v17 = vmax.f32 %v7033_v14, 0.0  ;;  %v8501_v46 = vpack.c.bf16 %v7160_v15, %v7159_v13 }
 0x601   : > { %v7162_v18 = vmax.f32 %v7034_v16, 0.0 }
 0x602   : > { %7609 = vst [vmem:[%s10814_s17 + $0x1f0] sm:$0xff] %v8501_v46 }
 0x603   : > { %v8502_v19 = vpack.c.bf16 %v7162_v18, %v7161_v17 }
 0x605   : > { %7610 = vst [vmem:[%s10814_s17 + $0x1f8] sm:$0xff] %v8502_v19 }
 0x606 PF: > { %s11916_s2 = scalar_lea.sflag [#allocation5], %s372_s27  ;;  %s12082_s10 = sld [smem:[#allocation30_spill]] }
 0x60c   : > { %p12083_p11 = scmp.ne.s32.totalorder %s12082_s10, 0 }
 0x60d   : > { %s12084_s28 = sld [smem:[#allocation22_spill]] (%p12083_p11) }
 0x60e   : > { %7618 = sbr.rel (!%p12083_p11) target bundleno = 1588 (0x634), region = 72 }
 0x613   : > { %s8424_s16 = sshll.u32 (%p12083_p11), %s12084_s28, 6 }
 0x614   : > { %s7621_s18 = ssub.s32 (%p12083_p11), 125, %s8424_s16 }
 0x615   : > { %p7622_p2 = scmp.lt.s32.totalorder %s7621_s18, 64 }
 0x617   : > { %s12119_s18 = smov (!%p7622_p2, %s7621_s18), 64 }
 0x618   : > { %s11921_s8 = sshll.u32 %s12119_s18, 7 }
 0x619   : > { %s7627_s12 = ssub.s32 8192, %s11921_s8 }
 0x61a   : > { %7628 = vsyncadd %s11916_s2, %s7627_s12  ;;  %p8427_p1 = scmp.ne.s32.totalorder %s11921_s8, 0  ;;  %s8505_s19 = sshll.u32 %s12084_s28, 13 }
 0x61b   : > { %s12085_s14 = sld [smem:[#allocation33_spill]]  ;;  %s7635_s27 = sshll.u32 %s10814_s17, 4  ;;  %s11933_s27 = int_to_ptr.vmem [resolvable:$true] %s7635_s27 }
 0x61c   : > { %s10222_s15 = scalar_lea.vmem %s11933_s27, %s11921_s8  ;;  %s10400_s24 = smov [#allocation12]  }
 0x61d   : > { %p10223_p8 = scmp.ne.s32.totalorder %s11933_s27, %s10222_s15  ;;  %s10226_s11 = sshll.u32 %s10400_s24, 4  ;;  %s10227_s11 = int_to_ptr.vmem [resolvable:$false] %s10226_s11 }
 0x61e   : > { %s10228_s7 = scalar_lea.vmem %s10227_s11, 16384  ;;  %p10229_p4 = scmp.lt.s32.totalorder %s11933_s27, %s10227_s11 }
 0x61f   : > { %p10224_p13 = pnand %p10223_p8, %p8427_p1  ;;  %p10230_p12 = scmp.lt.s32.totalorder %s10228_s7, %s10222_s15 }
 0x621   : > { %s11930_s13 = scalar_lea.hbm %s12085_s14, %s8505_s19  ;;  %p10225_p9 = pneg %p10224_p13 }
 0x622   : > { %p10231_p3 = por %p10230_p12, %p10229_p4 }
 0x624   : > { %p10232_p10 = pnand %p10231_p3, %p10225_p9 }
 0x626   : > { %10235 = shalt.err (!%p10232_p10)
}
 0x627   : > { %s10236_s17 = scalar_lea.hbm %s11930_s13, %s11921_s8  ;;  %s10240_s28 = scalar_lea.hbm %s12085_s14, 16000 }
 0x628   : > { %p10237_p7 = scmp.ne.s32.totalorder %s11930_s13, %s10236_s17  ;;  %p10241_p5 = scmp.lt.u32.totalorder %s11930_s13, %s12085_s14 }
 0x629   : > { %p10242_p11 = scmp.lt.u32.totalorder %s10240_s28, %s10236_s17  ;;  %p10244_p8 = scmp.lt.u32.totalorder %s10236_s17, %s11930_s13 }
 0x62a   : > { %p10238_p0 = pnand %p10237_p7, %p8427_p1 }
 0x62b   : > { %p10243_p2 = por %p10242_p11, %p10241_p5 }
 0x62c   : > { %p10239_p6 = pneg %p10238_p0 }
 0x62d   : > { %p10245_p13 = por %p10244_p8, %p10243_p2 }
 0x62f   : > { %p10246_p9 = pnand %p10245_p13, %p10239_p6 }
 0x631   : > { %10249 = shalt.err (!%p10246_p9)
}
 0x632   : > { %s10401_s12 = smov 128   ;;  %s10402_s19 = smov 8  }
 0x633   : > { %7641 = dma.vmem_to_hbm [thread:$0]  (%p8427_p1), %s11933_s27, %s11921_s8, %s11930_s13, %s11916_s2, %s10401_s12, %s10401_s12, %s10402_s19  }
 0x634 PF: > { %s12086_s9 = sld [smem:[#allocation19_spill]]  ;;  %s12087_s5 = sld [smem:[#allocation31_spill]] }
 0x635   : > { %p9180_p4 = scmp.ge.s32.totalorder %s10384_s6, 2 }
 0x63a   : > { %s7650_s15 = sand.u32 1, %s12086_s9   ;;  %p12088_p12 = scmp.ne.s32.totalorder %s12087_s5, 0 }
 0x63b   : > { %s7651_s24 = scalar_lea.sflag [#allocation5], %s7650_s15 }
 0x63c   : > { %p9173_p3 = pnand %p9180_p4, %p12088_p12 }
 0x63e   : > { %10327 = dma.done.wait (!%p9173_p3), %s7651_s24, 8192  }
 0x63f   : > { %10329 = vsyncadd (!%p9173_p3), %s7651_s24, 4294959104  ;;  %s25_s6 = sadd.s32 1, %s10384_s6   ;;  %s12090_s18 = sld [smem:[#allocation20_spill]] }
 0x640   : > { %p11965_p10 = scmp.ge.s32.totalorder %s25_s6, 8   ;;  %s12091_s2 = sld [smem:[#allocation28_spill]] }
 0x641   : > { %s12092_s8 = sld [smem:[#allocation25_spill]]  ;;  %s12093_s13 = sld [smem:[#allocation26_spill]] }
 0x642   : > { %s12094_s7 = sld [smem:[#allocation23_spill]]  ;;  %s12095_s17 = sld [smem:[#allocation24_spill]] }
 0x643   : > { %s12096_s19 = smov %s10340_s20  ;;  %s12098_s21 = smov %s10348_s22 }
 0x644   : > { %s12099_s22 = smov %s10352_s23  ;;  %s12101_s24 = smov %s10360_s25 }
 0x645   : > { %s12102_s25 = smov %s10364_s26  ;;  %s12104_s27 = smov %s10376_s29 }
 0x646   : > { %s12097_s20 = smov %s12091_s2  ;;  %s12105_s28 = smov %s10380_s30 }
 0x647   : > { %s12100_s23 = smov %s12092_s8  ;;  %s12103_s26 = smov %s12093_s13 }
 0x648   : > { %s12106_s29 = smov %s12094_s7  ;;  %s12107_s30 = smov %s12095_s17 }
 0x649   :  { %24 = sbr.rel (!%p11965_p10) target bundleno = 16 (0x10), region = 127 }
 0x650   :  { %7656 = vsyncpa [#allocation4], 1 }
 0x651   :  { %7658 = vsyncpa [#allocation4 + $0x1], 1 }
 0x652   :  { %7659 = vsyncpa [#allocation7], 1 }
 0x653   :  { %7661 = vsyncpa [#allocation7 + $0x1], 1 }
 0x654   :  { %7662 = vsyncpa [#allocation10], 1 }
 0x655   :  { %7663 = vsyncpa [#allocation5], 1 }
 0x656   :  { %7665 = vsyncpa [#allocation5 + $0x1], 1 }

</bundles_post_ra>
